<compile_context>
chip_gen: v7x
topology: tpu7x:2x2x1
jax: 0.10.0
libtpu: 0.0.40
codegen_flags: <defaults>
</compile_context>

<pallas_src>
import functools

import numpy as np
import jax
import jax.numpy as jnp
from jax import lax
from jax.experimental import pallas as pl
from jax.experimental.pallas import tpu as pltpu

# Model dims (from the PyTorch module)
HB = 158            # hidden bond-feature width (torch Linear(316, 158))
HBP = 256           # lane-padded feature width (multiple of 128); padded lanes stay 0
H1, H2, H3, H4 = 110, 70, 35, 1
GROUP = 8           # sublane group size for the batched neighbour gather


def _round_up(x, m):
    return (x + m - 1) // m * m


def gcn_kernel(idx_ref,                                 # fused gather rows, 1-D SMEM (prefetch)
               fbonds_ref,                              # (1, NB*MBLK, HBP) VMEM, bond-major
               w0a_ref, w0b_ref, b0_ref,                # (HBP,HBP), (HBP,HBP), (1,HBP)
               out_ref,                                 # (MBLK, HBP) pooled features
               fb, bsum,                                # VMEM scratch
               *, nb, max_nbr, mblk):
    blk = pl.program_id(0)
    k = max_nbr + 1                                     # neighbours + reverse bond
    blk_base = blk * (nb * mblk * k)

    # Working copy of this block's bond features, filled with ONE bulk assignment
    # (torch mutates f_bonds in place; the input block itself is never written back).
    fb[...] = fbonds_ref[0]

    # Each bond row is written exactly once, so the molecule readout sum(final
    # f_bonds) is accumulated on the fly instead of re-reading fb at the end.
    out_ref[...] = jnp.zeros_like(out_ref)

    bias = b0_ref[...]                                  # (1, HBP), hoisted out of the loop

    def bond_body(c, carry):
        c_base = blk_base + c * (mblk * k)

        # ---- gather: neighbour sums, GROUP molecules per iteration ----
        def group_body(g, carry2):
            m0 = pl.multiple_of(g * GROUP, GROUP)
            rows = []
            for i in range(GROUP):                      # static unroll (sublane group)
                base = c_base + (m0 + i) * k
                acc = fb[pl.ds(idx_ref[base], 1), :]
                for j in range(1, max_nbr):
                    acc = acc + fb[pl.ds(idx_ref[base + j], 1), :]
                acc = acc - fb[pl.ds(idx_ref[base + max_nbr], 1), :]   # reverse bond
                rows.append(acc)
            # one unmasked (GROUP, HBP) store instead of GROUP masked row stores
            bsum[pl.ds(m0, GROUP), :] = jnp.concatenate(rows, axis=0)
            return carry2

        lax.fori_loop(0, mblk // GROUP, group_body, 0)

        # ---- one batched MXU update for all MBLK molecules of bond c ----
        # relu(Linear(316->158)(cat(vec, bsum))) == relu(vec@W0a + bsum@W0b + b0)
        off = pl.multiple_of(c * mblk, 8)
        vec = fb[pl.ds(off, mblk), :]                   # (MBLK, HBP) contiguous slab
        h = (jnp.dot(vec, w0a_ref[...], preferred_element_type=jnp.float32)
             + jnp.dot(bsum[...], w0b_ref[...], preferred_element_type=jnp.float32)
             + bias)
        h = jnp.maximum(h, 0.0)
        # dropout (eval mode) == identity
        fb[pl.ds(off, mblk), :] = h
        out_ref[...] += h                               # running molecule readout sum
        return carry

    lax.fori_loop(0, nb, bond_body, 0)


def gcn_forward(a2b, b2a, b2revb, f_bonds, f_atoms, bond_sum, params, *, mblk=256):
    # f_atoms and bond_sum mirror the torch signature but are never read by the
    # reference forward (bond_sum is immediately overwritten with zeros).
    del f_atoms, bond_sum
    B, NB, hb = f_bonds.shape
    _, NA, MAX_NBR = a2b.shape
    assert hb == HB
    K = MAX_NBR + 1

    # MBLK sizing: >=256 on v6e/v7x (2x256x256 MXU); a multiple of 128 on v5e
    # (4x128x128 MXU).  Default is 256.  VMEM per grid step = 3 slabs of
    # NB*MBLK*HBP*4 bytes (2 input buffers + fb scratch) + weights/bsum/out;
    # drop MBLK to 128 (or remove the fb copy, see TODO) if NB is large on v7x.
    mblk = max(GROUP, _round_up(mblk, GROUP))
    assert mblk % GROUP == 0
    Bpad = _round_up(B, mblk)
    nblk = Bpad // mblk

    W0a, W0b, B0, W1, B1, W2, B2, W3, B3, W4, B4 = params

    # ---- pad feature dim 158 -> 256 with zeros (mathematically an identity) ----
    W0a_p = jnp.zeros((HBP, HBP), jnp.float32).at[:HB, :HB].set(W0a)
    W0b_p = jnp.zeros((HBP, HBP), jnp.float32).at[:HB, :HB].set(W0b)
    B0_p = jnp.zeros((1, HBP), jnp.float32).at[:, :HB].set(B0)

    fbp = jnp.zeros((Bpad, NB, HBP), jnp.float32)
    fbp = fbp.at[:B, :, :HB].set(f_bonds.astype(jnp.float32))
    # bond-major per block: row (c * MBLK + m) = molecule m of the block, bond c
    fb_blocks = (fbp.reshape(nblk, mblk, NB, HBP)
                    .transpose(0, 2, 1, 3)
                    .reshape(nblk, NB * mblk, HBP))

    # ---- fused gather-row indices precomputed in the wrapper ----
    def pad_mol(x):
        pad = ((0, Bpad - B),) + ((0, 0),) * (x.ndim - 1)
        return jnp.pad(x.astype(jnp.int32), pad)        # padded molecules use index 0 (valid,
                                                        # and row = m_local keeps them isolated)

    a2b_p, b2a_p, b2revb_p = pad_mol(a2b), pad_mol(b2a), pad_mol(b2revb)
    gath = jnp.take_along_axis(a2b_p, b2a_p[:, :, None], axis=1)       # (Bpad, NB, MAX_NBR)
    full = jnp.concatenate([gath, b2revb_p[:, :, None]], axis=-1)      # (Bpad, NB, K)
    m_local = jnp.arange(Bpad, dtype=jnp.int32) % mblk
    rows = full * mblk + m_local[:, None, None]                        # fb row = d*MBLK + m
    # kernel read order [blk, c, m, j]  ->  flat offset ((blk*NB + c)*MBLK + m)*K + j
    idx_flat = (rows.reshape(nblk, mblk, NB, K)
                    .transpose(0, 2, 1, 3)
                    .reshape(-1))
    # TODO(synk): for production B, pass this per grid step (SMEM BlockSpec indexed
    # by blk) instead of whole-table scalar prefetch (1-D SMEM pads to next_pow2(4N)).

    grid_spec = pltpu.PrefetchScalarGridSpec(
        num_scalar_prefetch=1,
        grid=(nblk,),
        in_specs=[
            pl.BlockSpec((1, NB * mblk, HBP), lambda i, *_: (i, 0, 0)),   # f_bonds block
            pl.BlockSpec((HBP, HBP), lambda i, *_: (0, 0)),               # W0a (const block)
            pl.BlockSpec((HBP, HBP), lambda i, *_: (0, 0)),               # W0b (const block)
            pl.BlockSpec((1, HBP), lambda i, *_: (0, 0)),                 # b0
        ],
        out_specs=pl.BlockSpec((mblk, HBP), lambda i, *_: (i, 0)),        # pooled features
        scratch_shapes=[
            pltpu.VMEM((NB * mblk, HBP), jnp.float32),    # fb working copy (bond-major)
            pltpu.VMEM((mblk, HBP), jnp.float32),         # neighbour-sum staging
        ],
    )

    # VMEM budget: 2 input buffers + fb scratch (+ weights/bsum/out); cap at 48 MiB
    # so it stays inside v7x's 64 MiB physical VMEM and well within v5e/v6e's 128 MiB.
    slab = NB * mblk * HBP * 4
    vmem_budget = min(48 * 1024 * 1024, max(32 * 1024 * 1024, 3 * slab + (4 << 20)))

    pooled = pl.pallas_call(
        functools.partial(gcn_kernel, nb=NB, max_nbr=MAX_NBR, mblk=mblk),
        out_shape=jax.ShapeDtypeStruct((Bpad, HBP), jnp.float32),
        grid_spec=grid_spec,
        compiler_params=pltpu.CompilerParams(
            dimension_semantics=("parallel",),            # independent molecule blocks
            vmem_limit_bytes=vmem_budget),
    )(idx_flat, fb_blocks, W0a_p, W0b_p, B0_p)

    # Readout MLP as plain batched XLA matmuls over all molecules (MXU-efficient,
    # lane-dense; no per-molecule matvecs or masked (1,1) stores inside the kernel).
    mp = pooled[:B, :HB]                                  # padded lanes/rows are exactly zero
    hp = jax.lax.Precision.HIGHEST                        # tiny matrices; cost negligible
    h1 = jax.nn.relu(jnp.dot(mp, W1, precision=hp) + B1)
    h2 = jax.nn.relu(jnp.dot(h1, W2, precision=hp) + B2)
    h3 = jax.nn.relu(jnp.dot(h2, W3, precision=hp) + B3)
    out = jnp.dot(h3, W4, precision=hp) + B4              # (B, 1)
    return out.reshape(B)                                 # matches torch.cat of per-mol preds


def init_params(key):
    """Deterministic PyTorch-style uniform(-1/sqrt(fan_in), 1/sqrt(fan_in)) init."""
    def linear(k, fan_in, fan_out):
        k1, k2 = jax.random.split(k)
        bound = 1.0 / np.sqrt(fan_in)
        w = jax.random.uniform(k1, (fan_in, fan_out), jnp.float32, -bound, bound)
        b = jax.random.uniform(k2, (1, fan_out), jnp.float32, -bound, bound)
        return w, b

    ks = jax.random.split(key, 5)
    W0, B0 = linear(ks[0], 2 * HB, HB)
    W1, B1 = linear(ks[1], HB, H1)
    W2, B2 = linear(ks[2], H1, H2)
    W3, B3 = linear(ks[3], H2, H3)
    W4, B4 = linear(ks[4], H3, H4)
    W0a, W0b = W0[:HB], W0[HB:]
    return (W0a, W0b, B0, W1, B1, W2, B2, W3, B3, W4, B4)


def gcn_reference(a2b, b2a, b2revb, f_bonds, params):
    """Pure-numpy replication of the torch forward (eval mode)."""
    W0a, W0b, B0, W1, B1, W2, B2, W3, B3, W4, B4 = params
    Bsz, NB, _ = f_bonds.shape
    MAX_NBR = a2b.shape[2]
    preds = []
    for m in range(Bsz):
        fb = f_bonds[m].astype(np.float32).copy()
        for c in range(NB):
            bsum = np.zeros(HB, np.float32)
            atom = int(b2a[m, c])
            for j in range(MAX_NBR):
                bsum = fb[int(a2b[m, atom, j])] + bsum
            bsum = bsum - fb[int(b2revb[m, c])]
            h = fb[c] @ W0a + bsum @ W0b + B0[0]
            fb[c] = np.maximum(h, 0.0)
        mp = fb.sum(axis=0)
        h1 = np.maximum(mp @ W1 + B1[0], 0.0)
        h2 = np.maximum(h1 @ W2 + B2[0], 0.0)
        h3 = np.maximum(h2 @ W3 + B3[0], 0.0)
        preds.append(h3 @ W4 + B4[0])
    return np.concatenate(preds, axis=0)


if __name__ == "__main__":
    # B chosen so Bpad/MBLK = 2 grid blocks with the real default MBLK=256
    # (even block count -> both v7x TensorCores busy), and B % MBLK != 0 so the
    # molecule-padding path is exercised too.  Per-molecule graph stays small.
    B, NB, NA, MAX_NBR = 270, 8, 8, 4

    key = jax.random.PRNGKey(0)
    k_param, k_fb, k_a2b, k_b2a, k_rev, k_fa = jax.random.split(key, 6)

    params = init_params(k_param)
    f_bonds = jax.random.normal(k_fb, (B, NB, HB), jnp.float32) * 0.5
    a2b = jax.random.randint(k_a2b, (B, NA, MAX_NBR), 0, NB, jnp.int32)
    b2a = jax.random.randint(k_b2a, (B, NB), 0, NA, jnp.int32)
    b2revb = jax.random.randint(k_rev, (B, NB), 0, NB, jnp.int32)
    f_atoms = jax.random.normal(k_fa, (B, NA, 133), jnp.float32)   # unused by forward
    bond_sum = jnp.zeros((B, HB), jnp.float32)                     # unused (overwritten)

    out = gcn_forward(a2b, b2a, b2revb, f_bonds, f_atoms, bond_sum, params)  # default MBLK=256
    out = jax.block_until_ready(out)

    ref = gcn_reference(np.asarray(a2b), np.asarray(b2a), np.asarray(b2revb),
                        np.asarray(f_bonds), [np.asarray(p) for p in params])
    # DEFAULT-precision MXU in the kernel (single-pass bf16, f32 accumulate); the
    # contracting readout keeps the per-molecule error well within 2e-2.
    np.testing.assert_allclose(np.asarray(out), ref, rtol=2e-2, atol=2e-2)
    print("KERNEL_OK")
</pallas_src>

<mosaic_0001>
module attributes {stable_mosaic.version = 11 : i64} {
  func.func @gcn_kernel(%arg0: i32, %arg1: memref<20480xi32, #tpu.memory_space<smem>>, %arg2: memref<1x2048x256xf32, #tpu.memory_space<vmem>>, %arg3: memref<256x256xf32, #tpu.memory_space<vmem>>, %arg4: memref<256x256xf32, #tpu.memory_space<vmem>>, %arg5: memref<1x256xf32, #tpu.memory_space<vmem>>, %arg6: memref<256x256xf32, #tpu.memory_space<vmem>>, %arg7: memref<2048x256xf32, #tpu.memory_space<vmem>>, %arg8: memref<256x256xf32, #tpu.memory_space<vmem>>) attributes {dimension_semantics = [#tpu.dimension_semantics<parallel>], iteration_bounds = array<i64: 2>, scalar_prefetch = 1 : i64, scratch_operands = 2 : i64, tpu.core_type = #tpu.core_type<tc>, window_params = [{transform_indices = @transform_0, window_bounds = array<i64: 1, 2048, 256>}, {pipeline_mode = #tpu.pipeline_mode<synchronous>, transform_indices = @transform_1, window_bounds = array<i64: 256, 256>}, {pipeline_mode = #tpu.pipeline_mode<synchronous>, transform_indices = @transform_2, window_bounds = array<i64: 256, 256>}, {pipeline_mode = #tpu.pipeline_mode<synchronous>, transform_indices = @transform_3, window_bounds = array<i64: 1, 256>}, {transform_indices = @transform_4, window_bounds = array<i64: 256, 256>}]} {
    %c10240_i32 = arith.constant 10240 : i32
    %0 = arith.muli %arg0, %c10240_i32 : i32
    %c0 = arith.constant 0 : index
    %c0_0 = arith.constant 0 : index
    %c0_1 = arith.constant 0 : index
    %1 = vector.load %arg2[%c0, %c0_0, %c0_1] : memref<1x2048x256xf32, #tpu.memory_space<vmem>>, vector<1x2048x256xf32>
    %2 = vector.shape_cast %1 : vector<1x2048x256xf32> to vector<2048x256xf32>
    %c0_2 = arith.constant 0 : index
    %c0_3 = arith.constant 0 : index
    %3 = vector.load %arg7[%c0_2, %c0_3] : memref<2048x256xf32, #tpu.memory_space<vmem>>, vector<2048x256xf32>
    tpu.vector_store %arg7[%c0_2, %c0_3], %2 {strides = array<i32>} : memref<2048x256xf32, #tpu.memory_space<vmem>>, vector<2048x256xf32>,
    %cst = arith.constant 0.000000e+00 : f32
    %4 = vector.broadcast %cst : f32 to vector<256x256xf32>
    %c0_4 = arith.constant 0 : index
    %c0_5 = arith.constant 0 : index
    %5 = vector.load %arg6[%c0_4, %c0_5] : memref<256x256xf32, #tpu.memory_space<vmem>>, vector<256x256xf32>
    tpu.vector_store %arg6[%c0_4, %c0_5], %4 {strides = array<i32>} : memref<256x256xf32, #tpu.memory_space<vmem>>, vector<256x256xf32>,
    %c0_6 = arith.constant 0 : index
    %c0_7 = arith.constant 0 : index
    %6 = vector.load %arg5[%c0_6, %c0_7] : memref<1x256xf32, #tpu.memory_space<vmem>>, vector<1x256xf32>
    %c0_i32 = arith.constant 0 : i32
    %c8_i32 = arith.constant 8 : i32
    %7 = arith.addi %c0_i32, %c8_i32 : i32
    %c1_i32 = arith.constant 1 : i32
    scf.for %arg9 = %c0_i32 to %7 step %c1_i32  : i32 {
      %c1280_i32 = arith.constant 1280 : i32
      %8 = arith.muli %arg9, %c1280_i32 : i32
      %9 = arith.addi %0, %8 : i32
      %c0_i32_9 = arith.constant 0 : i32
      %c32_i32 = arith.constant 32 : i32
      %10 = arith.addi %c0_i32_9, %c32_i32 : i32
      %c1_i32_10 = arith.constant 1 : i32
      scf.for %arg10 = %c0_i32_9 to %10 step %c1_i32_10  : i32 {
        %c8_i32_27 = arith.constant 8 : i32
        %30 = arith.muli %arg10, %c8_i32_27 : i32
        %31 = tpu.assume_multiple %30, 8 : i32
        %c0_i32_28 = arith.constant 0 : i32
        %32 = arith.addi %31, %c0_i32_28 : i32
        %c5_i32 = arith.constant 5 : i32
        %33 = arith.muli %32, %c5_i32 : i32
        %34 = arith.addi %9, %33 : i32
        %35 = arith.index_cast %34 : i32 to index
        %36 = memref.load %arg1[%35] : memref<20480xi32, #tpu.memory_space<smem>>
        %37 = arith.index_cast %36 : i32 to index
        %c0_29 = arith.constant 0 : index
        %38 = vector.load %arg7[%37, %c0_29] : memref<2048x256xf32, #tpu.memory_space<vmem>>, vector<1x256xf32>
        %c1_i32_30 = arith.constant 1 : i32
        %39 = arith.addi %34, %c1_i32_30 : i32
        %40 = arith.index_cast %39 : i32 to index
        %41 = memref.load %arg1[%40] : memref<20480xi32, #tpu.memory_space<smem>>
        %42 = arith.index_cast %41 : i32 to index
        %c0_31 = arith.constant 0 : index
        %43 = vector.load %arg7[%42, %c0_31] : memref<2048x256xf32, #tpu.memory_space<vmem>>, vector<1x256xf32>
        %44 = arith.addf %38, %43 : vector<1x256xf32>
        %c2_i32 = arith.constant 2 : i32
        %45 = arith.addi %34, %c2_i32 : i32
        %46 = arith.index_cast %45 : i32 to index
        %47 = memref.load %arg1[%46] : memref<20480xi32, #tpu.memory_space<smem>>
        %48 = arith.index_cast %47 : i32 to index
        %c0_32 = arith.constant 0 : index
        %49 = vector.load %arg7[%48, %c0_32] : memref<2048x256xf32, #tpu.memory_space<vmem>>, vector<1x256xf32>
        %50 = arith.addf %44, %49 : vector<1x256xf32>
        %c3_i32 = arith.constant 3 : i32
        %51 = arith.addi %34, %c3_i32 : i32
        %52 = arith.index_cast %51 : i32 to index
        %53 = memref.load %arg1[%52] : memref<20480xi32, #tpu.memory_space<smem>>
        %54 = arith.index_cast %53 : i32 to index
        %c0_33 = arith.constant 0 : index
        %55 = vector.load %arg7[%54, %c0_33] : memref<2048x256xf32, #tpu.memory_space<vmem>>, vector<1x256xf32>
        %56 = arith.addf %50, %55 : vector<1x256xf32>
        %c4_i32 = arith.constant 4 : i32
        %57 = arith.addi %34, %c4_i32 : i32
        %58 = arith.index_cast %57 : i32 to index
        %59 = memref.load %arg1[%58] : memref<20480xi32, #tpu.memory_space<smem>>
        %60 = arith.index_cast %59 : i32 to index
        %c0_34 = arith.constant 0 : index
        %61 = vector.load %arg7[%60, %c0_34] : memref<2048x256xf32, #tpu.memory_space<vmem>>, vector<1x256xf32>
        %62 = arith.subf %56, %61 : vector<1x256xf32>
        %c1_i32_35 = arith.constant 1 : i32
        %63 = arith.addi %31, %c1_i32_35 : i32
        %c5_i32_36 = arith.constant 5 : i32
        %64 = arith.muli %63, %c5_i32_36 : i32
        %65 = arith.addi %9, %64 : i32
        %66 = arith.index_cast %65 : i32 to index
        %67 = memref.load %arg1[%66] : memref<20480xi32, #tpu.memory_space<smem>>
        %68 = arith.index_cast %67 : i32 to index
        %c0_37 = arith.constant 0 : index
        %69 = vector.load %arg7[%68, %c0_37] : memref<2048x256xf32, #tpu.memory_space<vmem>>, vector<1x256xf32>
        %c1_i32_38 = arith.constant 1 : i32
        %70 = arith.addi %65, %c1_i32_38 : i32
        %71 = arith.index_cast %70 : i32 to index
        %72 = memref.load %arg1[%71] : memref<20480xi32, #tpu.memory_space<smem>>
        %73 = arith.index_cast %72 : i32 to index
        %c0_39 = arith.constant 0 : index
        %74 = vector.load %arg7[%73, %c0_39] : memref<2048x256xf32, #tpu.memory_space<vmem>>, vector<1x256xf32>
        %75 = arith.addf %69, %74 : vector<1x256xf32>
        %c2_i32_40 = arith.constant 2 : i32
        %76 = arith.addi %65, %c2_i32_40 : i32
        %77 = arith.index_cast %76 : i32 to index
        %78 = memref.load %arg1[%77] : memref<20480xi32, #tpu.memory_space<smem>>
        %79 = arith.index_cast %78 : i32 to index
        %c0_41 = arith.constant 0 : index
        %80 = vector.load %arg7[%79, %c0_41] : memref<2048x256xf32, #tpu.memory_space<vmem>>, vector<1x256xf32>
        %81 = arith.addf %75, %80 : vector<1x256xf32>
        %c3_i32_42 = arith.constant 3 : i32
        %82 = arith.addi %65, %c3_i32_42 : i32
        %83 = arith.index_cast %82 : i32 to index
        %84 = memref.load %arg1[%83] : memref<20480xi32, #tpu.memory_space<smem>>
        %85 = arith.index_cast %84 : i32 to index
        %c0_43 = arith.constant 0 : index
        %86 = vector.load %arg7[%85, %c0_43] : memref<2048x256xf32, #tpu.memory_space<vmem>>, vector<1x256xf32>
        %87 = arith.addf %81, %86 : vector<1x256xf32>
        %c4_i32_44 = arith.constant 4 : i32
        %88 = arith.addi %65, %c4_i32_44 : i32
        %89 = arith.index_cast %88 : i32 to index
        %90 = memref.load %arg1[%89] : memref<20480xi32, #tpu.memory_space<smem>>
        %91 = arith.index_cast %90 : i32 to index
        %c0_45 = arith.constant 0 : index
        %92 = vector.load %arg7[%91, %c0_45] : memref<2048x256xf32, #tpu.memory_space<vmem>>, vector<1x256xf32>
        %93 = arith.subf %87, %92 : vector<1x256xf32>
        %c2_i32_46 = arith.constant 2 : i32
        %94 = arith.addi %31, %c2_i32_46 : i32
        %c5_i32_47 = arith.constant 5 : i32
        %95 = arith.muli %94, %c5_i32_47 : i32
        %96 = arith.addi %9, %95 : i32
        %97 = arith.index_cast %96 : i32 to index
        %98 = memref.load %arg1[%97] : memref<20480xi32, #tpu.memory_space<smem>>
        %99 = arith.index_cast %98 : i32 to index
        %c0_48 = arith.constant 0 : index
        %100 = vector.load %arg7[%99, %c0_48] : memref<2048x256xf32, #tpu.memory_space<vmem>>, vector<1x256xf32>
        %c1_i32_49 = arith.constant 1 : i32
        %101 = arith.addi %96, %c1_i32_49 : i32
        %102 = arith.index_cast %101 : i32 to index
        %103 = memref.load %arg1[%102] : memref<20480xi32, #tpu.memory_space<smem>>
        %104 = arith.index_cast %103 : i32 to index
        %c0_50 = arith.constant 0 : index
        %105 = vector.load %arg7[%104, %c0_50] : memref<2048x256xf32, #tpu.memory_space<vmem>>, vector<1x256xf32>
        %106 = arith.addf %100, %105 : vector<1x256xf32>
        %c2_i32_51 = arith.constant 2 : i32
        %107 = arith.addi %96, %c2_i32_51 : i32
        %108 = arith.index_cast %107 : i32 to index
        %109 = memref.load %arg1[%108] : memref<20480xi32, #tpu.memory_space<smem>>
        %110 = arith.index_cast %109 : i32 to index
        %c0_52 = arith.constant 0 : index
        %111 = vector.load %arg7[%110, %c0_52] : memref<2048x256xf32, #tpu.memory_space<vmem>>, vector<1x256xf32>
        %112 = arith.addf %106, %111 : vector<1x256xf32>
        %c3_i32_53 = arith.constant 3 : i32
        %113 = arith.addi %96, %c3_i32_53 : i32
        %114 = arith.index_cast %113 : i32 to index
        %115 = memref.load %arg1[%114] : memref<20480xi32, #tpu.memory_space<smem>>
        %116 = arith.index_cast %115 : i32 to index
        %c0_54 = arith.constant 0 : index
        %117 = vector.load %arg7[%116, %c0_54] : memref<2048x256xf32, #tpu.memory_space<vmem>>, vector<1x256xf32>
        %118 = arith.addf %112, %117 : vector<1x256xf32>
        %c4_i32_55 = arith.constant 4 : i32
        %119 = arith.addi %96, %c4_i32_55 : i32
        %120 = arith.index_cast %119 : i32 to index
        %121 = memref.load %arg1[%120] : memref<20480xi32, #tpu.memory_space<smem>>
        %122 = arith.index_cast %121 : i32 to index
        %c0_56 = arith.constant 0 : index
        %123 = vector.load %arg7[%122, %c0_56] : memref<2048x256xf32, #tpu.memory_space<vmem>>, vector<1x256xf32>
        %124 = arith.subf %118, %123 : vector<1x256xf32>
        %c3_i32_57 = arith.constant 3 : i32
        %125 = arith.addi %31, %c3_i32_57 : i32
        %c5_i32_58 = arith.constant 5 : i32
        %126 = arith.muli %125, %c5_i32_58 : i32
        %127 = arith.addi %9, %126 : i32
        %128 = arith.index_cast %127 : i32 to index
        %129 = memref.load %arg1[%128] : memref<20480xi32, #tpu.memory_space<smem>>
        %130 = arith.index_cast %129 : i32 to index
        %c0_59 = arith.constant 0 : index
        %131 = vector.load %arg7[%130, %c0_59] : memref<2048x256xf32, #tpu.memory_space<vmem>>, vector<1x256xf32>
        %c1_i32_60 = arith.constant 1 : i32
        %132 = arith.addi %127, %c1_i32_60 : i32
        %133 = arith.index_cast %132 : i32 to index
        %134 = memref.load %arg1[%133] : memref<20480xi32, #tpu.memory_space<smem>>
        %135 = arith.index_cast %134 : i32 to index
        %c0_61 = arith.constant 0 : index
        %136 = vector.load %arg7[%135, %c0_61] : memref<2048x256xf32, #tpu.memory_space<vmem>>, vector<1x256xf32>
        %137 = arith.addf %131, %136 : vector<1x256xf32>
        %c2_i32_62 = arith.constant 2 : i32
        %138 = arith.addi %127, %c2_i32_62 : i32
        %139 = arith.index_cast %138 : i32 to index
        %140 = memref.load %arg1[%139] : memref<20480xi32, #tpu.memory_space<smem>>
        %141 = arith.index_cast %140 : i32 to index
        %c0_63 = arith.constant 0 : index
        %142 = vector.load %arg7[%141, %c0_63] : memref<2048x256xf32, #tpu.memory_space<vmem>>, vector<1x256xf32>
        %143 = arith.addf %137, %142 : vector<1x256xf32>
        %c3_i32_64 = arith.constant 3 : i32
        %144 = arith.addi %127, %c3_i32_64 : i32
        %145 = arith.index_cast %144 : i32 to index
        %146 = memref.load %arg1[%145] : memref<20480xi32, #tpu.memory_space<smem>>
        %147 = arith.index_cast %146 : i32 to index
        %c0_65 = arith.constant 0 : index
        %148 = vector.load %arg7[%147, %c0_65] : memref<2048x256xf32, #tpu.memory_space<vmem>>, vector<1x256xf32>
        %149 = arith.addf %143, %148 : vector<1x256xf32>
        %c4_i32_66 = arith.constant 4 : i32
        %150 = arith.addi %127, %c4_i32_66 : i32
        %151 = arith.index_cast %150 : i32 to index
        %152 = memref.load %arg1[%151] : memref<20480xi32, #tpu.memory_space<smem>>
        %153 = arith.index_cast %152 : i32 to index
        %c0_67 = arith.constant 0 : index
        %154 = vector.load %arg7[%153, %c0_67] : memref<2048x256xf32, #tpu.memory_space<vmem>>, vector<1x256xf32>
        %155 = arith.subf %149, %154 : vector<1x256xf32>
        %c4_i32_68 = arith.constant 4 : i32
        %156 = arith.addi %31, %c4_i32_68 : i32
        %c5_i32_69 = arith.constant 5 : i32
        %157 = arith.muli %156, %c5_i32_69 : i32
        %158 = arith.addi %9, %157 : i32
        %159 = arith.index_cast %158 : i32 to index
        %160 = memref.load %arg1[%159] : memref<20480xi32, #tpu.memory_space<smem>>
        %161 = arith.index_cast %160 : i32 to index
        %c0_70 = arith.constant 0 : index
        %162 = vector.load %arg7[%161, %c0_70] : memref<2048x256xf32, #tpu.memory_space<vmem>>, vector<1x256xf32>
        %c1_i32_71 = arith.constant 1 : i32
        %163 = arith.addi %158, %c1_i32_71 : i32
        %164 = arith.index_cast %163 : i32 to index
        %165 = memref.load %arg1[%164] : memref<20480xi32, #tpu.memory_space<smem>>
        %166 = arith.index_cast %165 : i32 to index
        %c0_72 = arith.constant 0 : index
        %167 = vector.load %arg7[%166, %c0_72] : memref<2048x256xf32, #tpu.memory_space<vmem>>, vector<1x256xf32>
        %168 = arith.addf %162, %167 : vector<1x256xf32>
        %c2_i32_73 = arith.constant 2 : i32
        %169 = arith.addi %158, %c2_i32_73 : i32
        %170 = arith.index_cast %169 : i32 to index
        %171 = memref.load %arg1[%170] : memref<20480xi32, #tpu.memory_space<smem>>
        %172 = arith.index_cast %171 : i32 to index
        %c0_74 = arith.constant 0 : index
        %173 = vector.load %arg7[%172, %c0_74] : memref<2048x256xf32, #tpu.memory_space<vmem>>, vector<1x256xf32>
        %174 = arith.addf %168, %173 : vector<1x256xf32>
        %c3_i32_75 = arith.constant 3 : i32
        %175 = arith.addi %158, %c3_i32_75 : i32
        %176 = arith.index_cast %175 : i32 to index
        %177 = memref.load %arg1[%176] : memref<20480xi32, #tpu.memory_space<smem>>
        %178 = arith.index_cast %177 : i32 to index
        %c0_76 = arith.constant 0 : index
        %179 = vector.load %arg7[%178, %c0_76] : memref<2048x256xf32, #tpu.memory_space<vmem>>, vector<1x256xf32>
        %180 = arith.addf %174, %179 : vector<1x256xf32>
        %c4_i32_77 = arith.constant 4 : i32
        %181 = arith.addi %158, %c4_i32_77 : i32
        %182 = arith.index_cast %181 : i32 to index
        %183 = memref.load %arg1[%182] : memref<20480xi32, #tpu.memory_space<smem>>
        %184 = arith.index_cast %183 : i32 to index
        %c0_78 = arith.constant 0 : index
        %185 = vector.load %arg7[%184, %c0_78] : memref<2048x256xf32, #tpu.memory_space<vmem>>, vector<1x256xf32>
        %186 = arith.subf %180, %185 : vector<1x256xf32>
        %c5_i32_79 = arith.constant 5 : i32
        %187 = arith.addi %31, %c5_i32_79 : i32
        %c5_i32_80 = arith.constant 5 : i32
        %188 = arith.muli %187, %c5_i32_80 : i32
        %189 = arith.addi %9, %188 : i32
        %190 = arith.index_cast %189 : i32 to index
        %191 = memref.load %arg1[%190] : memref<20480xi32, #tpu.memory_space<smem>>
        %192 = arith.index_cast %191 : i32 to index
        %c0_81 = arith.constant 0 : index
        %193 = vector.load %arg7[%192, %c0_81] : memref<2048x256xf32, #tpu.memory_space<vmem>>, vector<1x256xf32>
        %c1_i32_82 = arith.constant 1 : i32
        %194 = arith.addi %189, %c1_i32_82 : i32
        %195 = arith.index_cast %194 : i32 to index
        %196 = memref.load %arg1[%195] : memref<20480xi32, #tpu.memory_space<smem>>
        %197 = arith.index_cast %196 : i32 to index
        %c0_83 = arith.constant 0 : index
        %198 = vector.load %arg7[%197, %c0_83] : memref<2048x256xf32, #tpu.memory_space<vmem>>, vector<1x256xf32>
        %199 = arith.addf %193, %198 : vector<1x256xf32>
        %c2_i32_84 = arith.constant 2 : i32
        %200 = arith.addi %189, %c2_i32_84 : i32
        %201 = arith.index_cast %200 : i32 to index
        %202 = memref.load %arg1[%201] : memref<20480xi32, #tpu.memory_space<smem>>
        %203 = arith.index_cast %202 : i32 to index
        %c0_85 = arith.constant 0 : index
        %204 = vector.load %arg7[%203, %c0_85] : memref<2048x256xf32, #tpu.memory_space<vmem>>, vector<1x256xf32>
        %205 = arith.addf %199, %204 : vector<1x256xf32>
        %c3_i32_86 = arith.constant 3 : i32
        %206 = arith.addi %189, %c3_i32_86 : i32
        %207 = arith.index_cast %206 : i32 to index
        %208 = memref.load %arg1[%207] : memref<20480xi32, #tpu.memory_space<smem>>
        %209 = arith.index_cast %208 : i32 to index
        %c0_87 = arith.constant 0 : index
        %210 = vector.load %arg7[%209, %c0_87] : memref<2048x256xf32, #tpu.memory_space<vmem>>, vector<1x256xf32>
        %211 = arith.addf %205, %210 : vector<1x256xf32>
        %c4_i32_88 = arith.constant 4 : i32
        %212 = arith.addi %189, %c4_i32_88 : i32
        %213 = arith.index_cast %212 : i32 to index
        %214 = memref.load %arg1[%213] : memref<20480xi32, #tpu.memory_space<smem>>
        %215 = arith.index_cast %214 : i32 to index
        %c0_89 = arith.constant 0 : index
        %216 = vector.load %arg7[%215, %c0_89] : memref<2048x256xf32, #tpu.memory_space<vmem>>, vector<1x256xf32>
        %217 = arith.subf %211, %216 : vector<1x256xf32>
        %c6_i32 = arith.constant 6 : i32
        %218 = arith.addi %31, %c6_i32 : i32
        %c5_i32_90 = arith.constant 5 : i32
        %219 = arith.muli %218, %c5_i32_90 : i32
        %220 = arith.addi %9, %219 : i32
        %221 = arith.index_cast %220 : i32 to index
        %222 = memref.load %arg1[%221] : memref<20480xi32, #tpu.memory_space<smem>>
        %223 = arith.index_cast %222 : i32 to index
        %c0_91 = arith.constant 0 : index
        %224 = vector.load %arg7[%223, %c0_91] : memref<2048x256xf32, #tpu.memory_space<vmem>>, vector<1x256xf32>
        %c1_i32_92 = arith.constant 1 : i32
        %225 = arith.addi %220, %c1_i32_92 : i32
        %226 = arith.index_cast %225 : i32 to index
        %227 = memref.load %arg1[%226] : memref<20480xi32, #tpu.memory_space<smem>>
        %228 = arith.index_cast %227 : i32 to index
        %c0_93 = arith.constant 0 : index
        %229 = vector.load %arg7[%228, %c0_93] : memref<2048x256xf32, #tpu.memory_space<vmem>>, vector<1x256xf32>
        %230 = arith.addf %224, %229 : vector<1x256xf32>
        %c2_i32_94 = arith.constant 2 : i32
        %231 = arith.addi %220, %c2_i32_94 : i32
        %232 = arith.index_cast %231 : i32 to index
        %233 = memref.load %arg1[%232] : memref<20480xi32, #tpu.memory_space<smem>>
        %234 = arith.index_cast %233 : i32 to index
        %c0_95 = arith.constant 0 : index
        %235 = vector.load %arg7[%234, %c0_95] : memref<2048x256xf32, #tpu.memory_space<vmem>>, vector<1x256xf32>
        %236 = arith.addf %230, %235 : vector<1x256xf32>
        %c3_i32_96 = arith.constant 3 : i32
        %237 = arith.addi %220, %c3_i32_96 : i32
        %238 = arith.index_cast %237 : i32 to index
        %239 = memref.load %arg1[%238] : memref<20480xi32, #tpu.memory_space<smem>>
        %240 = arith.index_cast %239 : i32 to index
        %c0_97 = arith.constant 0 : index
        %241 = vector.load %arg7[%240, %c0_97] : memref<2048x256xf32, #tpu.memory_space<vmem>>, vector<1x256xf32>
        %242 = arith.addf %236, %241 : vector<1x256xf32>
        %c4_i32_98 = arith.constant 4 : i32
        %243 = arith.addi %220, %c4_i32_98 : i32
        %244 = arith.index_cast %243 : i32 to index
        %245 = memref.load %arg1[%244] : memref<20480xi32, #tpu.memory_space<smem>>
        %246 = arith.index_cast %245 : i32 to index
        %c0_99 = arith.constant 0 : index
        %247 = vector.load %arg7[%246, %c0_99] : memref<2048x256xf32, #tpu.memory_space<vmem>>, vector<1x256xf32>
        %248 = arith.subf %242, %247 : vector<1x256xf32>
        %c7_i32 = arith.constant 7 : i32
        %249 = arith.addi %31, %c7_i32 : i32
        %c5_i32_100 = arith.constant 5 : i32
        %250 = arith.muli %249, %c5_i32_100 : i32
        %251 = arith.addi %9, %250 : i32
        %252 = arith.index_cast %251 : i32 to index
        %253 = memref.load %arg1[%252] : memref<20480xi32, #tpu.memory_space<smem>>
        %254 = arith.index_cast %253 : i32 to index
        %c0_101 = arith.constant 0 : index
        %255 = vector.load %arg7[%254, %c0_101] : memref<2048x256xf32, #tpu.memory_space<vmem>>, vector<1x256xf32>
        %c1_i32_102 = arith.constant 1 : i32
        %256 = arith.addi %251, %c1_i32_102 : i32
        %257 = arith.index_cast %256 : i32 to index
        %258 = memref.load %arg1[%257] : memref<20480xi32, #tpu.memory_space<smem>>
        %259 = arith.index_cast %258 : i32 to index
        %c0_103 = arith.constant 0 : index
        %260 = vector.load %arg7[%259, %c0_103] : memref<2048x256xf32, #tpu.memory_space<vmem>>, vector<1x256xf32>
        %261 = arith.addf %255, %260 : vector<1x256xf32>
        %c2_i32_104 = arith.constant 2 : i32
        %262 = arith.addi %251, %c2_i32_104 : i32
        %263 = arith.index_cast %262 : i32 to index
        %264 = memref.load %arg1[%263] : memref<20480xi32, #tpu.memory_space<smem>>
        %265 = arith.index_cast %264 : i32 to index
        %c0_105 = arith.constant 0 : index
        %266 = vector.load %arg7[%265, %c0_105] : memref<2048x256xf32, #tpu.memory_space<vmem>>, vector<1x256xf32>
        %267 = arith.addf %261, %266 : vector<1x256xf32>
        %c3_i32_106 = arith.constant 3 : i32
        %268 = arith.addi %251, %c3_i32_106 : i32
        %269 = arith.index_cast %268 : i32 to index
        %270 = memref.load %arg1[%269] : memref<20480xi32, #tpu.memory_space<smem>>
        %271 = arith.index_cast %270 : i32 to index
        %c0_107 = arith.constant 0 : index
        %272 = vector.load %arg7[%271, %c0_107] : memref<2048x256xf32, #tpu.memory_space<vmem>>, vector<1x256xf32>
        %273 = arith.addf %267, %272 : vector<1x256xf32>
        %c4_i32_108 = arith.constant 4 : i32
        %274 = arith.addi %251, %c4_i32_108 : i32
        %275 = arith.index_cast %274 : i32 to index
        %276 = memref.load %arg1[%275] : memref<20480xi32, #tpu.memory_space<smem>>
        %277 = arith.index_cast %276 : i32 to index
        %c0_109 = arith.constant 0 : index
        %278 = vector.load %arg7[%277, %c0_109] : memref<2048x256xf32, #tpu.memory_space<vmem>>, vector<1x256xf32>
        %279 = arith.subf %273, %278 : vector<1x256xf32>
        %280 = tpu.concatenate %62, %93, %124, %155, %186, %217, %248, %279 in 0 : vector<1x256xf32>, vector<1x256xf32>, vector<1x256xf32>, vector<1x256xf32>, vector<1x256xf32>, vector<1x256xf32>, vector<1x256xf32>, vector<1x256xf32> -> vector<8x256xf32>
        %281 = arith.index_cast %31 : i32 to index
        %c0_110 = arith.constant 0 : index
        %282 = vector.load %arg8[%281, %c0_110] : memref<256x256xf32, #tpu.memory_space<vmem>>, vector<8x256xf32>
        tpu.vector_store %arg8[%281, %c0_110], %280 {strides = array<i32>} : memref<256x256xf32, #tpu.memory_space<vmem>>, vector<8x256xf32>,
      }
      %c32_i32_11 = arith.constant 32 : i32
      %c256_i32 = arith.constant 256 : i32
      %11 = arith.muli %arg9, %c256_i32 : i32
      %12 = tpu.assume_multiple %11, 8 : i32
      %13 = arith.index_cast %12 : i32 to index
      %c0_12 = arith.constant 0 : index
      %14 = vector.load %arg7[%13, %c0_12] : memref<2048x256xf32, #tpu.memory_space<vmem>>, vector<256x256xf32>
      %c0_13 = arith.constant 0 : index
      %c0_14 = arith.constant 0 : index
      %15 = vector.load %arg3[%c0_13, %c0_14] : memref<256x256xf32, #tpu.memory_space<vmem>>, vector<256x256xf32>
      %cst_15 = arith.constant dense<0.000000e+00> : vector<256x256xf32>
      %16 = tpu.matmul %14, %15, %cst_15 {dimension_numbers = #tpu.dot_dimension_numbers<[1], [0], [0], [1], [0, 0, 1, 1], [], []>} : vector<256x256xf32>, vector<256x256xf32>, vector<256x256xf32> -> vector<256x256xf32>
      %c0_16 = arith.constant 0 : index
      %c0_17 = arith.constant 0 : index
      %17 = vector.load %arg8[%c0_16, %c0_17] : memref<256x256xf32, #tpu.memory_space<vmem>>, vector<256x256xf32>
      %c0_18 = arith.constant 0 : index
      %c0_19 = arith.constant 0 : index
      %18 = vector.load %arg4[%c0_18, %c0_19] : memref<256x256xf32, #tpu.memory_space<vmem>>, vector<256x256xf32>
      %cst_20 = arith.constant dense<0.000000e+00> : vector<256x256xf32>
      %19 = tpu.matmul %17, %18, %cst_20 {dimension_numbers = #tpu.dot_dimension_numbers<[1], [0], [0], [1], [0, 0, 1, 1], [], []>} : vector<256x256xf32>, vector<256x256xf32>, vector<256x256xf32> -> vector<256x256xf32>
      %20 = arith.addf %16, %19 : vector<256x256xf32>
      %21 = vector.broadcast %6 : vector<1x256xf32> to vector<256x256xf32>
      %22 = arith.addf %20, %21 : vector<256x256xf32>
      %cst_21 = arith.constant 0.000000e+00 : f32
      %23 = vector.broadcast %cst_21 : f32 to vector<256x256xf32>
      %24 = arith.maximumf %22, %23 : vector<256x256xf32>
      %25 = arith.index_cast %12 : i32 to index
      %c0_22 = arith.constant 0 : index
      %26 = vector.load %arg7[%25, %c0_22] : memref<2048x256xf32, #tpu.memory_space<vmem>>, vector<256x256xf32>
      tpu.vector_store %arg7[%25, %c0_22], %24 {strides = array<i32>} : memref<2048x256xf32, #tpu.memory_space<vmem>>, vector<256x256xf32>,
      %c0_23 = arith.constant 0 : index
      %c0_24 = arith.constant 0 : index
      %27 = vector.load %arg6[%c0_23, %c0_24] : memref<256x256xf32, #tpu.memory_space<vmem>>, vector<256x256xf32>
      %28 = arith.addf %27, %24 : vector<256x256xf32>
      %c0_25 = arith.constant 0 : index
      %c0_26 = arith.constant 0 : index
      %29 = vector.load %arg6[%c0_25, %c0_26] : memref<256x256xf32, #tpu.memory_space<vmem>>, vector<256x256xf32>
      tpu.vector_store %arg6[%c0_25, %c0_26], %28 {strides = array<i32>} : memref<256x256xf32, #tpu.memory_space<vmem>>, vector<256x256xf32>,
    }
    %c8_i32_8 = arith.constant 8 : i32
    return
  }
  func.func @transform_0(%arg0: i32, %arg1: memref<20480xi32, #tpu.memory_space<smem>>) -> (i32, i32, i32) {
    %c0_i32 = arith.constant 0 : i32
    %c0_i32_0 = arith.constant 0 : i32
    %c0_i32_1 = arith.constant 0 : i32
    return %arg0, %c0_i32, %c0_i32_0 : i32, i32, i32
  }
  func.func @transform_1(%arg0: i32, %arg1: memref<20480xi32, #tpu.memory_space<smem>>) -> (i32, i32) {
    %c0_i32 = arith.constant 0 : i32
    %c0_i32_0 = arith.constant 0 : i32
    %c0_i32_1 = arith.constant 0 : i32
    return %c0_i32, %c0_i32_0 : i32, i32
  }
  func.func @transform_2(%arg0: i32, %arg1: memref<20480xi32, #tpu.memory_space<smem>>) -> (i32, i32) {
    %c0_i32 = arith.constant 0 : i32
    %c0_i32_0 = arith.constant 0 : i32
    %c0_i32_1 = arith.constant 0 : i32
    return %c0_i32, %c0_i32_0 : i32, i32
  }
  func.func @transform_3(%arg0: i32, %arg1: memref<20480xi32, #tpu.memory_space<smem>>) -> (i32, i32) {
    %c0_i32 = arith.constant 0 : i32
    %c0_i32_0 = arith.constant 0 : i32
    %c0_i32_1 = arith.constant 0 : i32
    return %c0_i32, %c0_i32_0 : i32, i32
  }
  func.func @transform_4(%arg0: i32, %arg1: memref<20480xi32, #tpu.memory_space<smem>>) -> (i32, i32) {
    %c0_i32 = arith.constant 0 : i32
    %c0_i32_0 = arith.constant 0 : i32
    return %arg0, %c0_i32 : i32, i32
  }
}

</mosaic_0001>

<bundles_post_ra>
// kernel: tpu_custom_call.1
= control target key start
LH: loop header
LB: loop body
LE: loop exit
PB: predicated region body
PF: predicated region fallthrough
CT: control target
= control target key end

     0   :  { %s5619_s0 = inlined_call_operand.hbm [shape: s32[20480], index: 0, kind: input, shape index: {}]   ;;  %s5620_s1 = inlined_call_operand.hbm [shape: f32[2,2048,256], index: 1, kind: input, shape index: {}]   ;;  %s5621_s2 = inlined_call_operand.hbm [shape: f32[256,256], index: 2, kind: input, shape index: {}]   ;;  %s5622_s3 = inlined_call_operand.hbm [shape: f32[256,256], index: 3, kind: input, shape index: {}]   ;;  %s5623_s4 = inlined_call_operand.hbm [shape: f32[1,256], index: 4, kind: input, shape index: {}]   ;;  %s5624_s5 = inlined_call_operand.hbm [shape: f32[512,256], index: 5, kind: output, shape index: {}]  }
   0x1   :  { %5648 = sst [smem:[#allocation53_spill]] %s5620_s1  ;;  %s3838_s20 = scalar_lea.hbm %s5619_s0, 2560 }
   0x2   :  { %5649 = sst [smem:[#allocation54_spill]] %s5621_s2  ;;  %p3839_p0 = scmp.ne.s32.totalorder %s5619_s0, %s3838_s20 }
   0x3   :  { %5650 = sst [smem:[#allocation55_spill]] %s5622_s3  ;;  %p3842_p1 = scmp.lt.u32.totalorder %s3838_s20, %s5619_s0 }
   0x4   :  { %5651 = sst [smem:[#allocation56_spill]] %s5623_s4 }
   0x5   :  { %5652 = sst [smem:[#allocation57_spill]] %s5624_s5  ;;  %p3844_p2 = pnand %p3842_p1, %p3839_p0 }
   0x7   :  { %3847 = shalt.err (!%p3844_p2)  }
   0x8   :  { %s4056_s25 = smov [#allocation5]  }
   0x9   :  { %11 = dma.hbm_to_smem %s5619_s0, 2560, %s4056_s25, [#allocation4] }
   0xa   :  { %4014 = dma.done.wait [#allocation4], 2560 }
   0xb   :  { %4015 = vsyncadd [#allocation4], 4294964736 }
   0xc   :  { %13 = sfence }
   0xd   :  { %14 = vsyncpa [#allocation7], 0 }
   0xe   :  { %16 = vsyncpa [#allocation7 + $0x1], 0 }
   0xf   :  { %17 = vsyncpa [#allocation10], 0 }
  0x10   :  { %18 = vsyncpa [#allocation13], 0 }
  0x11   :  { %19 = vsyncpa [#allocation8], 0 }
  0x12   :  { %21 = vsyncpa [#allocation8 + $0x1], 0  ;;  %s4109_s28 = smov 0   ;;  %s4111_s29 = smov 0  }
  0x13   :  { %s4113_s30 = smov 0   ;;  %s4115_s6 = smov 0  }
  0x14 LB: > { %5653 = sst [smem:[#allocation20_spill]] %s4034_s28  ;;  %s4130_s0 = sadd.s32 4294967295, %s4046_s6   ;;  %s4046_s6 = sphi %s4115_s6, %s5745_s6   ;;  %s4042_s30 = sphi %s4113_s30, %s5748_s30   ;;  %s4038_s29 = sphi %s4111_s29, %s5747_s29   ;;  %s4034_s28 = sphi %s4109_s28, %s5746_s28  }
  0x15   : > { %5654 = sst [smem:[#allocation21_spill]] %s4038_s29  ;;  %s3394_s7 = sadd.s32 4294967294, %s4046_s6  }
  0x16   : > { %5655 = sst [smem:[#allocation22_spill]] %s4042_s30  ;;  %p47_p3 = scmp.ne.s32.totalorder %s4038_s29, %s4034_s28 }
  0x17   : > { %5656 = sst [smem:[#allocation23_spill]] %s4046_s6  ;;  %p5625_p4 = scmp.eq.s32.totalorder %s4130_s0, 0 }
  0x18   : > { %5657 = sst [smem:[#allocation24_spill]] %s4130_s0  ;;  %p140_p6 = scmp.eq.s32.totalorder %s3394_s7, 1 }
  0x19   : > { %p4139_p7 = por %p5625_p4, %p47_p3  ;;  %p3395_p8 = scmp.ge.s32.totalorder %s4046_s6, 1 }
  0x1a   : > { %p4144_p9 = por %p140_p6, %p47_p3  ;;  %p147_p10 = scmp.lt.s32.totalorder %s4046_s6, 3 }
  0x1b   : > { %s5658_s8 = scalar_select %p4139_p7, 1, 0 }
  0x1c   : > { %s5659_s9 = scalar_select %p4144_p9, 1, 0 }
  0x1d   : > { %p4149_p11 = pnand %p3395_p8, %p147_p10  ;;  %s4057_s11 = smov [#allocation9]  }
  0x1e   : > { %5660 = sst [smem:[#allocation25_spill]] %s5659_s9  ;;  %s159_s12 = sshll.u32 %s4057_s11, 4  ;;  %s4153_s12 = int_to_ptr.vmem [resolvable:$true] %s159_s12 }
  0x1f   : > { %s5661_s10 = scalar_select %p4149_p11, 1, 0 }
  0x20   : > { %p3755_p12 = pneg %p4149_p11  ;;  %s4058_s14 = smov [#allocation11]  }
  0x21   : > { %s172_s15 = sshll.u32 %s4058_s14, 4  ;;  %s4059_s16 = smov [#allocation12]   ;;  %s4164_s15 = int_to_ptr.vmem [resolvable:$true] %s172_s15 }
  0x22   : > { %p4160_p0 = pnand %p3755_p12, %p5625_p4  ;;  %s4166_s17 = sshll.u32 %s4059_s16, 4  ;;  %s187_s17 = int_to_ptr.vmem [resolvable:$true] %s4166_s17 }
  0x23   : > { %s5663_s2 = sld [smem:[#allocation54_spill]] }
  0x24   : > { %p4176_p2 = pneg %p4160_p0 }
  0x29   : > { %s3848_s20 = scalar_lea.hbm %s5663_s2, 8192 }
  0x2a   : > { %p3849_p1 = scmp.ne.s32.totalorder %s5663_s2, %s3848_s20  ;;  %p3855_p8 = scmp.lt.u32.totalorder %s3848_s20, %s5663_s2 }
  0x2c   : > { %p3851_p3 = pnand %p4176_p2, %p3849_p1 }
  0x2e   : > { %p3852_p6 = pneg %p3851_p3 }
  0x30   : > { %p3857_p10 = pnand %p3855_p8, %p3852_p6 }
  0x32   : > { %3860 = shalt.err (!%p3857_p10)
}
  0x33   : > { %s3861_s26 = scalar_lea.vmem %s4153_s12, 8192  ;;  %p3869_p5 = scmp.lt.s32.totalorder %s4153_s12, %s4153_s12 }
  0x34   : > { %p3862_p12 = scmp.ne.s32.totalorder %s4153_s12, %s3861_s26  ;;  %p3870_p9 = scmp.lt.s32.totalorder %s3861_s26, %s3861_s26 }
  0x36   : > { %p3864_p13 = pnand %p3862_p12, %p4176_p2  ;;  %p3871_p1 = por %p3870_p9, %p3869_p5 }
  0x38   : > { %p3865_p4 = pneg %p3864_p13 }
  0x3a   : > { %p3872_p3 = pnand %p3871_p1, %p3865_p4 }
  0x3c   : > { %3875 = shalt.err (!%p3872_p3)
}
  0x3d   : > { %s4060_s27 = smov 256   ;;  %s4061_s7 = smov 16  }
  0x3e   : > { %3758 = dma.hbm_to_vmem [thread:$0]  (!%p4160_p0), %s5663_s2, 8192, %s4153_s12, [#allocation10], %s4060_s27, %s4060_s27, %s4061_s7  }
  0x3f   : > { %s5665_s3 = sld [smem:[#allocation55_spill]] }
  0x45   : > { %s3876_s19 = scalar_lea.hbm %s5665_s3, 8192 }
  0x46   : > { %p3877_p4 = scmp.ne.s32.totalorder %s5665_s3, %s3876_s19  ;;  %p3883_p13 = scmp.lt.u32.totalorder %s3876_s19, %s5665_s3 }
  0x48   : > { %p3879_p5 = pnand %p3877_p4, %p4176_p2 }
  0x4a   : > { %p3880_p9 = pneg %p3879_p5 }
  0x4c   : > { %p3885_p6 = pnand %p3883_p13, %p3880_p9 }
  0x4e   : > { %3888 = shalt.err (!%p3885_p6)
}
  0x4f   : > { %s3889_s12 = scalar_lea.vmem %s4164_s15, 8192  ;;  %p3897_p1 = scmp.lt.s32.totalorder %s4164_s15, %s4164_s15 }
  0x50   : > { %p3890_p8 = scmp.ne.s32.totalorder %s4164_s15, %s3889_s12  ;;  %p3898_p3 = scmp.lt.s32.totalorder %s3889_s12, %s3889_s12 }
  0x52   : > { %p3892_p10 = pnand %p3890_p8, %p4176_p2  ;;  %p3899_p4 = por %p3898_p3, %p3897_p1 }
  0x54   : > { %p3893_p12 = pneg %p3892_p10 }
  0x56   : > { %p3900_p5 = pnand %p3899_p4, %p3893_p12 }
  0x58   : > { %3903 = shalt.err (!%p3900_p5)
}
  0x59   : > { %3761 = dma.hbm_to_vmem [thread:$0]  (!%p4160_p0), %s5665_s3, 8192, %s4164_s15, [#allocation10], %s4060_s27, %s4060_s27, %s4061_s7  }
  0x5a   : > { %s5666_s4 = sld [smem:[#allocation56_spill]] }
  0x60   : > { %s3904_s16 = scalar_lea.hbm %s5666_s4, 32 }
  0x61   : > { %p3905_p9 = scmp.ne.s32.totalorder %s5666_s4, %s3904_s16  ;;  %p3911_p8 = scmp.lt.u32.totalorder %s3904_s16, %s5666_s4 }
  0x63   : > { %p3907_p13 = pnand %p3905_p9, %p4176_p2 }
  0x65   : > { %p3908_p6 = pneg %p3907_p13 }
  0x67   : > { %p3913_p10 = pnand %p3911_p8, %p3908_p6 }
  0x69   : > { %3916 = shalt.err (!%p3913_p10)
}
  0x6a   : > { %s3917_s22 = scalar_lea.vmem %s187_s17, 32  ;;  %p3925_p4 = scmp.lt.s32.totalorder %s187_s17, %s187_s17 }
  0x6b   : > { %p3918_p12 = scmp.ne.s32.totalorder %s187_s17, %s3917_s22  ;;  %p3926_p5 = scmp.lt.s32.totalorder %s3917_s22, %s3917_s22 }
  0x6d   : > { %p3920_p1 = pnand %p3918_p12, %p4176_p2  ;;  %p3927_p7 = por %p3926_p5, %p3925_p4 }
  0x6f   : > { %p3921_p3 = pneg %p3920_p1 }
  0x71   : > { %p3928_p11 = pnand %p3927_p7, %p3921_p3 }
  0x73   : > { %3931 = shalt.err (!%p3928_p11)
}
  0x74   : > { %3764 = dma.hbm_to_vmem [thread:$0]  (!%p4160_p0), %s5666_s4, 32, %s187_s17, [#allocation13]  }
  0x75   : > { %s4246_s23 = sadd.s32 1, %s4046_s6   ;;  %s34_s13 = sadd.s32 1, %s4042_s30 }
  0x76   : > { %5667 = sst [smem:[#allocation26_spill]] %s4246_s23  ;;  %s31_s12 = ssub.s32 %s4046_s6, %s4246_s23 }
  0x77   : > { %p32_p7 = scmp.eq.s32.totalorder %s31_s12, 0  ;;  %p41_p11 = scmp.ne.s32.totalorder %s4042_s30, %s4038_s29 }
  0x78   : > { %p42_p2 = scmp.eq.s32.totalorder %s4046_s6, 0  ;;  %p3776_p9 = scmp.lt.s32.totalorder %s4046_s6, 2 }
  0x79   : > { %s4256_s25 = scalar_select %p32_p7, %s4042_s30, %s34_s13  }
  0x7a   : > { %p43_p13 = por %p42_p2, %p41_p11  ;;  %p5669_p6 = scmp.eq.s32.totalorder %s4130_s0, 1 }
  0x7b   : > { %5668 = sst [smem:[#allocation27_spill]] %s4256_s25  ;;  %s197_s11 = sand.u32 1, %s4042_s30  }
  0x7c   : > { %p4260_p8 = por %p5669_p6, %p41_p11  ;;  %s3502_s14 = sshll.u32 %s4046_s6, 16 }
  0x7d   : > { %s3400_s17 = sshll.u32 %s197_s11, 12  ;;  %s5672_s1 = sld [smem:[#allocation53_spill]] }
  0x7e   : > { %s5670_s26 = scalar_select %p4260_p8, 1, 0 }
  0x7f   : > { %s201_s20 = scalar_lea.vmem [#allocation6], %s3400_s17  ;;  %p4271_p0 = pnand %p3776_p9, %p43_p13 }
  0x80   : > { %5671 = sst [smem:[#allocation28_spill]] %s5670_s26  ;;  %s208_s21 = sshll.u32 %s201_s20, 4  ;;  %s4275_s21 = int_to_ptr.vmem [resolvable:$true] %s208_s21 }
  0x81   : > { %s4277_s15 = scalar_lea.sflag [#allocation7], %s197_s11  ;;  %p3934_p12 = pneg %p4271_p0 }
  0x83   : > { %s4269_s19 = scalar_lea.hbm %s5672_s1, %s3502_s14  ;;  %s3937_s14 = scalar_lea.hbm %s5672_s1, 131072 }
  0x84   : > { %s3932_s24 = scalar_lea.hbm %s4269_s19, 65536  ;;  %p3938_p4 = scmp.lt.u32.totalorder %s4269_s19, %s5672_s1 }
  0x85   : > { %p3933_p10 = scmp.ne.s32.totalorder %s4269_s19, %s3932_s24  ;;  %p3939_p5 = scmp.lt.u32.totalorder %s3937_s14, %s3932_s24 }
  0x86   : > { %p3941_p11 = scmp.lt.u32.totalorder %s3932_s24, %s4269_s19 }
  0x87   : > { %p3935_p1 = pnand %p3934_p12, %p3933_p10  ;;  %p3940_p7 = por %p3939_p5, %p3938_p4 }
  0x89   : > { %p3936_p3 = pneg %p3935_p1  ;;  %p3942_p2 = por %p3941_p11, %p3940_p7 }
  0x8b   : > { %p3943_p9 = pnand %p3942_p2, %p3936_p3 }
  0x8d   : > { %3946 = shalt.err (!%p3943_p9)
}
  0x8e   : > { %s3947_s11 = scalar_lea.vmem %s4275_s21, 65536  ;;  %s4062_s18 = smov [#allocation6]  }
  0x8f   : > { %p3948_p13 = scmp.ne.s32.totalorder %s4275_s21, %s3947_s11  ;;  %s3952_s20 = sshll.u32 %s4062_s18, 4  ;;  %s3953_s20 = int_to_ptr.vmem [resolvable:$false] %s3952_s20 }
  0x90   : > { %s3954_s12 = scalar_lea.vmem %s3953_s20, 131072  ;;  %p3955_p1 = scmp.lt.s32.totalorder %s4275_s21, %s3953_s20 }
  0x91   : > { %p3950_p6 = pnand %p3948_p13, %p3934_p12  ;;  %p3956_p4 = scmp.lt.s32.totalorder %s3954_s12, %s3947_s11 }
  0x93   : > { %p3951_p10 = pneg %p3950_p6  ;;  %p3957_p5 = por %p3956_p4, %p3955_p1 }
  0x95   : > { %p3958_p7 = pnand %p3957_p5, %p3951_p10 }
  0x97   : > { %3961 = shalt.err (!%p3958_p7)
}
  0x98   : > { %3768 = dma.hbm_to_vmem [thread:$0]  (!%p4271_p0), %s4269_s19, 65536, %s4275_s21, %s4277_s15, %s4060_s27, %s4060_s27, %s4061_s7  }
  0x99   : > { %p5674_p12 = scmp.ne.s32.totalorder %s5661_s10, 0 }
  0x9b   : > { %220 = sbr.rel (%p5674_p12) target bundleno = 1081 (0x439), region = 36 }
  0xa2   : > { %s4311_s24 = sand.u32 1, %s4038_s29   ;;  %p5676_p3 = scmp.ne.s32.totalorder %s5658_s8, 0 }
  0xa3   : > { %5675 = sst [smem:[#allocation29_spill]] %s4311_s24  ;;  %s3404_s13 = sshll.u32 %s4311_s24, 12 }
  0xa4   : > { %s223_s14 = scalar_lea.sflag [#allocation7], %s4311_s24  ;;  %s4315_s17 = scalar_lea.vmem [#allocation6], %s3404_s13 }
  0xa5   : > { %4017 = dma.done.wait (%p5676_p3), %s223_s14, 65536  }
  0xa6   : > { %4019 = vsyncadd (%p5676_p3), %s223_s14, 4294901760  ;;  %p5677_p0 = scmp.eq.s32.totalorder %s4130_s0, 0 }
  0xa8   : > { %4021 = dma.done.wait (%p5677_p0), [#allocation10], 16384   ;;  %p5678_p11 = pmov %p5677_p0 }
  0xa9   : > { %p5679_p2 = pmov %p5677_p0 }
  0xaa   : > { %4023 = vsyncadd (%p5678_p11), [#allocation10], 4294950912 }
  0xab   : > { %4025 = dma.done.wait (%p5679_p2), [#allocation13], 32   ;;  %p5680_p9 = pmov %p5677_p0 }
  0xac   : > { %v4330_v0 = vld [vmem:[#allocation12] sm:$0x3]  ;;  %v266_v2 = vld [vmem:[%s4315_s17 + $0x8] sm:$0xff]  ;;  %v267_v3 = vld [vmem:[%s4315_s17 + $0x10] sm:$0xff]  ;;  %s3408_s10 = sshll.u32 %s4311_s24, 9  ;;  %s4984_s7 = smov 0  }
  0xad   : > { %4027 = vsyncadd (%p5680_p9), [#allocation13], 4294967264  ;;  %v265_v1 = vld [vmem:[%s4315_s17] sm:$0xff]  ;;  %778 = vst [vmem:[#allocation2 + $0x8] sm:$0xff] %v266_v2  ;;  %v268_v4 = vld [vmem:[%s4315_s17 + $0x18] sm:$0xff]  ;;  %s4470_s27 = scalar_lea.vmem [#allocation14], %s3408_s10 }
  0xae   : > { %777 = vst [vmem:[#allocation2] sm:$0xff] %v265_v1  ;;  %v269_v5 = vld [vmem:[%s4315_s17 + $0x20] sm:$0xff]  ;;  %779 = vst [vmem:[#allocation2 + $0x10] sm:$0xff] %v267_v3  ;;  %v270_v6 = vld [vmem:[%s4315_s17 + $0x28] sm:$0xff]  ;;  %5681 = sst [smem:[#allocation30_spill]] %s4470_s27 }
  0xaf   : > { %780 = vst [vmem:[#allocation2 + $0x18] sm:$0xff] %v268_v4  ;;  %781 = vst [vmem:[#allocation2 + $0x20] sm:$0xff] %v269_v5  ;;  %v271_v7 = vld [vmem:[%s4315_s17 + $0x30] sm:$0xff]  ;;  %v272_v8 = vld [vmem:[%s4315_s17 + $0x38] sm:$0xff] }
  0xb0   : > { %782 = vst [vmem:[#allocation2 + $0x28] sm:$0xff] %v270_v6  ;;  %783 = vst [vmem:[#allocation2 + $0x30] sm:$0xff] %v271_v7  ;;  %v273_v9 = vld [vmem:[%s4315_s17 + $0x40] sm:$0xff]  ;;  %v274_v10 = vld [vmem:[%s4315_s17 + $0x48] sm:$0xff] }
  0xb1   : > { %784 = vst [vmem:[#allocation2 + $0x38] sm:$0xff] %v272_v8  ;;  %v275_v11 = vld [vmem:[%s4315_s17 + $0x50] sm:$0xff]  ;;  %785 = vst [vmem:[#allocation2 + $0x40] sm:$0xff] %v273_v9  ;;  %v276_v12 = vld [vmem:[%s4315_s17 + $0x58] sm:$0xff] }
  0xb2   : > { %786 = vst [vmem:[#allocation2 + $0x48] sm:$0xff] %v274_v10  ;;  %787 = vst [vmem:[#allocation2 + $0x50] sm:$0xff] %v275_v11  ;;  %v277_v13 = vld [vmem:[%s4315_s17 + $0x60] sm:$0xff]  ;;  %v278_v14 = vld [vmem:[%s4315_s17 + $0x68] sm:$0xff] }
  0xb3   : > { %788 = vst [vmem:[#allocation2 + $0x58] sm:$0xff] %v276_v12  ;;  %789 = vst [vmem:[#allocation2 + $0x60] sm:$0xff] %v277_v13  ;;  %v279_v15 = vld [vmem:[%s4315_s17 + $0x70] sm:$0xff]  ;;  %v280_v16 = vld [vmem:[%s4315_s17 + $0x78] sm:$0xff] }
  0xb4   : > { %790 = vst [vmem:[#allocation2 + $0x68] sm:$0xff] %v278_v14  ;;  %v281_v17 = vld [vmem:[%s4315_s17 + $0x80] sm:$0xff]  ;;  %791 = vst [vmem:[#allocation2 + $0x70] sm:$0xff] %v279_v15  ;;  %v282_v18 = vld [vmem:[%s4315_s17 + $0x88] sm:$0xff] }
  0xb5   : > { %792 = vst [vmem:[#allocation2 + $0x78] sm:$0xff] %v280_v16  ;;  %793 = vst [vmem:[#allocation2 + $0x80] sm:$0xff] %v281_v17  ;;  %v283_v19 = vld [vmem:[%s4315_s17 + $0x90] sm:$0xff]  ;;  %v284_v20 = vld [vmem:[%s4315_s17 + $0x98] sm:$0xff] }
  0xb6   : > { %794 = vst [vmem:[#allocation2 + $0x88] sm:$0xff] %v282_v18  ;;  %795 = vst [vmem:[#allocation2 + $0x90] sm:$0xff] %v283_v19  ;;  %v285_v21 = vld [vmem:[%s4315_s17 + $0xa0] sm:$0xff]  ;;  %v286_v22 = vld [vmem:[%s4315_s17 + $0xa8] sm:$0xff] }
  0xb7   : > { %796 = vst [vmem:[#allocation2 + $0x98] sm:$0xff] %v284_v20  ;;  %v287_v23 = vld [vmem:[%s4315_s17 + $0xb0] sm:$0xff]  ;;  %797 = vst [vmem:[#allocation2 + $0xa0] sm:$0xff] %v285_v21  ;;  %v288_v24 = vld [vmem:[%s4315_s17 + $0xb8] sm:$0xff] }
  0xb8   : > { %798 = vst [vmem:[#allocation2 + $0xa8] sm:$0xff] %v286_v22  ;;  %799 = vst [vmem:[#allocation2 + $0xb0] sm:$0xff] %v287_v23  ;;  %v289_v25 = vld [vmem:[%s4315_s17 + $0xc0] sm:$0xff]  ;;  %v290_v26 = vld [vmem:[%s4315_s17 + $0xc8] sm:$0xff] }
  0xb9   : > { %800 = vst [vmem:[#allocation2 + $0xb8] sm:$0xff] %v288_v24  ;;  %801 = vst [vmem:[#allocation2 + $0xc0] sm:$0xff] %v289_v25  ;;  %v291_v27 = vld [vmem:[%s4315_s17 + $0xd0] sm:$0xff]  ;;  %v292_v28 = vld [vmem:[%s4315_s17 + $0xd8] sm:$0xff] }
  0xba   : > { %802 = vst [vmem:[#allocation2 + $0xc8] sm:$0xff] %v290_v26  ;;  %v293_v29 = vld [vmem:[%s4315_s17 + $0xe0] sm:$0xff]  ;;  %803 = vst [vmem:[#allocation2 + $0xd0] sm:$0xff] %v291_v27  ;;  %v294_v30 = vld [vmem:[%s4315_s17 + $0xe8] sm:$0xff] }
  0xbb   : > { %804 = vst [vmem:[#allocation2 + $0xd8] sm:$0xff] %v292_v28  ;;  %805 = vst [vmem:[#allocation2 + $0xe0] sm:$0xff] %v293_v29  ;;  %v295_v31 = vld [vmem:[%s4315_s17 + $0xf0] sm:$0xff]  ;;  %v296_v32 = vld [vmem:[%s4315_s17 + $0xf8] sm:$0xff] }
  0xbc   : > { %806 = vst [vmem:[#allocation2 + $0xe8] sm:$0xff] %v294_v30  ;;  %807 = vst [vmem:[#allocation2 + $0xf0] sm:$0xff] %v295_v31  ;;  %v297_v33 = vld [vmem:[%s4315_s17 + $0x100] sm:$0xff]  ;;  %v298_v34 = vld [vmem:[%s4315_s17 + $0x108] sm:$0xff] }
  0xbd   : > { %808 = vst [vmem:[#allocation2 + $0xf8] sm:$0xff] %v296_v32  ;;  %v299_v35 = vld [vmem:[%s4315_s17 + $0x110] sm:$0xff]  ;;  %809 = vst [vmem:[#allocation2 + $0x100] sm:$0xff] %v297_v33  ;;  %v300_v36 = vld [vmem:[%s4315_s17 + $0x118] sm:$0xff] }
  0xbe   : > { %810 = vst [vmem:[#allocation2 + $0x108] sm:$0xff] %v298_v34  ;;  %811 = vst [vmem:[#allocation2 + $0x110] sm:$0xff] %v299_v35  ;;  %v301_v37 = vld [vmem:[%s4315_s17 + $0x120] sm:$0xff]  ;;  %v302_v38 = vld [vmem:[%s4315_s17 + $0x128] sm:$0xff] }
  0xbf   : > { %812 = vst [vmem:[#allocation2 + $0x118] sm:$0xff] %v300_v36  ;;  %813 = vst [vmem:[#allocation2 + $0x120] sm:$0xff] %v301_v37  ;;  %v303_v39 = vld [vmem:[%s4315_s17 + $0x130] sm:$0xff]  ;;  %v304_v40 = vld [vmem:[%s4315_s17 + $0x138] sm:$0xff] }
  0xc0   : > { %814 = vst [vmem:[#allocation2 + $0x128] sm:$0xff] %v302_v38  ;;  %v305_v41 = vld [vmem:[%s4315_s17 + $0x140] sm:$0xff]  ;;  %815 = vst [vmem:[#allocation2 + $0x130] sm:$0xff] %v303_v39  ;;  %v306_v42 = vld [vmem:[%s4315_s17 + $0x148] sm:$0xff] }
  0xc1   : > { %816 = vst [vmem:[#allocation2 + $0x138] sm:$0xff] %v304_v40  ;;  %817 = vst [vmem:[#allocation2 + $0x140] sm:$0xff] %v305_v41  ;;  %v307_v43 = vld [vmem:[%s4315_s17 + $0x150] sm:$0xff]  ;;  %v308_v44 = vld [vmem:[%s4315_s17 + $0x158] sm:$0xff] }
  0xc2   : > { %818 = vst [vmem:[#allocation2 + $0x148] sm:$0xff] %v306_v42  ;;  %819 = vst [vmem:[#allocation2 + $0x150] sm:$0xff] %v307_v43  ;;  %v309_v45 = vld [vmem:[%s4315_s17 + $0x160] sm:$0xff]  ;;  %v310_v46 = vld [vmem:[%s4315_s17 + $0x168] sm:$0xff] }
  0xc3   : > { %820 = vst [vmem:[#allocation2 + $0x158] sm:$0xff] %v308_v44  ;;  %v311_v47 = vld [vmem:[%s4315_s17 + $0x170] sm:$0xff]  ;;  %821 = vst [vmem:[#allocation2 + $0x160] sm:$0xff] %v309_v45  ;;  %v312_v48 = vld [vmem:[%s4315_s17 + $0x178] sm:$0xff] }
  0xc4   : > { %822 = vst [vmem:[#allocation2 + $0x168] sm:$0xff] %v310_v46  ;;  %823 = vst [vmem:[#allocation2 + $0x170] sm:$0xff] %v311_v47  ;;  %v313_v49 = vld [vmem:[%s4315_s17 + $0x180] sm:$0xff]  ;;  %v314_v50 = vld [vmem:[%s4315_s17 + $0x188] sm:$0xff] }
  0xc5   : > { %824 = vst [vmem:[#allocation2 + $0x178] sm:$0xff] %v312_v48  ;;  %825 = vst [vmem:[#allocation2 + $0x180] sm:$0xff] %v313_v49  ;;  %v315_v51 = vld [vmem:[%s4315_s17 + $0x190] sm:$0xff]  ;;  %v316_v52 = vld [vmem:[%s4315_s17 + $0x198] sm:$0xff] }
  0xc6   : > { %826 = vst [vmem:[#allocation2 + $0x188] sm:$0xff] %v314_v50  ;;  %v317_v53 = vld [vmem:[%s4315_s17 + $0x1a0] sm:$0xff]  ;;  %827 = vst [vmem:[#allocation2 + $0x190] sm:$0xff] %v315_v51  ;;  %v318_v54 = vld [vmem:[%s4315_s17 + $0x1a8] sm:$0xff] }
  0xc7   : > { %828 = vst [vmem:[#allocation2 + $0x198] sm:$0xff] %v316_v52  ;;  %829 = vst [vmem:[#allocation2 + $0x1a0] sm:$0xff] %v317_v53  ;;  %v319_v55 = vld [vmem:[%s4315_s17 + $0x1b0] sm:$0xff]  ;;  %v320_v56 = vld [vmem:[%s4315_s17 + $0x1b8] sm:$0xff] }
  0xc8   : > { %830 = vst [vmem:[#allocation2 + $0x1a8] sm:$0xff] %v318_v54  ;;  %831 = vst [vmem:[#allocation2 + $0x1b0] sm:$0xff] %v319_v55  ;;  %v321_v57 = vld [vmem:[%s4315_s17 + $0x1c0] sm:$0xff]  ;;  %v322_v58 = vld [vmem:[%s4315_s17 + $0x1c8] sm:$0xff] }
  0xc9   : > { %832 = vst [vmem:[#allocation2 + $0x1b8] sm:$0xff] %v320_v56  ;;  %v323_v59 = vld [vmem:[%s4315_s17 + $0x1d0] sm:$0xff]  ;;  %833 = vst [vmem:[#allocation2 + $0x1c0] sm:$0xff] %v321_v57  ;;  %v324_v60 = vld [vmem:[%s4315_s17 + $0x1d8] sm:$0xff] }
  0xca   : > { %834 = vst [vmem:[#allocation2 + $0x1c8] sm:$0xff] %v322_v58  ;;  %835 = vst [vmem:[#allocation2 + $0x1d0] sm:$0xff] %v323_v59  ;;  %v325_v61 = vld [vmem:[%s4315_s17 + $0x1e0] sm:$0xff]  ;;  %v326_v62 = vld [vmem:[%s4315_s17 + $0x1e8] sm:$0xff] }
  0xcb   : > { %836 = vst [vmem:[#allocation2 + $0x1d8] sm:$0xff] %v324_v60  ;;  %837 = vst [vmem:[#allocation2 + $0x1e0] sm:$0xff] %v325_v61  ;;  %v327_v63 = vld [vmem:[%s4315_s17 + $0x1f0] sm:$0xff]  ;;  %v328_v1 = vld [vmem:[%s4315_s17 + $0x1f8] sm:$0xff] }
  0xcc   : > { %838 = vst [vmem:[#allocation2 + $0x1e8] sm:$0xff] %v326_v62  ;;  %v329_v2 = vld [vmem:[%s4315_s17 + $0x200] sm:$0xff]  ;;  %839 = vst [vmem:[#allocation2 + $0x1f0] sm:$0xff] %v327_v63  ;;  %v330_v3 = vld [vmem:[%s4315_s17 + $0x208] sm:$0xff] }
  0xcd   : > { %840 = vst [vmem:[#allocation2 + $0x1f8] sm:$0xff] %v328_v1  ;;  %841 = vst [vmem:[#allocation2 + $0x200] sm:$0xff] %v329_v2  ;;  %v331_v4 = vld [vmem:[%s4315_s17 + $0x210] sm:$0xff]  ;;  %v332_v5 = vld [vmem:[%s4315_s17 + $0x218] sm:$0xff] }
  0xce   : > { %842 = vst [vmem:[#allocation2 + $0x208] sm:$0xff] %v330_v3  ;;  %843 = vst [vmem:[#allocation2 + $0x210] sm:$0xff] %v331_v4  ;;  %v333_v6 = vld [vmem:[%s4315_s17 + $0x220] sm:$0xff]  ;;  %v334_v7 = vld [vmem:[%s4315_s17 + $0x228] sm:$0xff] }
  0xcf   : > { %844 = vst [vmem:[#allocation2 + $0x218] sm:$0xff] %v332_v5  ;;  %v335_v8 = vld [vmem:[%s4315_s17 + $0x230] sm:$0xff]  ;;  %845 = vst [vmem:[#allocation2 + $0x220] sm:$0xff] %v333_v6  ;;  %v336_v9 = vld [vmem:[%s4315_s17 + $0x238] sm:$0xff]  ;;  %v4063_v6 = vmov 0.0  }
  0xd0   : > { %846 = vst [vmem:[#allocation2 + $0x228] sm:$0xff] %v334_v7  ;;  %847 = vst [vmem:[#allocation2 + $0x230] sm:$0xff] %v335_v8  ;;  %v337_v10 = vld [vmem:[%s4315_s17 + $0x240] sm:$0xff]  ;;  %v338_v11 = vld [vmem:[%s4315_s17 + $0x248] sm:$0xff] }
  0xd1   : > { %848 = vst [vmem:[#allocation2 + $0x238] sm:$0xff] %v336_v9  ;;  %849 = vst [vmem:[#allocation2 + $0x240] sm:$0xff] %v337_v10  ;;  %v339_v12 = vld [vmem:[%s4315_s17 + $0x250] sm:$0xff]  ;;  %v340_v13 = vld [vmem:[%s4315_s17 + $0x258] sm:$0xff] }
  0xd2   : > { %850 = vst [vmem:[#allocation2 + $0x248] sm:$0xff] %v338_v11  ;;  %v341_v14 = vld [vmem:[%s4315_s17 + $0x260] sm:$0xff]  ;;  %851 = vst [vmem:[#allocation2 + $0x250] sm:$0xff] %v339_v12  ;;  %v342_v15 = vld [vmem:[%s4315_s17 + $0x268] sm:$0xff] }
  0xd3   : > { %852 = vst [vmem:[#allocation2 + $0x258] sm:$0xff] %v340_v13  ;;  %853 = vst [vmem:[#allocation2 + $0x260] sm:$0xff] %v341_v14  ;;  %v343_v16 = vld [vmem:[%s4315_s17 + $0x270] sm:$0xff]  ;;  %v344_v17 = vld [vmem:[%s4315_s17 + $0x278] sm:$0xff] }
  0xd4   : > { %854 = vst [vmem:[#allocation2 + $0x268] sm:$0xff] %v342_v15  ;;  %855 = vst [vmem:[#allocation2 + $0x270] sm:$0xff] %v343_v16  ;;  %v345_v18 = vld [vmem:[%s4315_s17 + $0x280] sm:$0xff]  ;;  %v346_v19 = vld [vmem:[%s4315_s17 + $0x288] sm:$0xff] }
  0xd5   : > { %856 = vst [vmem:[#allocation2 + $0x278] sm:$0xff] %v344_v17  ;;  %v347_v20 = vld [vmem:[%s4315_s17 + $0x290] sm:$0xff]  ;;  %857 = vst [vmem:[#allocation2 + $0x280] sm:$0xff] %v345_v18  ;;  %v348_v21 = vld [vmem:[%s4315_s17 + $0x298] sm:$0xff] }
  0xd6   : > { %858 = vst [vmem:[#allocation2 + $0x288] sm:$0xff] %v346_v19  ;;  %859 = vst [vmem:[#allocation2 + $0x290] sm:$0xff] %v347_v20  ;;  %v349_v22 = vld [vmem:[%s4315_s17 + $0x2a0] sm:$0xff]  ;;  %v350_v23 = vld [vmem:[%s4315_s17 + $0x2a8] sm:$0xff] }
  0xd7   : > { %860 = vst [vmem:[#allocation2 + $0x298] sm:$0xff] %v348_v21  ;;  %861 = vst [vmem:[#allocation2 + $0x2a0] sm:$0xff] %v349_v22  ;;  %v351_v24 = vld [vmem:[%s4315_s17 + $0x2b0] sm:$0xff]  ;;  %v352_v25 = vld [vmem:[%s4315_s17 + $0x2b8] sm:$0xff] }
  0xd8   : > { %862 = vst [vmem:[#allocation2 + $0x2a8] sm:$0xff] %v350_v23  ;;  %v353_v26 = vld [vmem:[%s4315_s17 + $0x2c0] sm:$0xff]  ;;  %863 = vst [vmem:[#allocation2 + $0x2b0] sm:$0xff] %v351_v24  ;;  %v354_v27 = vld [vmem:[%s4315_s17 + $0x2c8] sm:$0xff] }
  0xd9   : > { %864 = vst [vmem:[#allocation2 + $0x2b8] sm:$0xff] %v352_v25  ;;  %865 = vst [vmem:[#allocation2 + $0x2c0] sm:$0xff] %v353_v26  ;;  %v355_v28 = vld [vmem:[%s4315_s17 + $0x2d0] sm:$0xff]  ;;  %v356_v29 = vld [vmem:[%s4315_s17 + $0x2d8] sm:$0xff] }
  0xda   : > { %866 = vst [vmem:[#allocation2 + $0x2c8] sm:$0xff] %v354_v27  ;;  %867 = vst [vmem:[#allocation2 + $0x2d0] sm:$0xff] %v355_v28  ;;  %v357_v30 = vld [vmem:[%s4315_s17 + $0x2e0] sm:$0xff]  ;;  %v358_v31 = vld [vmem:[%s4315_s17 + $0x2e8] sm:$0xff] }
  0xdb   : > { %868 = vst [vmem:[#allocation2 + $0x2d8] sm:$0xff] %v356_v29  ;;  %v359_v32 = vld [vmem:[%s4315_s17 + $0x2f0] sm:$0xff]  ;;  %869 = vst [vmem:[#allocation2 + $0x2e0] sm:$0xff] %v357_v30  ;;  %v360_v33 = vld [vmem:[%s4315_s17 + $0x2f8] sm:$0xff] }
  0xdc   : > { %870 = vst [vmem:[#allocation2 + $0x2e8] sm:$0xff] %v358_v31  ;;  %871 = vst [vmem:[#allocation2 + $0x2f0] sm:$0xff] %v359_v32  ;;  %v361_v34 = vld [vmem:[%s4315_s17 + $0x300] sm:$0xff]  ;;  %v362_v35 = vld [vmem:[%s4315_s17 + $0x308] sm:$0xff] }
  0xdd   : > { %872 = vst [vmem:[#allocation2 + $0x2f8] sm:$0xff] %v360_v33  ;;  %873 = vst [vmem:[#allocation2 + $0x300] sm:$0xff] %v361_v34  ;;  %v363_v36 = vld [vmem:[%s4315_s17 + $0x310] sm:$0xff]  ;;  %v364_v37 = vld [vmem:[%s4315_s17 + $0x318] sm:$0xff] }
  0xde   : > { %874 = vst [vmem:[#allocation2 + $0x308] sm:$0xff] %v362_v35  ;;  %v365_v38 = vld [vmem:[%s4315_s17 + $0x320] sm:$0xff]  ;;  %875 = vst [vmem:[#allocation2 + $0x310] sm:$0xff] %v363_v36  ;;  %v366_v39 = vld [vmem:[%s4315_s17 + $0x328] sm:$0xff] }
  0xdf   : > { %876 = vst [vmem:[#allocation2 + $0x318] sm:$0xff] %v364_v37  ;;  %877 = vst [vmem:[#allocation2 + $0x320] sm:$0xff] %v365_v38  ;;  %v367_v40 = vld [vmem:[%s4315_s17 + $0x330] sm:$0xff]  ;;  %v368_v41 = vld [vmem:[%s4315_s17 + $0x338] sm:$0xff] }
  0xe0   : > { %878 = vst [vmem:[#allocation2 + $0x328] sm:$0xff] %v366_v39  ;;  %879 = vst [vmem:[#allocation2 + $0x330] sm:$0xff] %v367_v40  ;;  %v369_v42 = vld [vmem:[%s4315_s17 + $0x340] sm:$0xff]  ;;  %v370_v43 = vld [vmem:[%s4315_s17 + $0x348] sm:$0xff] }
  0xe1   : > { %880 = vst [vmem:[#allocation2 + $0x338] sm:$0xff] %v368_v41  ;;  %v371_v44 = vld [vmem:[%s4315_s17 + $0x350] sm:$0xff]  ;;  %881 = vst [vmem:[#allocation2 + $0x340] sm:$0xff] %v369_v42  ;;  %v372_v45 = vld [vmem:[%s4315_s17 + $0x358] sm:$0xff] }
  0xe2   : > { %882 = vst [vmem:[#allocation2 + $0x348] sm:$0xff] %v370_v43  ;;  %883 = vst [vmem:[#allocation2 + $0x350] sm:$0xff] %v371_v44  ;;  %v373_v46 = vld [vmem:[%s4315_s17 + $0x360] sm:$0xff]  ;;  %v374_v47 = vld [vmem:[%s4315_s17 + $0x368] sm:$0xff] }
  0xe3   : > { %884 = vst [vmem:[#allocation2 + $0x358] sm:$0xff] %v372_v45  ;;  %885 = vst [vmem:[#allocation2 + $0x360] sm:$0xff] %v373_v46  ;;  %v375_v48 = vld [vmem:[%s4315_s17 + $0x370] sm:$0xff]  ;;  %v376_v49 = vld [vmem:[%s4315_s17 + $0x378] sm:$0xff] }
  0xe4   : > { %886 = vst [vmem:[#allocation2 + $0x368] sm:$0xff] %v374_v47  ;;  %v377_v50 = vld [vmem:[%s4315_s17 + $0x380] sm:$0xff]  ;;  %887 = vst [vmem:[#allocation2 + $0x370] sm:$0xff] %v375_v48  ;;  %v378_v51 = vld [vmem:[%s4315_s17 + $0x388] sm:$0xff] }
  0xe5   : > { %888 = vst [vmem:[#allocation2 + $0x378] sm:$0xff] %v376_v49  ;;  %889 = vst [vmem:[#allocation2 + $0x380] sm:$0xff] %v377_v50  ;;  %v379_v52 = vld [vmem:[%s4315_s17 + $0x390] sm:$0xff]  ;;  %v380_v53 = vld [vmem:[%s4315_s17 + $0x398] sm:$0xff] }
  0xe6   : > { %890 = vst [vmem:[#allocation2 + $0x388] sm:$0xff] %v378_v51  ;;  %891 = vst [vmem:[#allocation2 + $0x390] sm:$0xff] %v379_v52  ;;  %v381_v54 = vld [vmem:[%s4315_s17 + $0x3a0] sm:$0xff]  ;;  %v382_v55 = vld [vmem:[%s4315_s17 + $0x3a8] sm:$0xff] }
  0xe7   : > { %892 = vst [vmem:[#allocation2 + $0x398] sm:$0xff] %v380_v53  ;;  %v383_v56 = vld [vmem:[%s4315_s17 + $0x3b0] sm:$0xff]  ;;  %893 = vst [vmem:[#allocation2 + $0x3a0] sm:$0xff] %v381_v54  ;;  %v384_v57 = vld [vmem:[%s4315_s17 + $0x3b8] sm:$0xff] }
  0xe8   : > { %894 = vst [vmem:[#allocation2 + $0x3a8] sm:$0xff] %v382_v55  ;;  %895 = vst [vmem:[#allocation2 + $0x3b0] sm:$0xff] %v383_v56  ;;  %v385_v58 = vld [vmem:[%s4315_s17 + $0x3c0] sm:$0xff]  ;;  %v386_v59 = vld [vmem:[%s4315_s17 + $0x3c8] sm:$0xff] }
  0xe9   : > { %896 = vst [vmem:[#allocation2 + $0x3b8] sm:$0xff] %v384_v57  ;;  %897 = vst [vmem:[#allocation2 + $0x3c0] sm:$0xff] %v385_v58  ;;  %v387_v60 = vld [vmem:[%s4315_s17 + $0x3d0] sm:$0xff]  ;;  %v388_v61 = vld [vmem:[%s4315_s17 + $0x3d8] sm:$0xff] }
  0xea   : > { %898 = vst [vmem:[#allocation2 + $0x3c8] sm:$0xff] %v386_v59  ;;  %v389_v62 = vld [vmem:[%s4315_s17 + $0x3e0] sm:$0xff]  ;;  %899 = vst [vmem:[#allocation2 + $0x3d0] sm:$0xff] %v387_v60  ;;  %v390_v63 = vld [vmem:[%s4315_s17 + $0x3e8] sm:$0xff] }
  0xeb   : > { %900 = vst [vmem:[#allocation2 + $0x3d8] sm:$0xff] %v388_v61  ;;  %901 = vst [vmem:[#allocation2 + $0x3e0] sm:$0xff] %v389_v62  ;;  %v391_v1 = vld [vmem:[%s4315_s17 + $0x3f0] sm:$0xff]  ;;  %v392_v2 = vld [vmem:[%s4315_s17 + $0x3f8] sm:$0xff] }
  0xec   : > { %902 = vst [vmem:[#allocation2 + $0x3e8] sm:$0xff] %v390_v63  ;;  %903 = vst [vmem:[#allocation2 + $0x3f0] sm:$0xff] %v391_v1  ;;  %v4462_v3 = vld [vmem:[%s4315_s17 + $0x400] sm:$0xff]  ;;  %v4465_v4 = vld [vmem:[%s4315_s17 + $0x408] sm:$0xff] }
  0xed   : > { %904 = vst [vmem:[#allocation2 + $0x3f8] sm:$0xff] %v392_v2  ;;  %v4468_v5 = vld [vmem:[%s4315_s17 + $0x410] sm:$0xff]  ;;  %1289 = vst [vmem:[%s4470_s27] sm:$0xff] %v4063_v6  ;;  %v396_v7 = vld [vmem:[%s4315_s17 + $0x418] sm:$0xff] }
  0xee   : > { %1290 = vst [vmem:[%s4470_s27 + $0x8] sm:$0xff] %v4063_v6  ;;  %1291 = vst [vmem:[%s4470_s27 + $0x10] sm:$0xff] %v4063_v6  ;;  %v397_v8 = vld [vmem:[%s4315_s17 + $0x420] sm:$0xff]  ;;  %v398_v9 = vld [vmem:[%s4315_s17 + $0x428] sm:$0xff] }
  0xef   : > { %1292 = vst [vmem:[%s4470_s27 + $0x18] sm:$0xff] %v4063_v6  ;;  %1293 = vst [vmem:[%s4470_s27 + $0x20] sm:$0xff] %v4063_v6  ;;  %v399_v10 = vld [vmem:[%s4315_s17 + $0x430] sm:$0xff]  ;;  %v400_v11 = vld [vmem:[%s4315_s17 + $0x438] sm:$0xff] }
  0xf0   : > { %1294 = vst [vmem:[%s4470_s27 + $0x28] sm:$0xff] %v4063_v6  ;;  %1295 = vst [vmem:[%s4470_s27 + $0x30] sm:$0xff] %v4063_v6  ;;  %v401_v12 = vld [vmem:[%s4315_s17 + $0x440] sm:$0xff]  ;;  %v402_v13 = vld [vmem:[%s4315_s17 + $0x448] sm:$0xff] }
  0xf1   : > { %1296 = vst [vmem:[%s4470_s27 + $0x38] sm:$0xff] %v4063_v6  ;;  %1297 = vst [vmem:[%s4470_s27 + $0x40] sm:$0xff] %v4063_v6  ;;  %v403_v14 = vld [vmem:[%s4315_s17 + $0x450] sm:$0xff]  ;;  %v404_v15 = vld [vmem:[%s4315_s17 + $0x458] sm:$0xff] }
  0xf2   : > { %1298 = vst [vmem:[%s4470_s27 + $0x48] sm:$0xff] %v4063_v6  ;;  %1299 = vst [vmem:[%s4470_s27 + $0x50] sm:$0xff] %v4063_v6  ;;  %v405_v16 = vld [vmem:[%s4315_s17 + $0x460] sm:$0xff]  ;;  %v406_v17 = vld [vmem:[%s4315_s17 + $0x468] sm:$0xff] }
  0xf3   : > { %1300 = vst [vmem:[%s4470_s27 + $0x58] sm:$0xff] %v4063_v6  ;;  %1301 = vst [vmem:[%s4470_s27 + $0x60] sm:$0xff] %v4063_v6  ;;  %v407_v18 = vld [vmem:[%s4315_s17 + $0x470] sm:$0xff]  ;;  %v408_v19 = vld [vmem:[%s4315_s17 + $0x478] sm:$0xff] }
  0xf4   : > { %1302 = vst [vmem:[%s4470_s27 + $0x68] sm:$0xff] %v4063_v6  ;;  %1303 = vst [vmem:[%s4470_s27 + $0x70] sm:$0xff] %v4063_v6  ;;  %v409_v20 = vld [vmem:[%s4315_s17 + $0x480] sm:$0xff]  ;;  %v410_v21 = vld [vmem:[%s4315_s17 + $0x488] sm:$0xff] }
  0xf5   : > { %1304 = vst [vmem:[%s4470_s27 + $0x78] sm:$0xff] %v4063_v6  ;;  %1305 = vst [vmem:[%s4470_s27 + $0x80] sm:$0xff] %v4063_v6  ;;  %v411_v22 = vld [vmem:[%s4315_s17 + $0x490] sm:$0xff]  ;;  %v412_v23 = vld [vmem:[%s4315_s17 + $0x498] sm:$0xff] }
  0xf6   : > { %1306 = vst [vmem:[%s4470_s27 + $0x88] sm:$0xff] %v4063_v6  ;;  %1307 = vst [vmem:[%s4470_s27 + $0x90] sm:$0xff] %v4063_v6  ;;  %v413_v24 = vld [vmem:[%s4315_s17 + $0x4a0] sm:$0xff]  ;;  %v414_v25 = vld [vmem:[%s4315_s17 + $0x4a8] sm:$0xff] }
  0xf7   : > { %1308 = vst [vmem:[%s4470_s27 + $0x98] sm:$0xff] %v4063_v6  ;;  %1309 = vst [vmem:[%s4470_s27 + $0xa0] sm:$0xff] %v4063_v6  ;;  %v415_v26 = vld [vmem:[%s4315_s17 + $0x4b0] sm:$0xff]  ;;  %v416_v27 = vld [vmem:[%s4315_s17 + $0x4b8] sm:$0xff] }
  0xf8   : > { %1310 = vst [vmem:[%s4470_s27 + $0xa8] sm:$0xff] %v4063_v6  ;;  %1311 = vst [vmem:[%s4470_s27 + $0xb0] sm:$0xff] %v4063_v6  ;;  %v417_v28 = vld [vmem:[%s4315_s17 + $0x4c0] sm:$0xff]  ;;  %v418_v29 = vld [vmem:[%s4315_s17 + $0x4c8] sm:$0xff] }
  0xf9   : > { %1312 = vst [vmem:[%s4470_s27 + $0xb8] sm:$0xff] %v4063_v6  ;;  %1313 = vst [vmem:[%s4470_s27 + $0xc0] sm:$0xff] %v4063_v6  ;;  %v419_v30 = vld [vmem:[%s4315_s17 + $0x4d0] sm:$0xff]  ;;  %v420_v31 = vld [vmem:[%s4315_s17 + $0x4d8] sm:$0xff] }
  0xfa   : > { %1314 = vst [vmem:[%s4470_s27 + $0xc8] sm:$0xff] %v4063_v6  ;;  %1315 = vst [vmem:[%s4470_s27 + $0xd0] sm:$0xff] %v4063_v6  ;;  %v421_v32 = vld [vmem:[%s4315_s17 + $0x4e0] sm:$0xff]  ;;  %v422_v33 = vld [vmem:[%s4315_s17 + $0x4e8] sm:$0xff] }
  0xfb   : > { %1316 = vst [vmem:[%s4470_s27 + $0xd8] sm:$0xff] %v4063_v6  ;;  %1317 = vst [vmem:[%s4470_s27 + $0xe0] sm:$0xff] %v4063_v6  ;;  %v423_v34 = vld [vmem:[%s4315_s17 + $0x4f0] sm:$0xff]  ;;  %v424_v35 = vld [vmem:[%s4315_s17 + $0x4f8] sm:$0xff] }
  0xfc   : > { %1318 = vst [vmem:[%s4470_s27 + $0xe8] sm:$0xff] %v4063_v6  ;;  %1319 = vst [vmem:[%s4470_s27 + $0xf0] sm:$0xff] %v4063_v6  ;;  %v425_v36 = vld [vmem:[%s4315_s17 + $0x500] sm:$0xff]  ;;  %v426_v37 = vld [vmem:[%s4315_s17 + $0x508] sm:$0xff] }
  0xfd   : > { %1320 = vst [vmem:[%s4470_s27 + $0xf8] sm:$0xff] %v4063_v6  ;;  %1321 = vst [vmem:[%s4470_s27 + $0x100] sm:$0xff] %v4063_v6  ;;  %v427_v38 = vld [vmem:[%s4315_s17 + $0x510] sm:$0xff]  ;;  %v428_v39 = vld [vmem:[%s4315_s17 + $0x518] sm:$0xff] }
  0xfe   : > { %1322 = vst [vmem:[%s4470_s27 + $0x108] sm:$0xff] %v4063_v6  ;;  %1323 = vst [vmem:[%s4470_s27 + $0x110] sm:$0xff] %v4063_v6  ;;  %v429_v40 = vld [vmem:[%s4315_s17 + $0x520] sm:$0xff]  ;;  %v430_v41 = vld [vmem:[%s4315_s17 + $0x528] sm:$0xff] }
  0xff   : > { %1324 = vst [vmem:[%s4470_s27 + $0x118] sm:$0xff] %v4063_v6  ;;  %1325 = vst [vmem:[%s4470_s27 + $0x120] sm:$0xff] %v4063_v6  ;;  %v431_v42 = vld [vmem:[%s4315_s17 + $0x530] sm:$0xff]  ;;  %v432_v43 = vld [vmem:[%s4315_s17 + $0x538] sm:$0xff] }
 0x100   : > { %1326 = vst [vmem:[%s4470_s27 + $0x128] sm:$0xff] %v4063_v6  ;;  %1327 = vst [vmem:[%s4470_s27 + $0x130] sm:$0xff] %v4063_v6  ;;  %v433_v44 = vld [vmem:[%s4315_s17 + $0x540] sm:$0xff]  ;;  %v434_v45 = vld [vmem:[%s4315_s17 + $0x548] sm:$0xff] }
 0x101   : > { %1328 = vst [vmem:[%s4470_s27 + $0x138] sm:$0xff] %v4063_v6  ;;  %1329 = vst [vmem:[%s4470_s27 + $0x140] sm:$0xff] %v4063_v6  ;;  %v435_v46 = vld [vmem:[%s4315_s17 + $0x550] sm:$0xff]  ;;  %v436_v47 = vld [vmem:[%s4315_s17 + $0x558] sm:$0xff] }
 0x102   : > { %1330 = vst [vmem:[%s4470_s27 + $0x148] sm:$0xff] %v4063_v6  ;;  %1331 = vst [vmem:[%s4470_s27 + $0x150] sm:$0xff] %v4063_v6  ;;  %v437_v48 = vld [vmem:[%s4315_s17 + $0x560] sm:$0xff]  ;;  %v438_v49 = vld [vmem:[%s4315_s17 + $0x568] sm:$0xff] }
 0x103   : > { %1332 = vst [vmem:[%s4470_s27 + $0x158] sm:$0xff] %v4063_v6  ;;  %1333 = vst [vmem:[%s4470_s27 + $0x160] sm:$0xff] %v4063_v6  ;;  %v439_v50 = vld [vmem:[%s4315_s17 + $0x570] sm:$0xff]  ;;  %v440_v51 = vld [vmem:[%s4315_s17 + $0x578] sm:$0xff] }
 0x104   : > { %1334 = vst [vmem:[%s4470_s27 + $0x168] sm:$0xff] %v4063_v6  ;;  %1335 = vst [vmem:[%s4470_s27 + $0x170] sm:$0xff] %v4063_v6  ;;  %v441_v52 = vld [vmem:[%s4315_s17 + $0x580] sm:$0xff]  ;;  %v442_v53 = vld [vmem:[%s4315_s17 + $0x588] sm:$0xff] }
 0x105   : > { %1336 = vst [vmem:[%s4470_s27 + $0x178] sm:$0xff] %v4063_v6  ;;  %1337 = vst [vmem:[%s4470_s27 + $0x180] sm:$0xff] %v4063_v6  ;;  %v443_v54 = vld [vmem:[%s4315_s17 + $0x590] sm:$0xff]  ;;  %v444_v55 = vld [vmem:[%s4315_s17 + $0x598] sm:$0xff] }
 0x106   : > { %1338 = vst [vmem:[%s4470_s27 + $0x188] sm:$0xff] %v4063_v6  ;;  %1339 = vst [vmem:[%s4470_s27 + $0x190] sm:$0xff] %v4063_v6  ;;  %v445_v56 = vld [vmem:[%s4315_s17 + $0x5a0] sm:$0xff]  ;;  %v446_v57 = vld [vmem:[%s4315_s17 + $0x5a8] sm:$0xff] }
 0x107   : > { %1340 = vst [vmem:[%s4470_s27 + $0x198] sm:$0xff] %v4063_v6  ;;  %1341 = vst [vmem:[%s4470_s27 + $0x1a0] sm:$0xff] %v4063_v6  ;;  %v447_v58 = vld [vmem:[%s4315_s17 + $0x5b0] sm:$0xff]  ;;  %v448_v59 = vld [vmem:[%s4315_s17 + $0x5b8] sm:$0xff] }
 0x108   : > { %1342 = vst [vmem:[%s4470_s27 + $0x1a8] sm:$0xff] %v4063_v6  ;;  %1343 = vst [vmem:[%s4470_s27 + $0x1b0] sm:$0xff] %v4063_v6  ;;  %v449_v60 = vld [vmem:[%s4315_s17 + $0x5c0] sm:$0xff]  ;;  %v450_v61 = vld [vmem:[%s4315_s17 + $0x5c8] sm:$0xff] }
 0x109   : > { %1344 = vst [vmem:[%s4470_s27 + $0x1b8] sm:$0xff] %v4063_v6  ;;  %1345 = vst [vmem:[%s4470_s27 + $0x1c0] sm:$0xff] %v4063_v6  ;;  %v451_v62 = vld [vmem:[%s4315_s17 + $0x5d0] sm:$0xff]  ;;  %v452_v63 = vld [vmem:[%s4315_s17 + $0x5d8] sm:$0xff] }
 0x10a   : > { %1346 = vst [vmem:[%s4470_s27 + $0x1c8] sm:$0xff] %v4063_v6  ;;  %1347 = vst [vmem:[%s4470_s27 + $0x1d0] sm:$0xff] %v4063_v6  ;;  %v453_v1 = vld [vmem:[%s4315_s17 + $0x5e0] sm:$0xff]  ;;  %v454_v2 = vld [vmem:[%s4315_s17 + $0x5e8] sm:$0xff] }
 0x10b   : > { %1348 = vst [vmem:[%s4470_s27 + $0x1d8] sm:$0xff] %v4063_v6  ;;  %1349 = vst [vmem:[%s4470_s27 + $0x1e0] sm:$0xff] %v4063_v6 }
 0x10c   : > { %1350 = vst [vmem:[%s4470_s27 + $0x1e8] sm:$0xff] %v4063_v6  ;;  %1351 = vst [vmem:[%s4470_s27 + $0x1f0] sm:$0xff] %v4063_v6 }
 0x10d   : > { %1352 = vst [vmem:[%s4470_s27 + $0x1f8] sm:$0xff] %v4063_v6  ;;  %905 = vst [vmem:[#allocation2 + $0x400] sm:$0xff] %v4462_v3  ;;  %v455_v3 = vld [vmem:[%s4315_s17 + $0x5f0] sm:$0xff]  ;;  %v458_v6 = vld [vmem:[%s4315_s17 + $0x608] sm:$0xff] }
 0x10e   : > { %906 = vst [vmem:[#allocation2 + $0x408] sm:$0xff] %v4465_v4  ;;  %907 = vst [vmem:[#allocation2 + $0x410] sm:$0xff] %v4468_v5  ;;  %v456_v4 = vld [vmem:[%s4315_s17 + $0x5f8] sm:$0xff]  ;;  %v457_v5 = vld [vmem:[%s4315_s17 + $0x600] sm:$0xff] }
 0x10f   : > { %908 = vst [vmem:[#allocation2 + $0x418] sm:$0xff] %v396_v7  ;;  %909 = vst [vmem:[#allocation2 + $0x420] sm:$0xff] %v397_v8  ;;  %v459_v7 = vld [vmem:[%s4315_s17 + $0x610] sm:$0xff]  ;;  %v460_v8 = vld [vmem:[%s4315_s17 + $0x618] sm:$0xff] }
 0x110   : > { %910 = vst [vmem:[#allocation2 + $0x428] sm:$0xff] %v398_v9  ;;  %911 = vst [vmem:[#allocation2 + $0x430] sm:$0xff] %v399_v10  ;;  %v461_v9 = vld [vmem:[%s4315_s17 + $0x620] sm:$0xff]  ;;  %v462_v10 = vld [vmem:[%s4315_s17 + $0x628] sm:$0xff] }
 0x111   : > { %912 = vst [vmem:[#allocation2 + $0x438] sm:$0xff] %v400_v11  ;;  %913 = vst [vmem:[#allocation2 + $0x440] sm:$0xff] %v401_v12  ;;  %v463_v11 = vld [vmem:[%s4315_s17 + $0x630] sm:$0xff]  ;;  %v464_v12 = vld [vmem:[%s4315_s17 + $0x638] sm:$0xff] }
 0x112   : > { %914 = vst [vmem:[#allocation2 + $0x448] sm:$0xff] %v402_v13  ;;  %915 = vst [vmem:[#allocation2 + $0x450] sm:$0xff] %v403_v14  ;;  %v465_v13 = vld [vmem:[%s4315_s17 + $0x640] sm:$0xff]  ;;  %v466_v14 = vld [vmem:[%s4315_s17 + $0x648] sm:$0xff] }
 0x113   : > { %916 = vst [vmem:[#allocation2 + $0x458] sm:$0xff] %v404_v15  ;;  %917 = vst [vmem:[#allocation2 + $0x460] sm:$0xff] %v405_v16  ;;  %v467_v15 = vld [vmem:[%s4315_s17 + $0x650] sm:$0xff]  ;;  %v468_v16 = vld [vmem:[%s4315_s17 + $0x658] sm:$0xff] }
 0x114   : > { %918 = vst [vmem:[#allocation2 + $0x468] sm:$0xff] %v406_v17  ;;  %919 = vst [vmem:[#allocation2 + $0x470] sm:$0xff] %v407_v18  ;;  %v469_v17 = vld [vmem:[%s4315_s17 + $0x660] sm:$0xff]  ;;  %v470_v18 = vld [vmem:[%s4315_s17 + $0x668] sm:$0xff] }
 0x115   : > { %920 = vst [vmem:[#allocation2 + $0x478] sm:$0xff] %v408_v19  ;;  %921 = vst [vmem:[#allocation2 + $0x480] sm:$0xff] %v409_v20  ;;  %v471_v19 = vld [vmem:[%s4315_s17 + $0x670] sm:$0xff]  ;;  %v472_v20 = vld [vmem:[%s4315_s17 + $0x678] sm:$0xff] }
 0x116   : > { %922 = vst [vmem:[#allocation2 + $0x488] sm:$0xff] %v410_v21  ;;  %923 = vst [vmem:[#allocation2 + $0x490] sm:$0xff] %v411_v22  ;;  %v473_v21 = vld [vmem:[%s4315_s17 + $0x680] sm:$0xff]  ;;  %v474_v22 = vld [vmem:[%s4315_s17 + $0x688] sm:$0xff] }
 0x117   : > { %924 = vst [vmem:[#allocation2 + $0x498] sm:$0xff] %v412_v23  ;;  %925 = vst [vmem:[#allocation2 + $0x4a0] sm:$0xff] %v413_v24  ;;  %v475_v23 = vld [vmem:[%s4315_s17 + $0x690] sm:$0xff]  ;;  %v476_v24 = vld [vmem:[%s4315_s17 + $0x698] sm:$0xff] }
 0x118   : > { %926 = vst [vmem:[#allocation2 + $0x4a8] sm:$0xff] %v414_v25  ;;  %927 = vst [vmem:[#allocation2 + $0x4b0] sm:$0xff] %v415_v26  ;;  %v477_v25 = vld [vmem:[%s4315_s17 + $0x6a0] sm:$0xff]  ;;  %v478_v26 = vld [vmem:[%s4315_s17 + $0x6a8] sm:$0xff] }
 0x119   : > { %928 = vst [vmem:[#allocation2 + $0x4b8] sm:$0xff] %v416_v27  ;;  %929 = vst [vmem:[#allocation2 + $0x4c0] sm:$0xff] %v417_v28  ;;  %v479_v27 = vld [vmem:[%s4315_s17 + $0x6b0] sm:$0xff]  ;;  %v480_v28 = vld [vmem:[%s4315_s17 + $0x6b8] sm:$0xff] }
 0x11a   : > { %930 = vst [vmem:[#allocation2 + $0x4c8] sm:$0xff] %v418_v29  ;;  %931 = vst [vmem:[#allocation2 + $0x4d0] sm:$0xff] %v419_v30  ;;  %v481_v29 = vld [vmem:[%s4315_s17 + $0x6c0] sm:$0xff]  ;;  %v482_v30 = vld [vmem:[%s4315_s17 + $0x6c8] sm:$0xff] }
 0x11b   : > { %932 = vst [vmem:[#allocation2 + $0x4d8] sm:$0xff] %v420_v31  ;;  %933 = vst [vmem:[#allocation2 + $0x4e0] sm:$0xff] %v421_v32  ;;  %v483_v31 = vld [vmem:[%s4315_s17 + $0x6d0] sm:$0xff]  ;;  %v484_v32 = vld [vmem:[%s4315_s17 + $0x6d8] sm:$0xff] }
 0x11c   : > { %934 = vst [vmem:[#allocation2 + $0x4e8] sm:$0xff] %v422_v33  ;;  %935 = vst [vmem:[#allocation2 + $0x4f0] sm:$0xff] %v423_v34  ;;  %v485_v33 = vld [vmem:[%s4315_s17 + $0x6e0] sm:$0xff]  ;;  %v486_v34 = vld [vmem:[%s4315_s17 + $0x6e8] sm:$0xff] }
 0x11d   : > { %936 = vst [vmem:[#allocation2 + $0x4f8] sm:$0xff] %v424_v35  ;;  %937 = vst [vmem:[#allocation2 + $0x500] sm:$0xff] %v425_v36  ;;  %v487_v35 = vld [vmem:[%s4315_s17 + $0x6f0] sm:$0xff]  ;;  %v488_v36 = vld [vmem:[%s4315_s17 + $0x6f8] sm:$0xff] }
 0x11e   : > { %938 = vst [vmem:[#allocation2 + $0x508] sm:$0xff] %v426_v37  ;;  %939 = vst [vmem:[#allocation2 + $0x510] sm:$0xff] %v427_v38  ;;  %v489_v37 = vld [vmem:[%s4315_s17 + $0x700] sm:$0xff]  ;;  %v490_v38 = vld [vmem:[%s4315_s17 + $0x708] sm:$0xff] }
 0x11f   : > { %940 = vst [vmem:[#allocation2 + $0x518] sm:$0xff] %v428_v39  ;;  %941 = vst [vmem:[#allocation2 + $0x520] sm:$0xff] %v429_v40  ;;  %v491_v39 = vld [vmem:[%s4315_s17 + $0x710] sm:$0xff]  ;;  %v492_v40 = vld [vmem:[%s4315_s17 + $0x718] sm:$0xff] }
 0x120   : > { %942 = vst [vmem:[#allocation2 + $0x528] sm:$0xff] %v430_v41  ;;  %943 = vst [vmem:[#allocation2 + $0x530] sm:$0xff] %v431_v42  ;;  %v493_v41 = vld [vmem:[%s4315_s17 + $0x720] sm:$0xff]  ;;  %v494_v42 = vld [vmem:[%s4315_s17 + $0x728] sm:$0xff] }
 0x121   : > { %944 = vst [vmem:[#allocation2 + $0x538] sm:$0xff] %v432_v43  ;;  %945 = vst [vmem:[#allocation2 + $0x540] sm:$0xff] %v433_v44  ;;  %v495_v43 = vld [vmem:[%s4315_s17 + $0x730] sm:$0xff]  ;;  %v496_v44 = vld [vmem:[%s4315_s17 + $0x738] sm:$0xff] }
 0x122   : > { %946 = vst [vmem:[#allocation2 + $0x548] sm:$0xff] %v434_v45  ;;  %947 = vst [vmem:[#allocation2 + $0x550] sm:$0xff] %v435_v46  ;;  %v497_v45 = vld [vmem:[%s4315_s17 + $0x740] sm:$0xff]  ;;  %v498_v46 = vld [vmem:[%s4315_s17 + $0x748] sm:$0xff] }
 0x123   : > { %948 = vst [vmem:[#allocation2 + $0x558] sm:$0xff] %v436_v47  ;;  %949 = vst [vmem:[#allocation2 + $0x560] sm:$0xff] %v437_v48  ;;  %v499_v47 = vld [vmem:[%s4315_s17 + $0x750] sm:$0xff]  ;;  %v500_v48 = vld [vmem:[%s4315_s17 + $0x758] sm:$0xff] }
 0x124   : > { %950 = vst [vmem:[#allocation2 + $0x568] sm:$0xff] %v438_v49  ;;  %951 = vst [vmem:[#allocation2 + $0x570] sm:$0xff] %v439_v50  ;;  %v501_v49 = vld [vmem:[%s4315_s17 + $0x760] sm:$0xff]  ;;  %v502_v50 = vld [vmem:[%s4315_s17 + $0x768] sm:$0xff] }
 0x125   : > { %952 = vst [vmem:[#allocation2 + $0x578] sm:$0xff] %v440_v51  ;;  %953 = vst [vmem:[#allocation2 + $0x580] sm:$0xff] %v441_v52  ;;  %v503_v51 = vld [vmem:[%s4315_s17 + $0x770] sm:$0xff]  ;;  %v504_v52 = vld [vmem:[%s4315_s17 + $0x778] sm:$0xff] }
 0x126   : > { %954 = vst [vmem:[#allocation2 + $0x588] sm:$0xff] %v442_v53  ;;  %955 = vst [vmem:[#allocation2 + $0x590] sm:$0xff] %v443_v54  ;;  %v505_v53 = vld [vmem:[%s4315_s17 + $0x780] sm:$0xff]  ;;  %v506_v54 = vld [vmem:[%s4315_s17 + $0x788] sm:$0xff] }
 0x127   : > { %956 = vst [vmem:[#allocation2 + $0x598] sm:$0xff] %v444_v55  ;;  %957 = vst [vmem:[#allocation2 + $0x5a0] sm:$0xff] %v445_v56  ;;  %v507_v55 = vld [vmem:[%s4315_s17 + $0x790] sm:$0xff]  ;;  %v508_v56 = vld [vmem:[%s4315_s17 + $0x798] sm:$0xff] }
 0x128   : > { %958 = vst [vmem:[#allocation2 + $0x5a8] sm:$0xff] %v446_v57  ;;  %959 = vst [vmem:[#allocation2 + $0x5b0] sm:$0xff] %v447_v58  ;;  %v509_v57 = vld [vmem:[%s4315_s17 + $0x7a0] sm:$0xff]  ;;  %v510_v58 = vld [vmem:[%s4315_s17 + $0x7a8] sm:$0xff] }
 0x129   : > { %960 = vst [vmem:[#allocation2 + $0x5b8] sm:$0xff] %v448_v59  ;;  %961 = vst [vmem:[#allocation2 + $0x5c0] sm:$0xff] %v449_v60  ;;  %v511_v59 = vld [vmem:[%s4315_s17 + $0x7b0] sm:$0xff]  ;;  %v512_v60 = vld [vmem:[%s4315_s17 + $0x7b8] sm:$0xff] }
 0x12a   : > { %962 = vst [vmem:[#allocation2 + $0x5c8] sm:$0xff] %v450_v61  ;;  %963 = vst [vmem:[#allocation2 + $0x5d0] sm:$0xff] %v451_v62  ;;  %v513_v61 = vld [vmem:[%s4315_s17 + $0x7c0] sm:$0xff]  ;;  %v514_v62 = vld [vmem:[%s4315_s17 + $0x7c8] sm:$0xff] }
 0x12b   : > { %964 = vst [vmem:[#allocation2 + $0x5d8] sm:$0xff] %v452_v63  ;;  %965 = vst [vmem:[#allocation2 + $0x5e0] sm:$0xff] %v453_v1  ;;  %v515_v63 = vld [vmem:[%s4315_s17 + $0x7d0] sm:$0xff]  ;;  %v516_v1 = vld [vmem:[%s4315_s17 + $0x7d8] sm:$0xff] }
 0x12c   : > { %966 = vst [vmem:[#allocation2 + $0x5e8] sm:$0xff] %v454_v2  ;;  %967 = vst [vmem:[#allocation2 + $0x5f0] sm:$0xff] %v455_v3  ;;  %v517_v2 = vld [vmem:[%s4315_s17 + $0x7e0] sm:$0xff]  ;;  %v518_v3 = vld [vmem:[%s4315_s17 + $0x7e8] sm:$0xff] }
 0x12d   : > { %968 = vst [vmem:[#allocation2 + $0x5f8] sm:$0xff] %v456_v4  ;;  %969 = vst [vmem:[#allocation2 + $0x600] sm:$0xff] %v457_v5  ;;  %v519_v4 = vld [vmem:[%s4315_s17 + $0x7f0] sm:$0xff]  ;;  %v520_v5 = vld [vmem:[%s4315_s17 + $0x7f8] sm:$0xff] }
 0x12e   : > { %970 = vst [vmem:[#allocation2 + $0x608] sm:$0xff] %v458_v6  ;;  %971 = vst [vmem:[#allocation2 + $0x610] sm:$0xff] %v459_v7  ;;  %v521_v6 = vld [vmem:[%s4315_s17 + $0x800] sm:$0xff]  ;;  %v522_v7 = vld [vmem:[%s4315_s17 + $0x808] sm:$0xff] }
 0x12f   : > { %972 = vst [vmem:[#allocation2 + $0x618] sm:$0xff] %v460_v8  ;;  %973 = vst [vmem:[#allocation2 + $0x620] sm:$0xff] %v461_v9  ;;  %v523_v8 = vld [vmem:[%s4315_s17 + $0x810] sm:$0xff]  ;;  %v524_v9 = vld [vmem:[%s4315_s17 + $0x818] sm:$0xff] }
 0x130   : > { %974 = vst [vmem:[#allocation2 + $0x628] sm:$0xff] %v462_v10  ;;  %975 = vst [vmem:[#allocation2 + $0x630] sm:$0xff] %v463_v11  ;;  %v525_v10 = vld [vmem:[%s4315_s17 + $0x820] sm:$0xff]  ;;  %v526_v11 = vld [vmem:[%s4315_s17 + $0x828] sm:$0xff] }
 0x131   : > { %976 = vst [vmem:[#allocation2 + $0x638] sm:$0xff] %v464_v12  ;;  %977 = vst [vmem:[#allocation2 + $0x640] sm:$0xff] %v465_v13  ;;  %v527_v12 = vld [vmem:[%s4315_s17 + $0x830] sm:$0xff]  ;;  %v528_v13 = vld [vmem:[%s4315_s17 + $0x838] sm:$0xff] }
 0x132   : > { %978 = vst [vmem:[#allocation2 + $0x648] sm:$0xff] %v466_v14  ;;  %979 = vst [vmem:[#allocation2 + $0x650] sm:$0xff] %v467_v15  ;;  %v529_v14 = vld [vmem:[%s4315_s17 + $0x840] sm:$0xff]  ;;  %v530_v15 = vld [vmem:[%s4315_s17 + $0x848] sm:$0xff] }
 0x133   : > { %980 = vst [vmem:[#allocation2 + $0x658] sm:$0xff] %v468_v16  ;;  %981 = vst [vmem:[#allocation2 + $0x660] sm:$0xff] %v469_v17  ;;  %v531_v16 = vld [vmem:[%s4315_s17 + $0x850] sm:$0xff]  ;;  %v532_v17 = vld [vmem:[%s4315_s17 + $0x858] sm:$0xff] }
 0x134   : > { %982 = vst [vmem:[#allocation2 + $0x668] sm:$0xff] %v470_v18  ;;  %983 = vst [vmem:[#allocation2 + $0x670] sm:$0xff] %v471_v19  ;;  %v533_v18 = vld [vmem:[%s4315_s17 + $0x860] sm:$0xff]  ;;  %v534_v19 = vld [vmem:[%s4315_s17 + $0x868] sm:$0xff] }
 0x135   : > { %984 = vst [vmem:[#allocation2 + $0x678] sm:$0xff] %v472_v20  ;;  %985 = vst [vmem:[#allocation2 + $0x680] sm:$0xff] %v473_v21  ;;  %v535_v20 = vld [vmem:[%s4315_s17 + $0x870] sm:$0xff]  ;;  %v536_v21 = vld [vmem:[%s4315_s17 + $0x878] sm:$0xff] }
 0x136   : > { %986 = vst [vmem:[#allocation2 + $0x688] sm:$0xff] %v474_v22  ;;  %987 = vst [vmem:[#allocation2 + $0x690] sm:$0xff] %v475_v23  ;;  %v537_v22 = vld [vmem:[%s4315_s17 + $0x880] sm:$0xff]  ;;  %v538_v23 = vld [vmem:[%s4315_s17 + $0x888] sm:$0xff] }
 0x137   : > { %988 = vst [vmem:[#allocation2 + $0x698] sm:$0xff] %v476_v24  ;;  %989 = vst [vmem:[#allocation2 + $0x6a0] sm:$0xff] %v477_v25  ;;  %v539_v24 = vld [vmem:[%s4315_s17 + $0x890] sm:$0xff]  ;;  %v540_v25 = vld [vmem:[%s4315_s17 + $0x898] sm:$0xff] }
 0x138   : > { %990 = vst [vmem:[#allocation2 + $0x6a8] sm:$0xff] %v478_v26  ;;  %991 = vst [vmem:[#allocation2 + $0x6b0] sm:$0xff] %v479_v27  ;;  %v541_v26 = vld [vmem:[%s4315_s17 + $0x8a0] sm:$0xff]  ;;  %v542_v27 = vld [vmem:[%s4315_s17 + $0x8a8] sm:$0xff] }
 0x139   : > { %992 = vst [vmem:[#allocation2 + $0x6b8] sm:$0xff] %v480_v28  ;;  %993 = vst [vmem:[#allocation2 + $0x6c0] sm:$0xff] %v481_v29  ;;  %v543_v28 = vld [vmem:[%s4315_s17 + $0x8b0] sm:$0xff]  ;;  %v544_v29 = vld [vmem:[%s4315_s17 + $0x8b8] sm:$0xff] }
 0x13a   : > { %994 = vst [vmem:[#allocation2 + $0x6c8] sm:$0xff] %v482_v30  ;;  %995 = vst [vmem:[#allocation2 + $0x6d0] sm:$0xff] %v483_v31  ;;  %v545_v30 = vld [vmem:[%s4315_s17 + $0x8c0] sm:$0xff]  ;;  %v546_v31 = vld [vmem:[%s4315_s17 + $0x8c8] sm:$0xff] }
 0x13b   : > { %996 = vst [vmem:[#allocation2 + $0x6d8] sm:$0xff] %v484_v32  ;;  %997 = vst [vmem:[#allocation2 + $0x6e0] sm:$0xff] %v485_v33  ;;  %v547_v32 = vld [vmem:[%s4315_s17 + $0x8d0] sm:$0xff]  ;;  %v548_v33 = vld [vmem:[%s4315_s17 + $0x8d8] sm:$0xff] }
 0x13c   : > { %998 = vst [vmem:[#allocation2 + $0x6e8] sm:$0xff] %v486_v34  ;;  %999 = vst [vmem:[#allocation2 + $0x6f0] sm:$0xff] %v487_v35  ;;  %v549_v34 = vld [vmem:[%s4315_s17 + $0x8e0] sm:$0xff]  ;;  %v550_v35 = vld [vmem:[%s4315_s17 + $0x8e8] sm:$0xff] }
 0x13d   : > { %1000 = vst [vmem:[#allocation2 + $0x6f8] sm:$0xff] %v488_v36  ;;  %1001 = vst [vmem:[#allocation2 + $0x700] sm:$0xff] %v489_v37  ;;  %v551_v36 = vld [vmem:[%s4315_s17 + $0x8f0] sm:$0xff]  ;;  %v552_v37 = vld [vmem:[%s4315_s17 + $0x8f8] sm:$0xff] }
 0x13e   : > { %1002 = vst [vmem:[#allocation2 + $0x708] sm:$0xff] %v490_v38  ;;  %1003 = vst [vmem:[#allocation2 + $0x710] sm:$0xff] %v491_v39  ;;  %v553_v38 = vld [vmem:[%s4315_s17 + $0x900] sm:$0xff]  ;;  %v554_v39 = vld [vmem:[%s4315_s17 + $0x908] sm:$0xff] }
 0x13f   : > { %1004 = vst [vmem:[#allocation2 + $0x718] sm:$0xff] %v492_v40  ;;  %1005 = vst [vmem:[#allocation2 + $0x720] sm:$0xff] %v493_v41  ;;  %v555_v40 = vld [vmem:[%s4315_s17 + $0x910] sm:$0xff]  ;;  %v556_v41 = vld [vmem:[%s4315_s17 + $0x918] sm:$0xff] }
 0x140   : > { %1006 = vst [vmem:[#allocation2 + $0x728] sm:$0xff] %v494_v42  ;;  %1007 = vst [vmem:[#allocation2 + $0x730] sm:$0xff] %v495_v43  ;;  %v557_v42 = vld [vmem:[%s4315_s17 + $0x920] sm:$0xff]  ;;  %v558_v43 = vld [vmem:[%s4315_s17 + $0x928] sm:$0xff] }
 0x141   : > { %1008 = vst [vmem:[#allocation2 + $0x738] sm:$0xff] %v496_v44  ;;  %1009 = vst [vmem:[#allocation2 + $0x740] sm:$0xff] %v497_v45  ;;  %v559_v44 = vld [vmem:[%s4315_s17 + $0x930] sm:$0xff]  ;;  %v560_v45 = vld [vmem:[%s4315_s17 + $0x938] sm:$0xff] }
 0x142   : > { %1010 = vst [vmem:[#allocation2 + $0x748] sm:$0xff] %v498_v46  ;;  %1011 = vst [vmem:[#allocation2 + $0x750] sm:$0xff] %v499_v47  ;;  %v561_v46 = vld [vmem:[%s4315_s17 + $0x940] sm:$0xff]  ;;  %v562_v47 = vld [vmem:[%s4315_s17 + $0x948] sm:$0xff] }
 0x143   : > { %1012 = vst [vmem:[#allocation2 + $0x758] sm:$0xff] %v500_v48  ;;  %1013 = vst [vmem:[#allocation2 + $0x760] sm:$0xff] %v501_v49  ;;  %v563_v48 = vld [vmem:[%s4315_s17 + $0x950] sm:$0xff]  ;;  %v564_v49 = vld [vmem:[%s4315_s17 + $0x958] sm:$0xff] }
 0x144   : > { %1014 = vst [vmem:[#allocation2 + $0x768] sm:$0xff] %v502_v50  ;;  %1015 = vst [vmem:[#allocation2 + $0x770] sm:$0xff] %v503_v51  ;;  %v565_v50 = vld [vmem:[%s4315_s17 + $0x960] sm:$0xff]  ;;  %v566_v51 = vld [vmem:[%s4315_s17 + $0x968] sm:$0xff] }
 0x145   : > { %1016 = vst [vmem:[#allocation2 + $0x778] sm:$0xff] %v504_v52  ;;  %1017 = vst [vmem:[#allocation2 + $0x780] sm:$0xff] %v505_v53  ;;  %v567_v52 = vld [vmem:[%s4315_s17 + $0x970] sm:$0xff]  ;;  %v568_v53 = vld [vmem:[%s4315_s17 + $0x978] sm:$0xff] }
 0x146   : > { %1018 = vst [vmem:[#allocation2 + $0x788] sm:$0xff] %v506_v54  ;;  %1019 = vst [vmem:[#allocation2 + $0x790] sm:$0xff] %v507_v55  ;;  %v569_v54 = vld [vmem:[%s4315_s17 + $0x980] sm:$0xff]  ;;  %v570_v55 = vld [vmem:[%s4315_s17 + $0x988] sm:$0xff] }
 0x147   : > { %1020 = vst [vmem:[#allocation2 + $0x798] sm:$0xff] %v508_v56  ;;  %1021 = vst [vmem:[#allocation2 + $0x7a0] sm:$0xff] %v509_v57  ;;  %v571_v56 = vld [vmem:[%s4315_s17 + $0x990] sm:$0xff]  ;;  %v572_v57 = vld [vmem:[%s4315_s17 + $0x998] sm:$0xff] }
 0x148   : > { %1022 = vst [vmem:[#allocation2 + $0x7a8] sm:$0xff] %v510_v58  ;;  %1023 = vst [vmem:[#allocation2 + $0x7b0] sm:$0xff] %v511_v59  ;;  %v573_v58 = vld [vmem:[%s4315_s17 + $0x9a0] sm:$0xff]  ;;  %v574_v59 = vld [vmem:[%s4315_s17 + $0x9a8] sm:$0xff] }
 0x149   : > { %1024 = vst [vmem:[#allocation2 + $0x7b8] sm:$0xff] %v512_v60  ;;  %1025 = vst [vmem:[#allocation2 + $0x7c0] sm:$0xff] %v513_v61  ;;  %v575_v60 = vld [vmem:[%s4315_s17 + $0x9b0] sm:$0xff]  ;;  %v576_v61 = vld [vmem:[%s4315_s17 + $0x9b8] sm:$0xff] }
 0x14a   : > { %1026 = vst [vmem:[#allocation2 + $0x7c8] sm:$0xff] %v514_v62  ;;  %1027 = vst [vmem:[#allocation2 + $0x7d0] sm:$0xff] %v515_v63  ;;  %v577_v62 = vld [vmem:[%s4315_s17 + $0x9c0] sm:$0xff]  ;;  %v578_v63 = vld [vmem:[%s4315_s17 + $0x9c8] sm:$0xff] }
 0x14b   : > { %1028 = vst [vmem:[#allocation2 + $0x7d8] sm:$0xff] %v516_v1  ;;  %1029 = vst [vmem:[#allocation2 + $0x7e0] sm:$0xff] %v517_v2  ;;  %v579_v1 = vld [vmem:[%s4315_s17 + $0x9d0] sm:$0xff]  ;;  %v580_v2 = vld [vmem:[%s4315_s17 + $0x9d8] sm:$0xff] }
 0x14c   : > { %1030 = vst [vmem:[#allocation2 + $0x7e8] sm:$0xff] %v518_v3  ;;  %1031 = vst [vmem:[#allocation2 + $0x7f0] sm:$0xff] %v519_v4  ;;  %v581_v3 = vld [vmem:[%s4315_s17 + $0x9e0] sm:$0xff]  ;;  %v582_v4 = vld [vmem:[%s4315_s17 + $0x9e8] sm:$0xff] }
 0x14d   : > { %1032 = vst [vmem:[#allocation2 + $0x7f8] sm:$0xff] %v520_v5  ;;  %1033 = vst [vmem:[#allocation2 + $0x800] sm:$0xff] %v521_v6  ;;  %v583_v5 = vld [vmem:[%s4315_s17 + $0x9f0] sm:$0xff]  ;;  %v584_v6 = vld [vmem:[%s4315_s17 + $0x9f8] sm:$0xff] }
 0x14e   : > { %1034 = vst [vmem:[#allocation2 + $0x808] sm:$0xff] %v522_v7  ;;  %1035 = vst [vmem:[#allocation2 + $0x810] sm:$0xff] %v523_v8  ;;  %v585_v7 = vld [vmem:[%s4315_s17 + $0xa00] sm:$0xff]  ;;  %v586_v8 = vld [vmem:[%s4315_s17 + $0xa08] sm:$0xff] }
 0x14f   : > { %1036 = vst [vmem:[#allocation2 + $0x818] sm:$0xff] %v524_v9  ;;  %1037 = vst [vmem:[#allocation2 + $0x820] sm:$0xff] %v525_v10  ;;  %v587_v9 = vld [vmem:[%s4315_s17 + $0xa10] sm:$0xff]  ;;  %v588_v10 = vld [vmem:[%s4315_s17 + $0xa18] sm:$0xff] }
 0x150   : > { %1038 = vst [vmem:[#allocation2 + $0x828] sm:$0xff] %v526_v11  ;;  %1039 = vst [vmem:[#allocation2 + $0x830] sm:$0xff] %v527_v12  ;;  %v589_v11 = vld [vmem:[%s4315_s17 + $0xa20] sm:$0xff]  ;;  %v590_v12 = vld [vmem:[%s4315_s17 + $0xa28] sm:$0xff] }
 0x151   : > { %1040 = vst [vmem:[#allocation2 + $0x838] sm:$0xff] %v528_v13  ;;  %1041 = vst [vmem:[#allocation2 + $0x840] sm:$0xff] %v529_v14  ;;  %v591_v13 = vld [vmem:[%s4315_s17 + $0xa30] sm:$0xff]  ;;  %v592_v14 = vld [vmem:[%s4315_s17 + $0xa38] sm:$0xff] }
 0x152   : > { %1042 = vst [vmem:[#allocation2 + $0x848] sm:$0xff] %v530_v15  ;;  %1043 = vst [vmem:[#allocation2 + $0x850] sm:$0xff] %v531_v16  ;;  %v593_v15 = vld [vmem:[%s4315_s17 + $0xa40] sm:$0xff]  ;;  %v594_v16 = vld [vmem:[%s4315_s17 + $0xa48] sm:$0xff] }
 0x153   : > { %1044 = vst [vmem:[#allocation2 + $0x858] sm:$0xff] %v532_v17  ;;  %1045 = vst [vmem:[#allocation2 + $0x860] sm:$0xff] %v533_v18  ;;  %v595_v17 = vld [vmem:[%s4315_s17 + $0xa50] sm:$0xff]  ;;  %v596_v18 = vld [vmem:[%s4315_s17 + $0xa58] sm:$0xff] }
 0x154   : > { %1046 = vst [vmem:[#allocation2 + $0x868] sm:$0xff] %v534_v19  ;;  %1047 = vst [vmem:[#allocation2 + $0x870] sm:$0xff] %v535_v20  ;;  %v597_v19 = vld [vmem:[%s4315_s17 + $0xa60] sm:$0xff]  ;;  %v598_v20 = vld [vmem:[%s4315_s17 + $0xa68] sm:$0xff] }
 0x155   : > { %1048 = vst [vmem:[#allocation2 + $0x878] sm:$0xff] %v536_v21  ;;  %1049 = vst [vmem:[#allocation2 + $0x880] sm:$0xff] %v537_v22  ;;  %v599_v21 = vld [vmem:[%s4315_s17 + $0xa70] sm:$0xff]  ;;  %v600_v22 = vld [vmem:[%s4315_s17 + $0xa78] sm:$0xff] }
 0x156   : > { %1050 = vst [vmem:[#allocation2 + $0x888] sm:$0xff] %v538_v23  ;;  %1051 = vst [vmem:[#allocation2 + $0x890] sm:$0xff] %v539_v24  ;;  %v601_v23 = vld [vmem:[%s4315_s17 + $0xa80] sm:$0xff]  ;;  %v602_v24 = vld [vmem:[%s4315_s17 + $0xa88] sm:$0xff] }
 0x157   : > { %1052 = vst [vmem:[#allocation2 + $0x898] sm:$0xff] %v540_v25  ;;  %1053 = vst [vmem:[#allocation2 + $0x8a0] sm:$0xff] %v541_v26  ;;  %v603_v25 = vld [vmem:[%s4315_s17 + $0xa90] sm:$0xff]  ;;  %v604_v26 = vld [vmem:[%s4315_s17 + $0xa98] sm:$0xff] }
 0x158   : > { %1054 = vst [vmem:[#allocation2 + $0x8a8] sm:$0xff] %v542_v27  ;;  %1055 = vst [vmem:[#allocation2 + $0x8b0] sm:$0xff] %v543_v28  ;;  %v605_v27 = vld [vmem:[%s4315_s17 + $0xaa0] sm:$0xff]  ;;  %v606_v28 = vld [vmem:[%s4315_s17 + $0xaa8] sm:$0xff] }
 0x159   : > { %1056 = vst [vmem:[#allocation2 + $0x8b8] sm:$0xff] %v544_v29  ;;  %1057 = vst [vmem:[#allocation2 + $0x8c0] sm:$0xff] %v545_v30  ;;  %v607_v29 = vld [vmem:[%s4315_s17 + $0xab0] sm:$0xff]  ;;  %v608_v30 = vld [vmem:[%s4315_s17 + $0xab8] sm:$0xff] }
 0x15a   : > { %1058 = vst [vmem:[#allocation2 + $0x8c8] sm:$0xff] %v546_v31  ;;  %1059 = vst [vmem:[#allocation2 + $0x8d0] sm:$0xff] %v547_v32  ;;  %v609_v31 = vld [vmem:[%s4315_s17 + $0xac0] sm:$0xff]  ;;  %v610_v32 = vld [vmem:[%s4315_s17 + $0xac8] sm:$0xff] }
 0x15b   : > { %1060 = vst [vmem:[#allocation2 + $0x8d8] sm:$0xff] %v548_v33  ;;  %1061 = vst [vmem:[#allocation2 + $0x8e0] sm:$0xff] %v549_v34  ;;  %v611_v33 = vld [vmem:[%s4315_s17 + $0xad0] sm:$0xff]  ;;  %v612_v34 = vld [vmem:[%s4315_s17 + $0xad8] sm:$0xff] }
 0x15c   : > { %1062 = vst [vmem:[#allocation2 + $0x8e8] sm:$0xff] %v550_v35  ;;  %1063 = vst [vmem:[#allocation2 + $0x8f0] sm:$0xff] %v551_v36  ;;  %v613_v35 = vld [vmem:[%s4315_s17 + $0xae0] sm:$0xff]  ;;  %v614_v36 = vld [vmem:[%s4315_s17 + $0xae8] sm:$0xff] }
 0x15d   : > { %1064 = vst [vmem:[#allocation2 + $0x8f8] sm:$0xff] %v552_v37  ;;  %1065 = vst [vmem:[#allocation2 + $0x900] sm:$0xff] %v553_v38  ;;  %v615_v37 = vld [vmem:[%s4315_s17 + $0xaf0] sm:$0xff]  ;;  %v616_v38 = vld [vmem:[%s4315_s17 + $0xaf8] sm:$0xff] }
 0x15e   : > { %1066 = vst [vmem:[#allocation2 + $0x908] sm:$0xff] %v554_v39  ;;  %1067 = vst [vmem:[#allocation2 + $0x910] sm:$0xff] %v555_v40  ;;  %v617_v39 = vld [vmem:[%s4315_s17 + $0xb00] sm:$0xff]  ;;  %v618_v40 = vld [vmem:[%s4315_s17 + $0xb08] sm:$0xff] }
 0x15f   : > { %1068 = vst [vmem:[#allocation2 + $0x918] sm:$0xff] %v556_v41  ;;  %1069 = vst [vmem:[#allocation2 + $0x920] sm:$0xff] %v557_v42  ;;  %v619_v41 = vld [vmem:[%s4315_s17 + $0xb10] sm:$0xff]  ;;  %v620_v42 = vld [vmem:[%s4315_s17 + $0xb18] sm:$0xff] }
 0x160   : > { %1070 = vst [vmem:[#allocation2 + $0x928] sm:$0xff] %v558_v43  ;;  %1071 = vst [vmem:[#allocation2 + $0x930] sm:$0xff] %v559_v44  ;;  %v621_v43 = vld [vmem:[%s4315_s17 + $0xb20] sm:$0xff]  ;;  %v622_v44 = vld [vmem:[%s4315_s17 + $0xb28] sm:$0xff] }
 0x161   : > { %1072 = vst [vmem:[#allocation2 + $0x938] sm:$0xff] %v560_v45  ;;  %1073 = vst [vmem:[#allocation2 + $0x940] sm:$0xff] %v561_v46  ;;  %v623_v45 = vld [vmem:[%s4315_s17 + $0xb30] sm:$0xff]  ;;  %v624_v46 = vld [vmem:[%s4315_s17 + $0xb38] sm:$0xff] }
 0x162   : > { %1074 = vst [vmem:[#allocation2 + $0x948] sm:$0xff] %v562_v47  ;;  %1075 = vst [vmem:[#allocation2 + $0x950] sm:$0xff] %v563_v48  ;;  %v625_v47 = vld [vmem:[%s4315_s17 + $0xb40] sm:$0xff]  ;;  %v626_v48 = vld [vmem:[%s4315_s17 + $0xb48] sm:$0xff] }
 0x163   : > { %1076 = vst [vmem:[#allocation2 + $0x958] sm:$0xff] %v564_v49  ;;  %1077 = vst [vmem:[#allocation2 + $0x960] sm:$0xff] %v565_v50  ;;  %v627_v49 = vld [vmem:[%s4315_s17 + $0xb50] sm:$0xff]  ;;  %v628_v50 = vld [vmem:[%s4315_s17 + $0xb58] sm:$0xff] }
 0x164   : > { %1078 = vst [vmem:[#allocation2 + $0x968] sm:$0xff] %v566_v51  ;;  %1079 = vst [vmem:[#allocation2 + $0x970] sm:$0xff] %v567_v52  ;;  %v629_v51 = vld [vmem:[%s4315_s17 + $0xb60] sm:$0xff]  ;;  %v630_v52 = vld [vmem:[%s4315_s17 + $0xb68] sm:$0xff] }
 0x165   : > { %1080 = vst [vmem:[#allocation2 + $0x978] sm:$0xff] %v568_v53  ;;  %1081 = vst [vmem:[#allocation2 + $0x980] sm:$0xff] %v569_v54  ;;  %v631_v53 = vld [vmem:[%s4315_s17 + $0xb70] sm:$0xff]  ;;  %v632_v54 = vld [vmem:[%s4315_s17 + $0xb78] sm:$0xff] }
 0x166   : > { %1082 = vst [vmem:[#allocation2 + $0x988] sm:$0xff] %v570_v55  ;;  %1083 = vst [vmem:[#allocation2 + $0x990] sm:$0xff] %v571_v56  ;;  %v633_v55 = vld [vmem:[%s4315_s17 + $0xb80] sm:$0xff]  ;;  %v634_v56 = vld [vmem:[%s4315_s17 + $0xb88] sm:$0xff] }
 0x167   : > { %1084 = vst [vmem:[#allocation2 + $0x998] sm:$0xff] %v572_v57  ;;  %1085 = vst [vmem:[#allocation2 + $0x9a0] sm:$0xff] %v573_v58  ;;  %v635_v57 = vld [vmem:[%s4315_s17 + $0xb90] sm:$0xff]  ;;  %v636_v58 = vld [vmem:[%s4315_s17 + $0xb98] sm:$0xff] }
 0x168   : > { %1086 = vst [vmem:[#allocation2 + $0x9a8] sm:$0xff] %v574_v59  ;;  %1087 = vst [vmem:[#allocation2 + $0x9b0] sm:$0xff] %v575_v60  ;;  %v637_v59 = vld [vmem:[%s4315_s17 + $0xba0] sm:$0xff]  ;;  %v638_v60 = vld [vmem:[%s4315_s17 + $0xba8] sm:$0xff] }
 0x169   : > { %1088 = vst [vmem:[#allocation2 + $0x9b8] sm:$0xff] %v576_v61  ;;  %1089 = vst [vmem:[#allocation2 + $0x9c0] sm:$0xff] %v577_v62  ;;  %v639_v61 = vld [vmem:[%s4315_s17 + $0xbb0] sm:$0xff]  ;;  %v640_v62 = vld [vmem:[%s4315_s17 + $0xbb8] sm:$0xff] }
 0x16a   : > { %1090 = vst [vmem:[#allocation2 + $0x9c8] sm:$0xff] %v578_v63  ;;  %1091 = vst [vmem:[#allocation2 + $0x9d0] sm:$0xff] %v579_v1  ;;  %v641_v63 = vld [vmem:[%s4315_s17 + $0xbc0] sm:$0xff]  ;;  %v642_v1 = vld [vmem:[%s4315_s17 + $0xbc8] sm:$0xff] }
 0x16b   : > { %1092 = vst [vmem:[#allocation2 + $0x9d8] sm:$0xff] %v580_v2  ;;  %1093 = vst [vmem:[#allocation2 + $0x9e0] sm:$0xff] %v581_v3  ;;  %v643_v2 = vld [vmem:[%s4315_s17 + $0xbd0] sm:$0xff]  ;;  %v644_v3 = vld [vmem:[%s4315_s17 + $0xbd8] sm:$0xff] }
 0x16c   : > { %1094 = vst [vmem:[#allocation2 + $0x9e8] sm:$0xff] %v582_v4  ;;  %1095 = vst [vmem:[#allocation2 + $0x9f0] sm:$0xff] %v583_v5  ;;  %v645_v4 = vld [vmem:[%s4315_s17 + $0xbe0] sm:$0xff]  ;;  %v646_v5 = vld [vmem:[%s4315_s17 + $0xbe8] sm:$0xff] }
 0x16d   : > { %1096 = vst [vmem:[#allocation2 + $0x9f8] sm:$0xff] %v584_v6  ;;  %1097 = vst [vmem:[#allocation2 + $0xa00] sm:$0xff] %v585_v7  ;;  %v647_v6 = vld [vmem:[%s4315_s17 + $0xbf0] sm:$0xff]  ;;  %v648_v7 = vld [vmem:[%s4315_s17 + $0xbf8] sm:$0xff] }
 0x16e   : > { %1098 = vst [vmem:[#allocation2 + $0xa08] sm:$0xff] %v586_v8  ;;  %1099 = vst [vmem:[#allocation2 + $0xa10] sm:$0xff] %v587_v9  ;;  %v649_v8 = vld [vmem:[%s4315_s17 + $0xc00] sm:$0xff]  ;;  %v650_v9 = vld [vmem:[%s4315_s17 + $0xc08] sm:$0xff] }
 0x16f   : > { %1100 = vst [vmem:[#allocation2 + $0xa18] sm:$0xff] %v588_v10  ;;  %1101 = vst [vmem:[#allocation2 + $0xa20] sm:$0xff] %v589_v11  ;;  %v651_v10 = vld [vmem:[%s4315_s17 + $0xc10] sm:$0xff]  ;;  %v652_v11 = vld [vmem:[%s4315_s17 + $0xc18] sm:$0xff] }
 0x170   : > { %1102 = vst [vmem:[#allocation2 + $0xa28] sm:$0xff] %v590_v12  ;;  %1103 = vst [vmem:[#allocation2 + $0xa30] sm:$0xff] %v591_v13  ;;  %v653_v12 = vld [vmem:[%s4315_s17 + $0xc20] sm:$0xff]  ;;  %v654_v13 = vld [vmem:[%s4315_s17 + $0xc28] sm:$0xff] }
 0x171   : > { %1104 = vst [vmem:[#allocation2 + $0xa38] sm:$0xff] %v592_v14  ;;  %1105 = vst [vmem:[#allocation2 + $0xa40] sm:$0xff] %v593_v15  ;;  %v655_v14 = vld [vmem:[%s4315_s17 + $0xc30] sm:$0xff]  ;;  %v656_v15 = vld [vmem:[%s4315_s17 + $0xc38] sm:$0xff] }
 0x172   : > { %1106 = vst [vmem:[#allocation2 + $0xa48] sm:$0xff] %v594_v16  ;;  %1107 = vst [vmem:[#allocation2 + $0xa50] sm:$0xff] %v595_v17  ;;  %v657_v16 = vld [vmem:[%s4315_s17 + $0xc40] sm:$0xff]  ;;  %v658_v17 = vld [vmem:[%s4315_s17 + $0xc48] sm:$0xff] }
 0x173   : > { %1108 = vst [vmem:[#allocation2 + $0xa58] sm:$0xff] %v596_v18  ;;  %1109 = vst [vmem:[#allocation2 + $0xa60] sm:$0xff] %v597_v19  ;;  %v659_v18 = vld [vmem:[%s4315_s17 + $0xc50] sm:$0xff]  ;;  %v660_v19 = vld [vmem:[%s4315_s17 + $0xc58] sm:$0xff] }
 0x174   : > { %1110 = vst [vmem:[#allocation2 + $0xa68] sm:$0xff] %v598_v20  ;;  %1111 = vst [vmem:[#allocation2 + $0xa70] sm:$0xff] %v599_v21  ;;  %v661_v20 = vld [vmem:[%s4315_s17 + $0xc60] sm:$0xff]  ;;  %v662_v21 = vld [vmem:[%s4315_s17 + $0xc68] sm:$0xff] }
 0x175   : > { %1112 = vst [vmem:[#allocation2 + $0xa78] sm:$0xff] %v600_v22  ;;  %1113 = vst [vmem:[#allocation2 + $0xa80] sm:$0xff] %v601_v23  ;;  %v663_v22 = vld [vmem:[%s4315_s17 + $0xc70] sm:$0xff]  ;;  %v664_v23 = vld [vmem:[%s4315_s17 + $0xc78] sm:$0xff] }
 0x176   : > { %1114 = vst [vmem:[#allocation2 + $0xa88] sm:$0xff] %v602_v24  ;;  %1115 = vst [vmem:[#allocation2 + $0xa90] sm:$0xff] %v603_v25  ;;  %v665_v24 = vld [vmem:[%s4315_s17 + $0xc80] sm:$0xff]  ;;  %v666_v25 = vld [vmem:[%s4315_s17 + $0xc88] sm:$0xff] }
 0x177   : > { %1116 = vst [vmem:[#allocation2 + $0xa98] sm:$0xff] %v604_v26  ;;  %1117 = vst [vmem:[#allocation2 + $0xaa0] sm:$0xff] %v605_v27  ;;  %v667_v26 = vld [vmem:[%s4315_s17 + $0xc90] sm:$0xff]  ;;  %v668_v27 = vld [vmem:[%s4315_s17 + $0xc98] sm:$0xff] }
 0x178   : > { %1118 = vst [vmem:[#allocation2 + $0xaa8] sm:$0xff] %v606_v28  ;;  %1119 = vst [vmem:[#allocation2 + $0xab0] sm:$0xff] %v607_v29  ;;  %v669_v28 = vld [vmem:[%s4315_s17 + $0xca0] sm:$0xff]  ;;  %v670_v29 = vld [vmem:[%s4315_s17 + $0xca8] sm:$0xff] }
 0x179   : > { %1120 = vst [vmem:[#allocation2 + $0xab8] sm:$0xff] %v608_v30  ;;  %1121 = vst [vmem:[#allocation2 + $0xac0] sm:$0xff] %v609_v31  ;;  %v671_v30 = vld [vmem:[%s4315_s17 + $0xcb0] sm:$0xff]  ;;  %v672_v31 = vld [vmem:[%s4315_s17 + $0xcb8] sm:$0xff] }
 0x17a   : > { %1122 = vst [vmem:[#allocation2 + $0xac8] sm:$0xff] %v610_v32  ;;  %1123 = vst [vmem:[#allocation2 + $0xad0] sm:$0xff] %v611_v33  ;;  %v673_v32 = vld [vmem:[%s4315_s17 + $0xcc0] sm:$0xff]  ;;  %v674_v33 = vld [vmem:[%s4315_s17 + $0xcc8] sm:$0xff] }
 0x17b   : > { %1124 = vst [vmem:[#allocation2 + $0xad8] sm:$0xff] %v612_v34  ;;  %1125 = vst [vmem:[#allocation2 + $0xae0] sm:$0xff] %v613_v35  ;;  %v675_v34 = vld [vmem:[%s4315_s17 + $0xcd0] sm:$0xff]  ;;  %v676_v35 = vld [vmem:[%s4315_s17 + $0xcd8] sm:$0xff] }
 0x17c   : > { %1126 = vst [vmem:[#allocation2 + $0xae8] sm:$0xff] %v614_v36  ;;  %1127 = vst [vmem:[#allocation2 + $0xaf0] sm:$0xff] %v615_v37  ;;  %v677_v36 = vld [vmem:[%s4315_s17 + $0xce0] sm:$0xff]  ;;  %v678_v37 = vld [vmem:[%s4315_s17 + $0xce8] sm:$0xff] }
 0x17d   : > { %1128 = vst [vmem:[#allocation2 + $0xaf8] sm:$0xff] %v616_v38  ;;  %1129 = vst [vmem:[#allocation2 + $0xb00] sm:$0xff] %v617_v39  ;;  %v679_v38 = vld [vmem:[%s4315_s17 + $0xcf0] sm:$0xff]  ;;  %v680_v39 = vld [vmem:[%s4315_s17 + $0xcf8] sm:$0xff] }
 0x17e   : > { %1130 = vst [vmem:[#allocation2 + $0xb08] sm:$0xff] %v618_v40  ;;  %1131 = vst [vmem:[#allocation2 + $0xb10] sm:$0xff] %v619_v41  ;;  %v681_v40 = vld [vmem:[%s4315_s17 + $0xd00] sm:$0xff]  ;;  %v682_v41 = vld [vmem:[%s4315_s17 + $0xd08] sm:$0xff] }
 0x17f   : > { %1132 = vst [vmem:[#allocation2 + $0xb18] sm:$0xff] %v620_v42  ;;  %1133 = vst [vmem:[#allocation2 + $0xb20] sm:$0xff] %v621_v43  ;;  %v683_v42 = vld [vmem:[%s4315_s17 + $0xd10] sm:$0xff]  ;;  %v684_v43 = vld [vmem:[%s4315_s17 + $0xd18] sm:$0xff] }
 0x180   : > { %1134 = vst [vmem:[#allocation2 + $0xb28] sm:$0xff] %v622_v44  ;;  %1135 = vst [vmem:[#allocation2 + $0xb30] sm:$0xff] %v623_v45  ;;  %v685_v44 = vld [vmem:[%s4315_s17 + $0xd20] sm:$0xff]  ;;  %v686_v45 = vld [vmem:[%s4315_s17 + $0xd28] sm:$0xff] }
 0x181   : > { %1136 = vst [vmem:[#allocation2 + $0xb38] sm:$0xff] %v624_v46  ;;  %1137 = vst [vmem:[#allocation2 + $0xb40] sm:$0xff] %v625_v47  ;;  %v687_v46 = vld [vmem:[%s4315_s17 + $0xd30] sm:$0xff]  ;;  %v688_v47 = vld [vmem:[%s4315_s17 + $0xd38] sm:$0xff] }
 0x182   : > { %1138 = vst [vmem:[#allocation2 + $0xb48] sm:$0xff] %v626_v48  ;;  %1139 = vst [vmem:[#allocation2 + $0xb50] sm:$0xff] %v627_v49  ;;  %v689_v48 = vld [vmem:[%s4315_s17 + $0xd40] sm:$0xff]  ;;  %v690_v49 = vld [vmem:[%s4315_s17 + $0xd48] sm:$0xff] }
 0x183   : > { %1140 = vst [vmem:[#allocation2 + $0xb58] sm:$0xff] %v628_v50  ;;  %1141 = vst [vmem:[#allocation2 + $0xb60] sm:$0xff] %v629_v51  ;;  %v691_v50 = vld [vmem:[%s4315_s17 + $0xd50] sm:$0xff]  ;;  %v692_v51 = vld [vmem:[%s4315_s17 + $0xd58] sm:$0xff] }
 0x184   : > { %1142 = vst [vmem:[#allocation2 + $0xb68] sm:$0xff] %v630_v52  ;;  %1143 = vst [vmem:[#allocation2 + $0xb70] sm:$0xff] %v631_v53  ;;  %v693_v52 = vld [vmem:[%s4315_s17 + $0xd60] sm:$0xff]  ;;  %v694_v53 = vld [vmem:[%s4315_s17 + $0xd68] sm:$0xff] }
 0x185   : > { %1144 = vst [vmem:[#allocation2 + $0xb78] sm:$0xff] %v632_v54  ;;  %1145 = vst [vmem:[#allocation2 + $0xb80] sm:$0xff] %v633_v55  ;;  %v695_v54 = vld [vmem:[%s4315_s17 + $0xd70] sm:$0xff]  ;;  %v696_v55 = vld [vmem:[%s4315_s17 + $0xd78] sm:$0xff] }
 0x186   : > { %1146 = vst [vmem:[#allocation2 + $0xb88] sm:$0xff] %v634_v56  ;;  %1147 = vst [vmem:[#allocation2 + $0xb90] sm:$0xff] %v635_v57  ;;  %v697_v56 = vld [vmem:[%s4315_s17 + $0xd80] sm:$0xff]  ;;  %v698_v57 = vld [vmem:[%s4315_s17 + $0xd88] sm:$0xff] }
 0x187   : > { %1148 = vst [vmem:[#allocation2 + $0xb98] sm:$0xff] %v636_v58  ;;  %1149 = vst [vmem:[#allocation2 + $0xba0] sm:$0xff] %v637_v59  ;;  %v699_v58 = vld [vmem:[%s4315_s17 + $0xd90] sm:$0xff]  ;;  %v700_v59 = vld [vmem:[%s4315_s17 + $0xd98] sm:$0xff] }
 0x188   : > { %1150 = vst [vmem:[#allocation2 + $0xba8] sm:$0xff] %v638_v60  ;;  %1151 = vst [vmem:[#allocation2 + $0xbb0] sm:$0xff] %v639_v61  ;;  %v701_v60 = vld [vmem:[%s4315_s17 + $0xda0] sm:$0xff]  ;;  %v702_v61 = vld [vmem:[%s4315_s17 + $0xda8] sm:$0xff] }
 0x189   : > { %1152 = vst [vmem:[#allocation2 + $0xbb8] sm:$0xff] %v640_v62  ;;  %1153 = vst [vmem:[#allocation2 + $0xbc0] sm:$0xff] %v641_v63  ;;  %v703_v62 = vld [vmem:[%s4315_s17 + $0xdb0] sm:$0xff]  ;;  %v704_v63 = vld [vmem:[%s4315_s17 + $0xdb8] sm:$0xff] }
 0x18a   : > { %1154 = vst [vmem:[#allocation2 + $0xbc8] sm:$0xff] %v642_v1  ;;  %1155 = vst [vmem:[#allocation2 + $0xbd0] sm:$0xff] %v643_v2  ;;  %v705_v1 = vld [vmem:[%s4315_s17 + $0xdc0] sm:$0xff]  ;;  %v706_v2 = vld [vmem:[%s4315_s17 + $0xdc8] sm:$0xff] }
 0x18b   : > { %1156 = vst [vmem:[#allocation2 + $0xbd8] sm:$0xff] %v644_v3  ;;  %1157 = vst [vmem:[#allocation2 + $0xbe0] sm:$0xff] %v645_v4  ;;  %v707_v3 = vld [vmem:[%s4315_s17 + $0xdd0] sm:$0xff]  ;;  %v708_v4 = vld [vmem:[%s4315_s17 + $0xdd8] sm:$0xff] }
 0x18c   : > { %1158 = vst [vmem:[#allocation2 + $0xbe8] sm:$0xff] %v646_v5  ;;  %1159 = vst [vmem:[#allocation2 + $0xbf0] sm:$0xff] %v647_v6  ;;  %v709_v5 = vld [vmem:[%s4315_s17 + $0xde0] sm:$0xff]  ;;  %v710_v6 = vld [vmem:[%s4315_s17 + $0xde8] sm:$0xff] }
 0x18d   : > { %1160 = vst [vmem:[#allocation2 + $0xbf8] sm:$0xff] %v648_v7  ;;  %1161 = vst [vmem:[#allocation2 + $0xc00] sm:$0xff] %v649_v8  ;;  %v711_v7 = vld [vmem:[%s4315_s17 + $0xdf0] sm:$0xff]  ;;  %v712_v8 = vld [vmem:[%s4315_s17 + $0xdf8] sm:$0xff] }
 0x18e   : > { %1162 = vst [vmem:[#allocation2 + $0xc08] sm:$0xff] %v650_v9  ;;  %1163 = vst [vmem:[#allocation2 + $0xc10] sm:$0xff] %v651_v10  ;;  %v713_v9 = vld [vmem:[%s4315_s17 + $0xe00] sm:$0xff]  ;;  %v714_v10 = vld [vmem:[%s4315_s17 + $0xe08] sm:$0xff] }
 0x18f   : > { %1164 = vst [vmem:[#allocation2 + $0xc18] sm:$0xff] %v652_v11  ;;  %1165 = vst [vmem:[#allocation2 + $0xc20] sm:$0xff] %v653_v12  ;;  %v715_v11 = vld [vmem:[%s4315_s17 + $0xe10] sm:$0xff]  ;;  %v716_v12 = vld [vmem:[%s4315_s17 + $0xe18] sm:$0xff] }
 0x190   : > { %1166 = vst [vmem:[#allocation2 + $0xc28] sm:$0xff] %v654_v13  ;;  %1167 = vst [vmem:[#allocation2 + $0xc30] sm:$0xff] %v655_v14  ;;  %v717_v13 = vld [vmem:[%s4315_s17 + $0xe20] sm:$0xff]  ;;  %v718_v14 = vld [vmem:[%s4315_s17 + $0xe28] sm:$0xff] }
 0x191   : > { %1168 = vst [vmem:[#allocation2 + $0xc38] sm:$0xff] %v656_v15  ;;  %1169 = vst [vmem:[#allocation2 + $0xc40] sm:$0xff] %v657_v16  ;;  %v719_v15 = vld [vmem:[%s4315_s17 + $0xe30] sm:$0xff]  ;;  %v720_v16 = vld [vmem:[%s4315_s17 + $0xe38] sm:$0xff] }
 0x192   : > { %1170 = vst [vmem:[#allocation2 + $0xc48] sm:$0xff] %v658_v17  ;;  %1171 = vst [vmem:[#allocation2 + $0xc50] sm:$0xff] %v659_v18  ;;  %v721_v17 = vld [vmem:[%s4315_s17 + $0xe40] sm:$0xff]  ;;  %v722_v18 = vld [vmem:[%s4315_s17 + $0xe48] sm:$0xff] }
 0x193   : > { %1172 = vst [vmem:[#allocation2 + $0xc58] sm:$0xff] %v660_v19  ;;  %1173 = vst [vmem:[#allocation2 + $0xc60] sm:$0xff] %v661_v20  ;;  %v723_v19 = vld [vmem:[%s4315_s17 + $0xe50] sm:$0xff]  ;;  %v724_v20 = vld [vmem:[%s4315_s17 + $0xe58] sm:$0xff] }
 0x194   : > { %1174 = vst [vmem:[#allocation2 + $0xc68] sm:$0xff] %v662_v21  ;;  %1175 = vst [vmem:[#allocation2 + $0xc70] sm:$0xff] %v663_v22  ;;  %v725_v21 = vld [vmem:[%s4315_s17 + $0xe60] sm:$0xff]  ;;  %v726_v22 = vld [vmem:[%s4315_s17 + $0xe68] sm:$0xff] }
 0x195   : > { %1176 = vst [vmem:[#allocation2 + $0xc78] sm:$0xff] %v664_v23  ;;  %1177 = vst [vmem:[#allocation2 + $0xc80] sm:$0xff] %v665_v24  ;;  %v727_v23 = vld [vmem:[%s4315_s17 + $0xe70] sm:$0xff]  ;;  %v728_v24 = vld [vmem:[%s4315_s17 + $0xe78] sm:$0xff] }
 0x196   : > { %1178 = vst [vmem:[#allocation2 + $0xc88] sm:$0xff] %v666_v25  ;;  %1179 = vst [vmem:[#allocation2 + $0xc90] sm:$0xff] %v667_v26  ;;  %v729_v25 = vld [vmem:[%s4315_s17 + $0xe80] sm:$0xff]  ;;  %v730_v26 = vld [vmem:[%s4315_s17 + $0xe88] sm:$0xff] }
 0x197   : > { %1180 = vst [vmem:[#allocation2 + $0xc98] sm:$0xff] %v668_v27  ;;  %1181 = vst [vmem:[#allocation2 + $0xca0] sm:$0xff] %v669_v28  ;;  %v731_v27 = vld [vmem:[%s4315_s17 + $0xe90] sm:$0xff]  ;;  %v732_v28 = vld [vmem:[%s4315_s17 + $0xe98] sm:$0xff] }
 0x198   : > { %1182 = vst [vmem:[#allocation2 + $0xca8] sm:$0xff] %v670_v29  ;;  %1183 = vst [vmem:[#allocation2 + $0xcb0] sm:$0xff] %v671_v30  ;;  %v733_v29 = vld [vmem:[%s4315_s17 + $0xea0] sm:$0xff]  ;;  %v734_v30 = vld [vmem:[%s4315_s17 + $0xea8] sm:$0xff] }
 0x199   : > { %1184 = vst [vmem:[#allocation2 + $0xcb8] sm:$0xff] %v672_v31  ;;  %1185 = vst [vmem:[#allocation2 + $0xcc0] sm:$0xff] %v673_v32  ;;  %v735_v31 = vld [vmem:[%s4315_s17 + $0xeb0] sm:$0xff]  ;;  %v736_v32 = vld [vmem:[%s4315_s17 + $0xeb8] sm:$0xff] }
 0x19a   : > { %1186 = vst [vmem:[#allocation2 + $0xcc8] sm:$0xff] %v674_v33  ;;  %1187 = vst [vmem:[#allocation2 + $0xcd0] sm:$0xff] %v675_v34  ;;  %v737_v33 = vld [vmem:[%s4315_s17 + $0xec0] sm:$0xff]  ;;  %v738_v34 = vld [vmem:[%s4315_s17 + $0xec8] sm:$0xff] }
 0x19b   : > { %1188 = vst [vmem:[#allocation2 + $0xcd8] sm:$0xff] %v676_v35  ;;  %1189 = vst [vmem:[#allocation2 + $0xce0] sm:$0xff] %v677_v36  ;;  %v739_v35 = vld [vmem:[%s4315_s17 + $0xed0] sm:$0xff]  ;;  %v740_v36 = vld [vmem:[%s4315_s17 + $0xed8] sm:$0xff] }
 0x19c   : > { %1190 = vst [vmem:[#allocation2 + $0xce8] sm:$0xff] %v678_v37  ;;  %1191 = vst [vmem:[#allocation2 + $0xcf0] sm:$0xff] %v679_v38  ;;  %v741_v37 = vld [vmem:[%s4315_s17 + $0xee0] sm:$0xff]  ;;  %v742_v38 = vld [vmem:[%s4315_s17 + $0xee8] sm:$0xff] }
 0x19d   : > { %1192 = vst [vmem:[#allocation2 + $0xcf8] sm:$0xff] %v680_v39  ;;  %1193 = vst [vmem:[#allocation2 + $0xd00] sm:$0xff] %v681_v40  ;;  %v743_v39 = vld [vmem:[%s4315_s17 + $0xef0] sm:$0xff]  ;;  %v744_v40 = vld [vmem:[%s4315_s17 + $0xef8] sm:$0xff] }
 0x19e   : > { %1194 = vst [vmem:[#allocation2 + $0xd08] sm:$0xff] %v682_v41  ;;  %1195 = vst [vmem:[#allocation2 + $0xd10] sm:$0xff] %v683_v42  ;;  %v745_v41 = vld [vmem:[%s4315_s17 + $0xf00] sm:$0xff]  ;;  %v746_v42 = vld [vmem:[%s4315_s17 + $0xf08] sm:$0xff] }
 0x19f   : > { %1196 = vst [vmem:[#allocation2 + $0xd18] sm:$0xff] %v684_v43  ;;  %1197 = vst [vmem:[#allocation2 + $0xd20] sm:$0xff] %v685_v44  ;;  %v747_v43 = vld [vmem:[%s4315_s17 + $0xf10] sm:$0xff]  ;;  %v748_v44 = vld [vmem:[%s4315_s17 + $0xf18] sm:$0xff] }
 0x1a0   : > { %1198 = vst [vmem:[#allocation2 + $0xd28] sm:$0xff] %v686_v45  ;;  %1199 = vst [vmem:[#allocation2 + $0xd30] sm:$0xff] %v687_v46  ;;  %v749_v45 = vld [vmem:[%s4315_s17 + $0xf20] sm:$0xff]  ;;  %v750_v46 = vld [vmem:[%s4315_s17 + $0xf28] sm:$0xff] }
 0x1a1   : > { %1200 = vst [vmem:[#allocation2 + $0xd38] sm:$0xff] %v688_v47  ;;  %1201 = vst [vmem:[#allocation2 + $0xd40] sm:$0xff] %v689_v48  ;;  %v751_v47 = vld [vmem:[%s4315_s17 + $0xf30] sm:$0xff]  ;;  %v752_v48 = vld [vmem:[%s4315_s17 + $0xf38] sm:$0xff] }
 0x1a2   : > { %1202 = vst [vmem:[#allocation2 + $0xd48] sm:$0xff] %v690_v49  ;;  %1203 = vst [vmem:[#allocation2 + $0xd50] sm:$0xff] %v691_v50  ;;  %v753_v49 = vld [vmem:[%s4315_s17 + $0xf40] sm:$0xff]  ;;  %v754_v50 = vld [vmem:[%s4315_s17 + $0xf48] sm:$0xff] }
 0x1a3   : > { %1204 = vst [vmem:[#allocation2 + $0xd58] sm:$0xff] %v692_v51  ;;  %1205 = vst [vmem:[#allocation2 + $0xd60] sm:$0xff] %v693_v52  ;;  %v755_v51 = vld [vmem:[%s4315_s17 + $0xf50] sm:$0xff]  ;;  %v756_v52 = vld [vmem:[%s4315_s17 + $0xf58] sm:$0xff] }
 0x1a4   : > { %1206 = vst [vmem:[#allocation2 + $0xd68] sm:$0xff] %v694_v53  ;;  %1207 = vst [vmem:[#allocation2 + $0xd70] sm:$0xff] %v695_v54  ;;  %v757_v53 = vld [vmem:[%s4315_s17 + $0xf60] sm:$0xff]  ;;  %v758_v54 = vld [vmem:[%s4315_s17 + $0xf68] sm:$0xff] }
 0x1a5   : > { %1208 = vst [vmem:[#allocation2 + $0xd78] sm:$0xff] %v696_v55  ;;  %1209 = vst [vmem:[#allocation2 + $0xd80] sm:$0xff] %v697_v56  ;;  %v759_v55 = vld [vmem:[%s4315_s17 + $0xf70] sm:$0xff]  ;;  %v760_v56 = vld [vmem:[%s4315_s17 + $0xf78] sm:$0xff] }
 0x1a6   : > { %1210 = vst [vmem:[#allocation2 + $0xd88] sm:$0xff] %v698_v57  ;;  %1211 = vst [vmem:[#allocation2 + $0xd90] sm:$0xff] %v699_v58  ;;  %v761_v57 = vld [vmem:[%s4315_s17 + $0xf80] sm:$0xff]  ;;  %v762_v58 = vld [vmem:[%s4315_s17 + $0xf88] sm:$0xff] }
 0x1a7   : > { %1212 = vst [vmem:[#allocation2 + $0xd98] sm:$0xff] %v700_v59  ;;  %1213 = vst [vmem:[#allocation2 + $0xda0] sm:$0xff] %v701_v60  ;;  %v763_v59 = vld [vmem:[%s4315_s17 + $0xf90] sm:$0xff]  ;;  %v764_v60 = vld [vmem:[%s4315_s17 + $0xf98] sm:$0xff] }
 0x1a8   : > { %1214 = vst [vmem:[#allocation2 + $0xda8] sm:$0xff] %v702_v61  ;;  %1215 = vst [vmem:[#allocation2 + $0xdb0] sm:$0xff] %v703_v62  ;;  %v765_v61 = vld [vmem:[%s4315_s17 + $0xfa0] sm:$0xff]  ;;  %v766_v62 = vld [vmem:[%s4315_s17 + $0xfa8] sm:$0xff] }
 0x1a9   : > { %1216 = vst [vmem:[#allocation2 + $0xdb8] sm:$0xff] %v704_v63  ;;  %1217 = vst [vmem:[#allocation2 + $0xdc0] sm:$0xff] %v705_v1  ;;  %v767_v63 = vld [vmem:[%s4315_s17 + $0xfb0] sm:$0xff]  ;;  %v768_v1 = vld [vmem:[%s4315_s17 + $0xfb8] sm:$0xff] }
 0x1aa   : > { %1218 = vst [vmem:[#allocation2 + $0xdc8] sm:$0xff] %v706_v2  ;;  %1219 = vst [vmem:[#allocation2 + $0xdd0] sm:$0xff] %v707_v3  ;;  %v769_v2 = vld [vmem:[%s4315_s17 + $0xfc0] sm:$0xff]  ;;  %v770_v3 = vld [vmem:[%s4315_s17 + $0xfc8] sm:$0xff] }
 0x1ab   : > { %1220 = vst [vmem:[#allocation2 + $0xdd8] sm:$0xff] %v708_v4  ;;  %1221 = vst [vmem:[#allocation2 + $0xde0] sm:$0xff] %v709_v5  ;;  %v771_v4 = vld [vmem:[%s4315_s17 + $0xfd0] sm:$0xff]  ;;  %v772_v5 = vld [vmem:[%s4315_s17 + $0xfd8] sm:$0xff] }
 0x1ac   : > { %1222 = vst [vmem:[#allocation2 + $0xde8] sm:$0xff] %v710_v6  ;;  %1223 = vst [vmem:[#allocation2 + $0xdf0] sm:$0xff] %v711_v7  ;;  %v773_v6 = vld [vmem:[%s4315_s17 + $0xfe0] sm:$0xff]  ;;  %v774_v7 = vld [vmem:[%s4315_s17 + $0xfe8] sm:$0xff] }
 0x1ad   : > { %1224 = vst [vmem:[#allocation2 + $0xdf8] sm:$0xff] %v712_v8  ;;  %1225 = vst [vmem:[#allocation2 + $0xe00] sm:$0xff] %v713_v9  ;;  %v775_v8 = vld [vmem:[%s4315_s17 + $0xff0] sm:$0xff]  ;;  %v776_v9 = vld [vmem:[%s4315_s17 + $0xff8] sm:$0xff] }
 0x1ae   : > { %1226 = vst [vmem:[#allocation2 + $0xe08] sm:$0xff] %v714_v10  ;;  %1227 = vst [vmem:[#allocation2 + $0xe10] sm:$0xff] %v715_v11 }
 0x1af   : > { %1228 = vst [vmem:[#allocation2 + $0xe18] sm:$0xff] %v716_v12  ;;  %1229 = vst [vmem:[#allocation2 + $0xe20] sm:$0xff] %v717_v13 }
 0x1b0   : > { %1230 = vst [vmem:[#allocation2 + $0xe28] sm:$0xff] %v718_v14  ;;  %1231 = vst [vmem:[#allocation2 + $0xe30] sm:$0xff] %v719_v15 }
 0x1b1   : > { %1232 = vst [vmem:[#allocation2 + $0xe38] sm:$0xff] %v720_v16  ;;  %1233 = vst [vmem:[#allocation2 + $0xe40] sm:$0xff] %v721_v17 }
 0x1b2   : > { %1234 = vst [vmem:[#allocation2 + $0xe48] sm:$0xff] %v722_v18  ;;  %1235 = vst [vmem:[#allocation2 + $0xe50] sm:$0xff] %v723_v19 }
 0x1b3   : > { %1236 = vst [vmem:[#allocation2 + $0xe58] sm:$0xff] %v724_v20  ;;  %1237 = vst [vmem:[#allocation2 + $0xe60] sm:$0xff] %v725_v21 }
 0x1b4   : > { %1238 = vst [vmem:[#allocation2 + $0xe68] sm:$0xff] %v726_v22  ;;  %1239 = vst [vmem:[#allocation2 + $0xe70] sm:$0xff] %v727_v23 }
 0x1b5   : > { %1240 = vst [vmem:[#allocation2 + $0xe78] sm:$0xff] %v728_v24  ;;  %1241 = vst [vmem:[#allocation2 + $0xe80] sm:$0xff] %v729_v25 }
 0x1b6   : > { %1242 = vst [vmem:[#allocation2 + $0xe88] sm:$0xff] %v730_v26  ;;  %1243 = vst [vmem:[#allocation2 + $0xe90] sm:$0xff] %v731_v27 }
 0x1b7   : > { %1244 = vst [vmem:[#allocation2 + $0xe98] sm:$0xff] %v732_v28  ;;  %1245 = vst [vmem:[#allocation2 + $0xea0] sm:$0xff] %v733_v29 }
 0x1b8   : > { %1246 = vst [vmem:[#allocation2 + $0xea8] sm:$0xff] %v734_v30  ;;  %1247 = vst [vmem:[#allocation2 + $0xeb0] sm:$0xff] %v735_v31 }
 0x1b9   : > { %1248 = vst [vmem:[#allocation2 + $0xeb8] sm:$0xff] %v736_v32  ;;  %1249 = vst [vmem:[#allocation2 + $0xec0] sm:$0xff] %v737_v33 }
 0x1ba   : > { %1250 = vst [vmem:[#allocation2 + $0xec8] sm:$0xff] %v738_v34  ;;  %1251 = vst [vmem:[#allocation2 + $0xed0] sm:$0xff] %v739_v35 }
 0x1bb   : > { %1252 = vst [vmem:[#allocation2 + $0xed8] sm:$0xff] %v740_v36  ;;  %1253 = vst [vmem:[#allocation2 + $0xee0] sm:$0xff] %v741_v37 }
 0x1bc   : > { %1254 = vst [vmem:[#allocation2 + $0xee8] sm:$0xff] %v742_v38  ;;  %1255 = vst [vmem:[#allocation2 + $0xef0] sm:$0xff] %v743_v39 }
 0x1bd   : > { %1256 = vst [vmem:[#allocation2 + $0xef8] sm:$0xff] %v744_v40  ;;  %1257 = vst [vmem:[#allocation2 + $0xf00] sm:$0xff] %v745_v41 }
 0x1be   : > { %1258 = vst [vmem:[#allocation2 + $0xf08] sm:$0xff] %v746_v42  ;;  %1259 = vst [vmem:[#allocation2 + $0xf10] sm:$0xff] %v747_v43 }
 0x1bf   : > { %1260 = vst [vmem:[#allocation2 + $0xf18] sm:$0xff] %v748_v44  ;;  %1261 = vst [vmem:[#allocation2 + $0xf20] sm:$0xff] %v749_v45 }
 0x1c0   : > { %1262 = vst [vmem:[#allocation2 + $0xf28] sm:$0xff] %v750_v46  ;;  %1263 = vst [vmem:[#allocation2 + $0xf30] sm:$0xff] %v751_v47 }
 0x1c1   : > { %1264 = vst [vmem:[#allocation2 + $0xf38] sm:$0xff] %v752_v48  ;;  %1265 = vst [vmem:[#allocation2 + $0xf40] sm:$0xff] %v753_v49 }
 0x1c2   : > { %1266 = vst [vmem:[#allocation2 + $0xf48] sm:$0xff] %v754_v50  ;;  %1267 = vst [vmem:[#allocation2 + $0xf50] sm:$0xff] %v755_v51 }
 0x1c3   : > { %1268 = vst [vmem:[#allocation2 + $0xf58] sm:$0xff] %v756_v52  ;;  %1269 = vst [vmem:[#allocation2 + $0xf60] sm:$0xff] %v757_v53 }
 0x1c4   : > { %1270 = vst [vmem:[#allocation2 + $0xf68] sm:$0xff] %v758_v54  ;;  %1271 = vst [vmem:[#allocation2 + $0xf70] sm:$0xff] %v759_v55 }
 0x1c5   : > { %1272 = vst [vmem:[#allocation2 + $0xf78] sm:$0xff] %v760_v56  ;;  %1273 = vst [vmem:[#allocation2 + $0xf80] sm:$0xff] %v761_v57 }
 0x1c6   : > { %1274 = vst [vmem:[#allocation2 + $0xf88] sm:$0xff] %v762_v58  ;;  %1275 = vst [vmem:[#allocation2 + $0xf90] sm:$0xff] %v763_v59 }
 0x1c7   : > { %1276 = vst [vmem:[#allocation2 + $0xf98] sm:$0xff] %v764_v60  ;;  %1277 = vst [vmem:[#allocation2 + $0xfa0] sm:$0xff] %v765_v61 }
 0x1c8   : > { %1278 = vst [vmem:[#allocation2 + $0xfa8] sm:$0xff] %v766_v62  ;;  %1279 = vst [vmem:[#allocation2 + $0xfb0] sm:$0xff] %v767_v63 }
 0x1c9   : > { %1280 = vst [vmem:[#allocation2 + $0xfb8] sm:$0xff] %v768_v1  ;;  %1281 = vst [vmem:[#allocation2 + $0xfc0] sm:$0xff] %v769_v2 }
 0x1ca   : > { %1282 = vst [vmem:[#allocation2 + $0xfc8] sm:$0xff] %v770_v3  ;;  %1283 = vst [vmem:[#allocation2 + $0xfd0] sm:$0xff] %v771_v4 }
 0x1cb   : > { %1284 = vst [vmem:[#allocation2 + $0xfd8] sm:$0xff] %v772_v5  ;;  %1285 = vst [vmem:[#allocation2 + $0xfe0] sm:$0xff] %v773_v6 }
 0x1cc   : > { %1286 = vst [vmem:[#allocation2 + $0xfe8] sm:$0xff] %v774_v7  ;;  %1287 = vst [vmem:[#allocation2 + $0xff0] sm:$0xff] %v775_v8 }
 0x1cd   : > { %1288 = vst [vmem:[#allocation2 + $0xff8] sm:$0xff] %v776_v9 }
 0x1ce LB: >> { %s5682_s0 = sld [smem:[#allocation24_spill]]  ;;  %5683 = sst [smem:[#allocation31_spill]] %s4050_s7  ;;  %s4050_s7 = sphi %s4984_s7, %s1359_s7  }
 0x1cf   : >> { %s1360_s19 = smul.u32 1280, %s4050_s7  ;;  %s4994_s22 = smov 0  }
 0x1d4   : >> { %s5684_s8 = smul.u32 10240, %s5682_s0 }
 0x1d6   : >> { %s4992_s21 = sadd.s32 %s1360_s19, %s5684_s8 }
 0x1d7 LB: >>> { %5685 = sst [smem:[#allocation32_spill]] %s4054_s22  ;;  %s5000_s15 = sshll.u32 %s4054_s22, 3  ;;  %v1857_v22 = vlaneseq  ;;  %vm1944_vm0 = vcmask 1040384   ;;  %vm1947_vm1 = vcmask 1041408   ;;  %vm1950_vm2 = vcmask 1042432   ;;  %s4054_s22 = sphi %s4994_s22, %s1367_s22  }
 0x1d8   : >>> { %5686 = sst [smem:[#allocation33_spill]] %s5000_s15  ;;  %s3410_s16 = smul.u32 40, %s4054_s22  ;;  %vm1953_vm3 = vcmask 1043456   ;;  %vm1956_vm4 = vcmask 1044480   ;;  %vm1959_vm5 = vcmask 1045504   ;;  %vm1962_vm6 = vcmask 1046528  }
 0x1d9   : >>> { %s1429_s11 = sadd.s32 1, %s5000_s15  ;;  %v1858_v34 = vshrl.u32 %v1857_v22, 7 }
 0x1da   : >>> { %s1370_s18 = sadd.s32 %s3410_s16, %s4992_s21  ;;  %s1430_s20 = smul.u32 5, %s1429_s11 }
 0x1db   : >>> { %s1371_s12 = sld [smem:[#allocation5 + %s1370_s18]]  ;;  %s1381_s13 = sadd.s32 1, %s1370_s18  ;;  %v5158_v46 = vsub.s32 0, %v1858_v34  ;;  %v5161_v50 = vsub.s32 1, %v1858_v34 }
 0x1dc   : >>> { %s1382_s14 = sld [smem:[#allocation5 + %s1381_s13]]  ;;  %s1393_s17 = sadd.s32 2, %s1370_s18 }
 0x1dd   : >>> { %s1394_s10 = sld [smem:[#allocation5 + %s1393_s17]]  ;;  %s1405_s19 = sadd.s32 3, %s1370_s18 }
 0x1de   : >>> { %s1417_s8 = sadd.s32 4, %s1370_s18  ;;  %s1406_s1 = sld [smem:[#allocation5 + %s1405_s19]] }
 0x1df   : >>> { %s1418_s2 = sld [smem:[#allocation5 + %s1417_s8]]  ;;  %s5006_s3 = sadd.s32 %s1430_s20, %s4992_s21 }
 0x1e0   : >>> { %s1432_s6 = sld [smem:[#allocation5 + %s5006_s3]]  ;;  %s1442_s8 = sadd.s32 1, %s5006_s3 }
 0x1e1   : >>> { %s1372_s4 = sshra.s32 %s1371_s12, 3  ;;  %s1375_s25 = sand.u32 7, %s1371_s12 }
 0x1e2   : >>> { %s3503_s30 = sshll.u32 %s1372_s4, 4  ;;  %s1383_s29 = sshra.s32 %s1382_s14, 3 }
 0x1e3   : >>> { %s1386_s16 = sand.u32 7, %s1382_s14  ;;  %s3504_s23 = sshll.u32 %s1383_s29, 4 }
 0x1e4   : >>> { %s5010_s9 = sadd.s32 %s3503_s30, %s1375_s25  ;;  %s1395_s13 = sshra.s32 %s1394_s10, 3 }
 0x1e5   : >>> { %s5012_s17 = sadd.s32 %s3504_s23, %s1386_s16  ;;  %s1398_s18 = sand.u32 7, %s1394_s10 }
 0x1e6   : >>> { %s3505_s19 = sshll.u32 %s1395_s13, 4  ;;  %s1407_s20 = sshra.s32 %s1406_s1, 3 }
 0x1e7   : >>> { %s5015_s28 = sadd.s32 %s3505_s19, %s1398_s18  ;;  %s1410_s12 = sand.u32 7, %s1406_s1 }
 0x1e8   : >>> { %s1419_s4 = sshra.s32 %s1418_s2, 3  ;;  %s3506_s14 = sshll.u32 %s1407_s20, 4 }
 0x1e9   : >>> { %s1422_s11 = sand.u32 7, %s1418_s2  ;;  %s3507_s29 = sshll.u32 %s1419_s4, 4 }
 0x1ea   : >>> { %s1433_s5 = sshra.s32 %s1432_s6, 3  ;;  %s1436_s30 = sand.u32 7, %s1432_s6 }
 0x1eb   : >>> { %s5017_s25 = sadd.s32 %s3506_s14, %s1410_s12  ;;  %s3508_s23 = sshll.u32 %s1433_s5, 4 }
 0x1ec   : >>> { %5687 = sst [smem:[#allocation34_spill]] %s5017_s25  ;;  %s5019_s10 = sadd.s32 %s3507_s29, %s1422_s11 }
 0x1ed   : >>> { %5688 = sst [smem:[#allocation35_spill]] %s5019_s10  ;;  %s5021_s13 = sadd.s32 %s3508_s23, %s1436_s30 }
 0x1ee   : >>> { %s1443_s16 = sld [smem:[#allocation5 + %s1442_s8]]  ;;  %s1454_s18 = sadd.s32 2, %s5006_s3 }
 0x1ef   : >>> { %s1455_s1 = sld [smem:[#allocation5 + %s1454_s18]]  ;;  %s1466_s19 = sadd.s32 3, %s5006_s3 }
 0x1f0   : >>> { %s1467_s20 = sld [smem:[#allocation5 + %s1466_s19]]  ;;  %s1478_s2 = sadd.s32 4, %s5006_s3 }
 0x1f1   : >>> { %s1479_s4 = sld [smem:[#allocation5 + %s1478_s2]]  ;;  %s5689_s12 = sadd.s32 2, %s5000_s15 }
 0x1f2   : >>> { %s1491_s14 = smul.u32 5, %s5689_s12 }
 0x1f4   : >>> { %s1444_s26 = sshra.s32 %s1443_s16, 3  ;;  %s1447_s24 = sand.u32 7, %s1443_s16 }
 0x1f5   : >>> { %s3509_s6 = sshll.u32 %s1444_s26, 4  ;;  %s1456_s0 = sshra.s32 %s1455_s1, 3 }
 0x1f6   : >>> { %s5029_s11 = sadd.s32 %s3509_s6, %s1447_s24  ;;  %s1459_s8 = sand.u32 7, %s1455_s1 }
 0x1f7   : >>> { %s3510_s29 = sshll.u32 %s1456_s0, 4  ;;  %s1468_s18 = sshra.s32 %s1467_s20, 3 }
 0x1f8   : >>> { %s5032_s23 = sadd.s32 %s3510_s29, %s1459_s8  ;;  %s1492_s27 = sadd.s32 %s1491_s14, %s4992_s21 }
 0x1f9   : >>> { %5690 = sst [smem:[#allocation36_spill]] %s5032_s23  ;;  %s1471_s7 = sand.u32 7, %s1467_s20 }
 0x1fa   : >>> { %s1480_s19 = sshra.s32 %s1479_s4, 3  ;;  %s3511_s3 = sshll.u32 %s1468_s18, 4 }
 0x1fb   : >>> { %s1483_s2 = sand.u32 7, %s1479_s4  ;;  %s1493_s22 = sld [smem:[#allocation5 + %s1492_s27]] }
 0x1fc   : >>> { %s3512_s16 = sshll.u32 %s1480_s19, 4  ;;  %s1503_s26 = sadd.s32 1, %s1492_s27 }
 0x1fd   : >>> { %s5035_s10 = sadd.s32 %s3511_s3, %s1471_s7  ;;  %s1504_s12 = sld [smem:[#allocation5 + %s1503_s26]] }
 0x1fe   : >>> { %5691 = sst [smem:[#allocation37_spill]] %s5035_s10  ;;  %s1515_s24 = sadd.s32 2, %s1492_s27 }
 0x1ff   : >>> { %s1527_s6 = sadd.s32 3, %s1492_s27  ;;  %s5037_s1 = sadd.s32 %s3512_s16, %s1483_s2 }
 0x200   : >>> { %5692 = sst [smem:[#allocation38_spill]] %s5037_s1  ;;  %s1539_s29 = sadd.s32 4, %s1492_s27 }
 0x201   : >>> { %s1516_s0 = sld [smem:[#allocation5 + %s1515_s24]]  ;;  %s1494_s30 = sshra.s32 %s1493_s22, 3 }
 0x202   : >>> { %s1528_s8 = sld [smem:[#allocation5 + %s1527_s6]]  ;;  %s1497_s14 = sand.u32 7, %s1493_s22 }
 0x203   : >>> { %s3513_s20 = sshll.u32 %s1494_s30, 4  ;;  %s1540_s5 = sld [smem:[#allocation5 + %s1539_s29]] }
 0x204   : >>> { %s1505_s18 = sshra.s32 %s1504_s12, 3  ;;  %s5039_s4 = sadd.s32 %s3513_s20, %s1497_s14 }
 0x205   : >>> { %5693 = sst [smem:[#allocation39_spill]] %s5039_s4  ;;  %s1508_s19 = sand.u32 7, %s1504_s12 }
 0x206   : >>> { %s3514_s7 = sshll.u32 %s1505_s18, 4  ;;  %s5694_s26 = sadd.s32 3, %s5000_s15 }
 0x207   : >>> { %s1517_s3 = sshra.s32 %s1516_s0, 3  ;;  %s1552_s10 = smul.u32 5, %s5694_s26 }
 0x208   : >>> { %s5043_s25 = sadd.s32 %s3514_s7, %s1508_s19  ;;  %s1520_s2 = sand.u32 7, %s1516_s0 }
 0x209   : >>> { %5695 = sst [smem:[#allocation40_spill]] %s5043_s25  ;;  %s1529_s16 = sshra.s32 %s1528_s8, 3 }
 0x20a   : >>> { %s3515_s24 = sshll.u32 %s1517_s3, 4  ;;  %s1532_s6 = sand.u32 7, %s1528_s8 }
 0x20b   : >>> { %s3516_s27 = sshll.u32 %s1529_s16, 4  ;;  %s1541_s1 = sshra.s32 %s1540_s5, 3 }
 0x20c   : >>> { %s1544_s22 = sand.u32 7, %s1540_s5  ;;  %s5045_s30 = sadd.s32 %s3515_s24, %s1520_s2 }
 0x20d   : >>> { %5696 = sst [smem:[#allocation41_spill]] %s5045_s30  ;;  %s3517_s29 = sshll.u32 %s1541_s1, 4 }
 0x20e   : >>> { %s5047_s14 = sadd.s32 %s3516_s27, %s1532_s6  ;;  %s1553_s12 = sadd.s32 %s1552_s10, %s4992_s21 }
 0x20f   : >>> { %5697 = sst [smem:[#allocation42_spill]] %s5047_s14  ;;  %s5050_s20 = sadd.s32 %s3517_s29, %s1544_s22 }
 0x210   : >>> { %5698 = sst [smem:[#allocation43_spill]] %s5050_s20  ;;  %s1564_s19 = sadd.s32 1, %s1553_s12 }
 0x211   : >>> { %s1554_s18 = sld [smem:[#allocation5 + %s1553_s12]]  ;;  %s1576_s7 = sadd.s32 2, %s1553_s12 }
 0x212   : >>> { %s1565_s0 = sld [smem:[#allocation5 + %s1564_s19]]  ;;  %s1588_s8 = sadd.s32 3, %s1553_s12 }
 0x213   : >>> { %s1577_s3 = sld [smem:[#allocation5 + %s1576_s7]]  ;;  %s1600_s26 = sadd.s32 4, %s1553_s12 }
 0x214   : >>> { %s1589_s16 = sld [smem:[#allocation5 + %s1588_s8]]  ;;  %s5699_s2 = sadd.s32 4, %s5000_s15 }
 0x215   : >>> { %s5052_s23 = sld [smem:[#allocation5 + %s1600_s26]]  ;;  %s1613_s24 = smul.u32 5, %s5699_s2 }
 0x217   : >>> { %s1555_s5 = sshra.s32 %s1554_s18, 3  ;;  %s1558_s6 = sand.u32 7, %s1554_s18 }
 0x218   : >>> { %s1566_s10 = sshra.s32 %s1565_s0, 3  ;;  %s3518_s27 = sshll.u32 %s1555_s5, 4 }
 0x219   : >>> { %s1569_s22 = sand.u32 7, %s1565_s0  ;;  %s3519_s29 = sshll.u32 %s1566_s10, 4 }
 0x21a   : >>> { %s1578_s20 = sshra.s32 %s1577_s3, 3  ;;  %s1581_s19 = sand.u32 7, %s1577_s3 }
 0x21b   : >>> { %s1614_s14 = sadd.s32 %s1613_s24, %s4992_s21  ;;  %s5058_s7 = sadd.s32 %s3518_s27, %s1558_s6 }
 0x21c   : >>> { %5700 = sst [smem:[#allocation44_spill]] %s5058_s7  ;;  %s3520_s12 = sshll.u32 %s1578_s20, 4 }
 0x21d   : >>> { %s5060_s8 = sadd.s32 %s3519_s29, %s1569_s22  ;;  %s1590_s26 = sshra.s32 %s1589_s16, 3 }
 0x21e   : >>> { %5701 = sst [smem:[#allocation45_spill]] %s5060_s8  ;;  %s5062_s30 = sadd.s32 %s3520_s12, %s1581_s19 }
 0x21f   : >>> { %5702 = sst [smem:[#allocation46_spill]] %s5062_s30  ;;  %s1593_s2 = sand.u32 7, %s1589_s16 }
 0x220   : >>> { %s3521_s1 = sshll.u32 %s1590_s26, 4  ;;  %s1602_s25 = sshra.s32 %s5052_s23, 3 }
 0x221   : >>> { %s5065_s18 = sadd.s32 %s3521_s1, %s1593_s2  ;;  %s1605_s5 = sand.u32 7, %s5052_s23 }
 0x222   : >>> { %5703 = sst [smem:[#allocation47_spill]] %s5065_s18  ;;  %s3522_s10 = sshll.u32 %s1602_s25, 4 }
 0x223   : >>> { %s1615_s0 = sld [smem:[#allocation5 + %s1614_s14]]  ;;  %s1625_s4 = sadd.s32 1, %s1614_s14 }
 0x224   : >>> { %s1626_s3 = sld [smem:[#allocation5 + %s1625_s4]]  ;;  %s1637_s24 = sadd.s32 2, %s1614_s14 }
 0x225   : >>> { %s1638_s6 = sld [smem:[#allocation5 + %s1637_s24]]  ;;  %s1649_s20 = sadd.s32 3, %s1614_s14 }
 0x226   : >>> { %s5068_s27 = sadd.s32 %s3522_s10, %s1605_s5  ;;  %s1661_s22 = sadd.s32 4, %s1614_s14 }
 0x227   : >>> { %5704 = sst [smem:[#allocation48_spill]] %s5068_s27  ;;  %s5705_s1 = sadd.s32 5, %s5000_s15 }
 0x228   : >>> { %s1650_s29 = sld [smem:[#allocation5 + %s1649_s20]]  ;;  %s1674_s2 = smul.u32 5, %s5705_s1 }
 0x229   : >>> { %s1662_s19 = sld [smem:[#allocation5 + %s1661_s22]]  ;;  %s1616_s16 = sshra.s32 %s1615_s0, 3 }
 0x22a   : >>> { %s1619_s12 = sand.u32 7, %s1615_s0  ;;  %s3523_s26 = sshll.u32 %s1616_s16, 4 }
 0x22b   : >>> { %s1627_s18 = sshra.s32 %s1626_s3, 3  ;;  %s5072_s23 = sadd.s32 %s3523_s26, %s1619_s12 }
 0x22c   : >>> { %s1630_s25 = sand.u32 7, %s1626_s3  ;;  %s3524_s30 = sshll.u32 %s1627_s18, 4 }
 0x22d   : >>> { %s1639_s4 = sshra.s32 %s1638_s6, 3  ;;  %s1675_s8 = sadd.s32 %s1674_s2, %s4992_s21 }
 0x22e   : >>> { %s5075_s7 = sadd.s32 %s3524_s30, %s1630_s25  ;;  %s1642_s24 = sand.u32 7, %s1638_s6 }
 0x22f   : >>> { %5706 = sst [smem:[#allocation49_spill]] %s5075_s7  ;;  %s1651_s5 = sshra.s32 %s1650_s29, 3 }
 0x230   : >>> { %s3525_s10 = sshll.u32 %s1639_s4, 4  ;;  %s1654_s14 = sand.u32 7, %s1650_s29 }
 0x231   : >>> { %s3526_s20 = sshll.u32 %s1651_s5, 4  ;;  %s1663_s22 = sshra.s32 %s1662_s19, 3 }
 0x232   : >>> { %s1666_s0 = sand.u32 7, %s1662_s19  ;;  %s5077_s16 = sadd.s32 %s3525_s10, %s1642_s24 }
 0x233   : >>> { %s3527_s1 = sshll.u32 %s1663_s22, 4  ;;  %s5079_s27 = sadd.s32 %s3526_s20, %s1654_s14 }
 0x234   : >>> { %5707 = sst [smem:[#allocation50_spill]] %s5079_s27  ;;  %s5081_s3 = sadd.s32 %s3527_s1, %s1666_s0 }
 0x235   : >>> { %s1676_s12 = sld [smem:[#allocation5 + %s1675_s8]]  ;;  %s1686_s18 = sadd.s32 1, %s1675_s8 }
 0x236   : >>> { %5708 = sst [smem:[#allocation51_spill]] %s5081_s3  ;;  %s1698_s30 = sadd.s32 2, %s1675_s8 }
 0x237   : >>> { %s1687_s26 = sld [smem:[#allocation5 + %s1686_s18]]  ;;  %s1710_s6 = sadd.s32 3, %s1675_s8 }
 0x238   : >>> { %s1699_s2 = sld [smem:[#allocation5 + %s1698_s30]]  ;;  %s1722_s25 = sadd.s32 4, %s1675_s8 }
 0x239   : >>> { %s1711_s4 = sld [smem:[#allocation5 + %s1710_s6]]  ;;  %s1734_s7 = sadd.s32 6, %s5000_s15 }
 0x23a   : >>> { %s5083_s5 = sld [smem:[#allocation5 + %s1722_s25]]  ;;  %s1735_s1 = smul.u32 5, %s1734_s7 }
 0x23b   : >>> { %s1677_s29 = sshra.s32 %s1676_s12, 3  ;;  %s1680_s19 = sand.u32 7, %s1676_s12 }
 0x23c   : >>> { %s3528_s10 = sshll.u32 %s1677_s29, 4  ;;  %s5097_s27 = sadd.s32 %s1735_s1, %s4992_s21 }
 0x23d   : >>> { %s1688_s24 = sshra.s32 %s1687_s26, 3  ;;  %s1691_s14 = sand.u32 7, %s1687_s26 }
 0x23e   : >>> { %s3529_s20 = sshll.u32 %s1688_s24, 4  ;;  %s1700_s22 = sshra.s32 %s1699_s2, 3 }
 0x23f   : >>> { %s1703_s0 = sand.u32 7, %s1699_s2  ;;  %s5086_s18 = sadd.s32 %s3528_s10, %s1680_s19 }
 0x240   : >>> { %s3530_s8 = sshll.u32 %s1700_s22, 4  ;;  %s5088_s30 = sadd.s32 %s3529_s20, %s1691_s14 }
 0x241   : >>> { %s1712_s6 = sshra.s32 %s1711_s4, 3  ;;  %s5090_s25 = sadd.s32 %s3530_s8, %s1703_s0 }
 0x242   : >>> { %s1715_s12 = sand.u32 7, %s1711_s4  ;;  %s3531_s3 = sshll.u32 %s1712_s6, 4 }
 0x243   : >>> { %s1724_s29 = sshra.s32 %s5083_s5, 3  ;;  %s5093_s26 = sadd.s32 %s3531_s3, %s1715_s12 }
 0x244   : >>> { %5709 = sst [smem:[#allocation52_spill]] %s5093_s26  ;;  %s1727_s24 = sand.u32 7, %s5083_s5 }
 0x245   : >>> { %s1379_s7 = scalar_lea.vmem [#allocation2], %s5010_s9  ;;  %s3532_s2 = sshll.u32 %s1724_s29, 4 }
 0x246   : >>> { %v1380_v10 = vld [vmem:[%s1379_s7] ss:$8 sm:$0x3]  ;;  %s5101_s19 = sld [smem:[#allocation5 + %s5097_s27]]  ;;  %s1390_s4 = scalar_lea.vmem [#allocation2], %s5012_s17 }
 0x247   : >>> { %s5710_s10 = sld [smem:[#allocation39_spill]]  ;;  %v1391_v11 = vld [vmem:[%s1390_s4] ss:$8 sm:$0x3]  ;;  %s1747_s14 = sadd.s32 1, %s5097_s27 }
 0x248   : >>> { %s1759_s3 = sadd.s32 2, %s5097_s27  ;;  %s1440_s5 = scalar_lea.vmem [#allocation2], %s5021_s13  ;;  %v1392_v15 = vadd.f32 %v1391_v11, %v1380_v10 }
 0x249   : >>> { %v1441_v12 = vld [vmem:[%s1440_s5] ss:$8 sm:$0x3]  ;;  %s5711_s20 = sld [smem:[#allocation40_spill]]  ;;  %s1451_s9 = scalar_lea.vmem [#allocation2], %s5029_s11 }
 0x24a   : >>> { %s5107_s22 = sld [smem:[#allocation5 + %s1747_s14]]  ;;  %v1452_v13 = vld [vmem:[%s1451_s9] ss:$8 sm:$0x3]  ;;  %s1771_s8 = sadd.s32 3, %s5097_s27 }
 0x24b   : >>> { %s5109_s0 = sld [smem:[#allocation5 + %s1759_s3]]  ;;  %s1402_s6 = scalar_lea.vmem [#allocation2], %s5015_s28  ;;  %v1453_v17 = vadd.f32 %v1452_v13, %v1441_v12 }
 0x24c   : >>> { %s5712_s1 = sld [smem:[#allocation36_spill]]  ;;  %v1403_v14 = vld [vmem:[%s1402_s6] ss:$8 sm:$0x3]  ;;  %s5114_s17 = sadd.s32 %s3532_s2, %s1727_s24 }
 0x24d   : >>> { %5713 = sst [smem:[#allocation39_spill]] %s5114_s17  ;;  %s5714_s12 = sld [smem:[#allocation34_spill]]  ;;  %v1404_v23 = vadd.f32 %v1403_v14, %v1392_v15 }
 0x24e   : >>> { %s1783_s29 = sadd.s32 4, %s5097_s27  ;;  %s5715_s13 = sld [smem:[#allocation44_spill]] }
 0x24f   : >>> { %s1501_s7 = scalar_lea.vmem [#allocation2], %s5710_s10  ;;  %s5118_s4 = sld [smem:[#allocation5 + %s1771_s8]] }
 0x250   : >>> { %v1502_v16 = vld [vmem:[%s1501_s7] ss:$8 sm:$0x3]  ;;  %s1795_s14 = sadd.s32 7, %s5000_s15  ;;  %s1512_s11 = scalar_lea.vmem [#allocation2], %s5711_s20 }
 0x251   : >>> { %s5716_s3 = sld [smem:[#allocation37_spill]]  ;;  %v1513_v18 = vld [vmem:[%s1512_s11] ss:$8 sm:$0x3]  ;;  %s1738_s5 = sshra.s32 %s5101_s19, 3 }
 0x252   : >>> { %s1741_s9 = sand.u32 7, %s5101_s19  ;;  %s5717_s28 = sld [smem:[#allocation45_spill]]  ;;  %v1514_v25 = vadd.f32 %v1513_v18, %v1502_v16 }
 0x253   : >>> { %s1463_s6 = scalar_lea.vmem [#allocation2], %s5712_s1  ;;  %s3533_s24 = sshll.u32 %s1738_s5, 4 }
 0x254   : >>> { %v1464_v19 = vld [vmem:[%s1463_s6] ss:$8 sm:$0x3]  ;;  %s5125_s27 = sld [smem:[#allocation5 + %s1783_s29]]  ;;  %s1414_s2 = scalar_lea.vmem [#allocation2], %s5714_s12 }
 0x255   : >>> { %s5718_s10 = sld [smem:[#allocation41_spill]]  ;;  %v1415_v20 = vld [vmem:[%s1414_s2] ss:$8 sm:$0x3]  ;;  %s1562_s7 = scalar_lea.vmem [#allocation2], %s5715_s13  ;;  %v1465_v27 = vadd.f32 %v1464_v19, %v1453_v17 }
 0x256   : >>> { %v1563_v21 = vld [vmem:[%s1562_s7] ss:$8 sm:$0x3]  ;;  %s1749_s8 = sshra.s32 %s5107_s22, 3  ;;  %s5130_s20 = smul.u32 5, %s1795_s14  ;;  %v1416_v35 = vadd.f32 %v1415_v20, %v1404_v23 }
 0x257   : >>> { %s1475_s19 = scalar_lea.vmem [#allocation2], %s5716_s3  ;;  %s5719_s1 = sld [smem:[#allocation35_spill]] }
 0x258   : >>> { %v1476_v24 = vld [vmem:[%s1475_s19] ss:$8 sm:$0x3]  ;;  %s5720_s11 = sld [smem:[#allocation42_spill]]  ;;  %s1573_s29 = scalar_lea.vmem [#allocation2], %s5717_s28 }
 0x259   : >>> { %v1574_v26 = vld [vmem:[%s1573_s29] ss:$8 sm:$0x3]  ;;  %s5134_s12 = sadd.s32 %s3533_s24, %s1741_s9  ;;  %s5721_s5 = sld [smem:[#allocation49_spill]]  ;;  %v1477_v39 = vadd.f32 %v1476_v24, %v1465_v27 }
 0x25a   : >>> { %s1752_s13 = sand.u32 7, %s5107_s22  ;;  %s3534_s2 = sshll.u32 %s1749_s8, 4  ;;  %v1575_v32 = vadd.f32 %v1574_v26, %v1563_v21 }
 0x25b   : >>> { %s1524_s6 = scalar_lea.vmem [#allocation2], %s5718_s10  ;;  %s5722_s14 = sld [smem:[#allocation38_spill]] }
 0x25c   : >>> { %v1525_v28 = vld [vmem:[%s1524_s6] ss:$8 sm:$0x3]  ;;  %s1761_s7 = sshra.s32 %s5109_s0, 3  ;;  %s1623_s17 = scalar_lea.vmem [#allocation2], %s5072_s23 }
 0x25d   : >>> { %v1624_v29 = vld [vmem:[%s1623_s17] ss:$8 sm:$0x3]  ;;  %s5723_s26 = sld [smem:[#allocation46_spill]]  ;;  %s5140_s3 = sadd.s32 %s3534_s2, %s1752_s13  ;;  %v1526_v37 = vadd.f32 %v1525_v28, %v1514_v25 }
 0x25e   : >>> { %s1764_s19 = sand.u32 7, %s5109_s0  ;;  %s1426_s15 = scalar_lea.vmem [#allocation2], %s5719_s1 }
 0x25f   : >>> { %v1427_v30 = vld [vmem:[%s1426_s15] ss:$8 sm:$0x3]  ;;  %s1536_s9 = scalar_lea.vmem [#allocation2], %s5720_s11  ;;  %s1634_s22 = scalar_lea.vmem [#allocation2], %s5721_s5 }
 0x260   : >>> { %v1537_v31 = vld [vmem:[%s1536_s9] ss:$8 sm:$0x3]  ;;  %s3535_s28 = sshll.u32 %s1761_s7, 4  ;;  %s5724_s17 = sld [smem:[#allocation43_spill]]  ;;  %v1428_v47 = vsub.f32 %v1416_v35, %v1427_v30 }
 0x261   : >>> { %v1635_v33 = vld [vmem:[%s1634_s22] ss:$8 sm:$0x3]  ;;  %s1487_s23 = scalar_lea.vmem [#allocation2], %s5722_s14  ;;  %s1773_s15 = sshra.s32 %s5118_s4, 3  ;;  %v1538_v48 = vadd.f32 %v1537_v31, %v1526_v37 }
 0x262   : >>> { %v1488_v36 = vld [vmem:[%s1487_s23] ss:$8 sm:$0x3]  ;;  %s1684_s24 = scalar_lea.vmem [#allocation2], %s5086_s18  ;;  %s5150_s10 = sadd.s32 %s3535_s28, %s1764_s19  ;;  %v1636_v41 = vadd.f32 %v1635_v33, %v1624_v29  ;;  %v1860_v62 = vrot.slane %v1428_v47, %v5158_v46  ;;  %v1864_v2 = vrot.slane %v1428_v47, %v5161_v50 }
 0x263   : >>> { %s1585_s0 = scalar_lea.vmem [#allocation2], %s5723_s26  ;;  %v1685_v40 = vld [vmem:[%s1684_s24] ss:$8 sm:$0x3]  ;;  %s5725_s8 = sld [smem:[#allocation47_spill]]  ;;  %v1489_v51 = vsub.f32 %v1477_v39, %v1488_v36 }
 0x264   : >>> { %v1586_v38 = vld [vmem:[%s1585_s0] ss:$8 sm:$0x3]  ;;  %s1776_s1 = sand.u32 7, %s5118_s4  ;;  %s1695_s11 = scalar_lea.vmem [#allocation2], %s5088_s30 }
 0x265   : >>> { %v1696_v42 = vld [vmem:[%s1695_s11] ss:$8 sm:$0x3]  ;;  %s3536_s29 = sshll.u32 %s1773_s15, 4  ;;  %s1785_s5 = sshra.s32 %s5125_s27, 3  ;;  %v1587_v44 = vadd.f32 %v1586_v38, %v1575_v32  ;;  %v1871_v3 = vrot.slane %v1489_v51, %v5158_v46  ;;  %v1875_v4 = vrot.slane %v1489_v51, %v5161_v50 }
 0x266   : >>> { %s1548_s13 = scalar_lea.vmem [#allocation2], %s5724_s17  ;;  %s1646_s26 = scalar_lea.vmem [#allocation2], %s5077_s16  ;;  %v1697_v52 = vadd.f32 %v1696_v42, %v1685_v40 }
 0x267   : >>> { %v1549_v43 = vld [vmem:[%s1548_s13] ss:$8 sm:$0x3]  ;;  %s1788_s18 = sand.u32 7, %s5125_s27  ;;  %s3537_s30 = sshll.u32 %s1785_s5, 4  ;;  %v1945_v14 = vsel %vm1944_vm0, %v1860_v62, %v1871_v3  ;;  %v1946_v15 = vsel %vm1944_vm0, %v1864_v2, %v1875_v4 }
 0x268   : >>> { %v1647_v45 = vld [vmem:[%s1646_s26] ss:$8 sm:$0x3]  ;;  %s5726_s6 = sld [smem:[#allocation50_spill]]  ;;  %s1745_s2 = scalar_lea.vmem [#allocation2], %s5134_s12  ;;  %v1550_v59 = vsub.f32 %v1538_v48, %v1549_v43 }
 0x269   : >>> { %s1597_s4 = scalar_lea.vmem [#allocation2], %s5725_s8  ;;  %v1746_v53 = vld [vmem:[%s1745_s2] ss:$8 sm:$0x3]  ;;  %s5727_s16 = sld [smem:[#allocation48_spill]]  ;;  %v1648_v55 = vadd.f32 %v1647_v45, %v1636_v41 }
 0x26a   : >>> { %v1598_v49 = vld [vmem:[%s1597_s4] ss:$8 sm:$0x3]  ;;  %s1756_s14 = scalar_lea.vmem [#allocation2], %s5140_s3  ;;  %s5165_s7 = sadd.s32 %s3536_s29, %s1776_s1  ;;  %v1882_v10 = vrot.slane %v1550_v59, %v5158_v46  ;;  %v1886_v11 = vrot.slane %v1550_v59, %v5161_v50 }
 0x26b   : >>> { %v1757_v54 = vld [vmem:[%s1756_s14] ss:$8 sm:$0x3]  ;;  %s5169_s27 = sadd.s32 %s5130_s20, %s4992_s21  ;;  %s1707_s19 = scalar_lea.vmem [#allocation2], %s5090_s25  ;;  %v1599_v57 = vadd.f32 %v1598_v49, %v1587_v44 }
 0x26c   : >>> { %v1708_v56 = vld [vmem:[%s1707_s19] ss:$8 sm:$0x3]  ;;  %s5172_s9 = sadd.s32 %s3537_s30, %s1788_s18  ;;  %s5175_s22 = sld [smem:[#allocation5 + %s5169_s27]]  ;;  %v1758_v61 = vadd.f32 %v1757_v54, %v1746_v53  ;;  %v1948_v22 = vsel %vm1947_vm1, %v1945_v14, %v1882_v10  ;;  %v1949_v23 = vsel %vm1947_vm1, %v1946_v15, %v1886_v11 }
 0x26d   : >>> { %s1808_s3 = sadd.s32 1, %s5169_s27  ;;  %s5728_s28 = sld [smem:[#allocation33_spill]]  ;;  %v1709_v63 = vadd.f32 %v1708_v56, %v1697_v52 }
 0x26e   : >>> { %s1658_s12 = scalar_lea.vmem [#allocation2], %s5726_s6  ;;  %s1820_s23 = sadd.s32 2, %s5169_s27 }
 0x26f   : >>> { %v1659_v58 = vld [vmem:[%s1658_s12] ss:$8 sm:$0x3]  ;;  %s5729_s20 = sld [smem:[#allocation52_spill]]  ;;  %s1609_s17 = scalar_lea.vmem [#allocation2], %s5727_s16 }
 0x270   : >>> { %v1610_v60 = vld [vmem:[%s1609_s17] ss:$8 sm:$0x3]  ;;  %s5181_s25 = sld [smem:[#allocation5 + %s1808_s3]]  ;;  %s1768_s24 = scalar_lea.vmem [#allocation2], %s5150_s10  ;;  %v1660_v5 = vadd.f32 %v1659_v58, %v1648_v55 }
 0x271   : >>> { %s5183_s0 = sld [smem:[#allocation5 + %s1820_s23]]  ;;  %v1769_v1 = vld [vmem:[%s1768_s24] ss:$8 sm:$0x3]  ;;  %s1832_s8 = sadd.s32 3, %s5169_s27  ;;  %v1611_v7 = vsub.f32 %v1599_v57, %v1610_v60 }
 0x272   : >>> { %s5730_s15 = sld [smem:[#allocation51_spill]]  ;;  %s1844_s29 = sadd.s32 4, %s5169_s27  ;;  %v1770_v9 = vadd.f32 %v1769_v1, %v1758_v61 }
 0x273   : >>> { %s1965_s1 = sshra.s32 %s5728_s28, 3  ;;  %s5731_s10 = sld [smem:[#allocation39_spill]]  ;;  %v1893_v18 = vrot.slane %v1611_v7, %v5158_v46  ;;  %v1897_v19 = vrot.slane %v1611_v7, %v5161_v50 }
 0x274   : >>> { %s5195_s13 = sld [smem:[#allocation5 + %s1832_s8]]  ;;  %s1799_s26 = sshra.s32 %s5175_s22, 3 }
 0x275   : >>> { %s1719_s11 = scalar_lea.vmem [#allocation2], %s5729_s20  ;;  %s1802_s18 = sand.u32 7, %s5175_s22  ;;  %v1951_v29 = vsel %vm1950_vm2, %v1948_v22, %v1893_v18  ;;  %v1952_v30 = vsel %vm1950_vm2, %v1949_v23, %v1897_v19 }
 0x276   : >>> { %v1720_v6 = vld [vmem:[%s1719_s11] ss:$8 sm:$0x3]  ;;  %s1780_s4 = scalar_lea.vmem [#allocation2], %s5165_s7  ;;  %s3538_s30 = sshll.u32 %s1799_s26, 4 }
 0x277   : >>> { %v1721_v12 = vadd.f32 %v1720_v6, %v1709_v63  ;;  %v1781_v13 = vld [vmem:[%s1780_s4] ss:$8 sm:$0x3]  ;;  %s5202_s6 = sld [smem:[#allocation5 + %s1844_s29]]  ;;  %s1805_s16 = sadd.s32 %s3538_s30, %s1802_s18 }
 0x278   : >>> { %s1670_s5 = scalar_lea.vmem [#allocation2], %s5730_s15  ;;  %s1810_s14 = sshra.s32 %s5181_s25, 3  ;;  %v1782_v20 = vadd.f32 %v1781_v13, %v1770_v9 }
 0x279   : >>> { %v1671_v8 = vld [vmem:[%s1670_s5] ss:$8 sm:$0x3]  ;;  %s1731_s2 = scalar_lea.vmem [#allocation2], %s5731_s10  ;;  %s1813_s27 = sand.u32 7, %s5181_s25 }
 0x27a   : >>> { %v1672_v16 = vsub.f32 %v1660_v5, %v1671_v8  ;;  %v1732_v17 = vld [vmem:[%s1731_s2] ss:$8 sm:$0x3]  ;;  %s1792_s7 = scalar_lea.vmem [#allocation2], %s5172_s9  ;;  %s3539_s19 = sshll.u32 %s1810_s14, 4 }
 0x27b   : >>> { %v1793_v21 = vld [vmem:[%s1792_s7] ss:$8 sm:$0x3]  ;;  %s1822_s22 = sshra.s32 %s5183_s0, 3  ;;  %v1733_v24 = vsub.f32 %v1721_v12, %v1732_v17  ;;  %s1806_s12 = scalar_lea.vmem [#allocation2], %s1805_s16 }
 0x27c   : >>> { %v1807_v25 = vld [vmem:[%s1806_s12] ss:$8 sm:$0x3]  ;;  %s1816_s3 = sadd.s32 %s3539_s19, %s1813_s27  ;;  %s1825_s23 = sand.u32 7, %s5183_s0  ;;  %v1904_v26 = vrot.slane %v1672_v16, %v5158_v46  ;;  %v1908_v27 = vrot.slane %v1672_v16, %v5161_v50  ;;  %v1794_v31 = vsub.f32 %v1782_v20, %v1793_v21 }
 0x27d   : >>> { %s3540_s20 = sshll.u32 %s1822_s22, 4  ;;  %s1817_s9 = scalar_lea.vmem [#allocation2], %s1816_s3  ;;  %v1915_v34 = vrot.slane %v1733_v24, %v5158_v46  ;;  %v1919_v35 = vrot.slane %v1733_v24, %v5161_v50 }
 0x27e   : >>> { %v1818_v28 = vld [vmem:[%s1817_s9] ss:$8 sm:$0x3]  ;;  %s1828_s17 = sadd.s32 %s3540_s20, %s1825_s23  ;;  %s1834_s25 = sshra.s32 %s5195_s13, 3  ;;  %v1954_v37 = vsel %vm1953_vm3, %v1951_v29, %v1904_v26  ;;  %v1955_v38 = vsel %vm1953_vm3, %v1952_v30, %v1908_v27  ;;  %v1926_v40 = vrot.slane %v1794_v31, %v5158_v46  ;;  %v1930_v41 = vrot.slane %v1794_v31, %v5161_v50 }
 0x27f   : >>> { %v1819_v32 = vadd.f32 %v1818_v28, %v1807_v25  ;;  %s1837_s15 = sand.u32 7, %s5195_s13  ;;  %s1829_s24 = scalar_lea.vmem [#allocation2], %s1828_s17  ;;  %v1957_v43 = vsel %vm1956_vm4, %v1954_v37, %v1915_v34  ;;  %v1958_v44 = vsel %vm1956_vm4, %v1955_v38, %v1919_v35 }
 0x280   : >>> { %v1830_v33 = vld [vmem:[%s1829_s24] ss:$8 sm:$0x3]  ;;  %s3541_s0 = sshll.u32 %s1834_s25, 4  ;;  %s1846_s8 = sshra.s32 %s5202_s6, 3  ;;  %v1960_v48 = vsel %vm1959_vm5, %v1957_v43, %v1926_v40  ;;  %v1961_v49 = vsel %vm1959_vm5, %v1958_v44, %v1930_v41 }
 0x281   : >>> { %v1831_v36 = vadd.f32 %v1830_v33, %v1819_v32  ;;  %s1840_s11 = sadd.s32 %s3541_s0, %s1837_s15  ;;  %s1849_s29 = sand.u32 7, %s5202_s6 }
 0x282   : >>> { %s3542_s5 = sshll.u32 %s1846_s8, 4  ;;  %s1841_s10 = scalar_lea.vmem [#allocation2], %s1840_s11 }
 0x283   : >>> { %v1842_v39 = vld [vmem:[%s1841_s10] ss:$8 sm:$0x3]  ;;  %s1852_s26 = sadd.s32 %s3542_s5, %s1849_s29  ;;  %s3543_s18 = sshll.u32 %s1965_s1, 4 }
 0x284   : >>> { %v1843_v42 = vadd.f32 %v1842_v39, %v1831_v36  ;;  %s1853_s13 = scalar_lea.vmem [#allocation2], %s1852_s26  ;;  %s1969_s4 = scalar_lea.vmem [#allocation3], %s3543_s18 }
 0x285   : >>> { %v1854_v45 = vld [vmem:[%s1853_s13] ss:$8 sm:$0x3]  ;;  %s5732_s30 = sld [smem:[#allocation32_spill]] }
 0x286   : >>> { %v1855_v47 = vsub.f32 %v1843_v42, %v1854_v45 }
 0x288   : >>> { %v1937_v51 = vrot.slane %v1855_v47, %v5158_v46  ;;  %v1941_v52 = vrot.slane %v1855_v47, %v5161_v50 }
 0x28a   : >>> { %v1963_v53 = vsel %vm1962_vm6, %v1960_v48, %v1937_v51  ;;  %v1964_v54 = vsel %vm1962_vm6, %v1961_v49, %v1941_v52 }
 0x28b   : >>> { %1970 = vst [vmem:[%s1969_s4] sm:$0xff] %v1963_v53  ;;  %1971 = vst [vmem:[%s1969_s4 + $0x8] sm:$0xff] %v1964_v54  ;;  %s1367_s22 = sadd.s32 1, %s5732_s30  }
 0x28c   : >>> { %p1364_p13 = scmp.ge.s32.totalorder %s1367_s22, 32  }
 0x28d   : >> { %v2171_v55 = vld [vmem:[#allocation11 + $0x8] sm:$0xff] (%p1364_p13)  ;;  %v2173_v56 = vld [vmem:[#allocation11 + $0x18] sm:$0xff] (%p1364_p13)  ;;  %v2170_v60 = vld [vmem:[#allocation11] sm:$0xff] (%p1364_p13)  ;;  %s5733_s21 = sld [smem:[#allocation31_spill]] (%p1364_p13)  ;;  %s5734_s16 = sld [smem:[#allocation30_spill]] (%p1364_p13) }
 0x28e   : >> { %1366 = sbr.rel (!%p1364_p13) target bundleno = 471 (0x1d7), region = 149  ;;  %v2043_v57 = vld [vmem:[#allocation9 + $0x8] sm:$0xff] (%p1364_p13)  ;;  %v3547_v58 = vpack.c.bf16 (%p1364_p13), %v2173_v56, %v2171_v55  ;;  %v2045_v59 = vld [vmem:[#allocation9 + $0x18] sm:$0xff] (%p1364_p13)  ;;  %v2172_v61 = vld [vmem:[#allocation11 + $0x10] sm:$0xff] (%p1364_p13) }
 0x28f   : >> { %v3611_v62 = vpack.c.bf16 (%p1364_p13), %v2045_v59, %v2043_v57  ;;  %v3549_v63 = vpack.c.bf16 (%p1364_p13), %v2172_v61, %v2170_v60  ;;  %v2042_v1 = vld [vmem:[#allocation9] sm:$0xff] (%p1364_p13)  ;;  %v2044_v2 = vld [vmem:[#allocation9 + $0x10] sm:$0xff] (%p1364_p13)  ;;  %v2175_v3 = vld [vmem:[#allocation11 + $0x28] sm:$0xff] (%p1364_p13) }
 0x290   : >> { %3548 = vmatprep.subr.bf16.mxu1 (%p1364_p13), %v3547_v58  ;;  %v3613_v4 = vpack.c.bf16 (%p1364_p13), %v2044_v2, %v2042_v1  ;;  %v2177_v5 = vld [vmem:[#allocation11 + $0x38] sm:$0xff] (%p1364_p13)  ;;  %v2047_v6 = vld [vmem:[#allocation9 + $0x28] sm:$0xff] (%p1364_p13)  ;;  %v2174_v10 = vld [vmem:[#allocation11 + $0x20] sm:$0xff] (%p1364_p13) }
 0x291   : >> { %v2049_v7 = vld [vmem:[#allocation9 + $0x38] sm:$0xff] (%p1364_p13)  ;;  %3612 = vmatprep.subr.bf16.mxu0 (%p1364_p13), %v3611_v62  ;;  %3550 = vmatpush1.bf16.msra.mxu1 (%p1364_p13), %v3549_v63  ;;  %v3551_v8 = vpack.c.bf16 (%p1364_p13), %v2177_v5, %v2175_v3  ;;  %v2176_v11 = vld [vmem:[#allocation11 + $0x30] sm:$0xff] (%p1364_p13)  ;;  %v2046_v12 = vld [vmem:[#allocation9 + $0x20] sm:$0xff] (%p1364_p13) }
 0x292   : >> { %v3615_v9 = vpack.c.bf16 (%p1364_p13), %v2049_v7, %v2047_v6  ;;  %3614 = vmatpush1.bf16.msra.mxu0 (%p1364_p13), %v3613_v4  ;;  %v3553_v13 = vpack.c.bf16 (%p1364_p13), %v2176_v11, %v2174_v10  ;;  %v2048_v14 = vld [vmem:[#allocation9 + $0x30] sm:$0xff] (%p1364_p13)  ;;  %v2179_v15 = vld [vmem:[#allocation11 + $0x48] sm:$0xff] (%p1364_p13)  ;;  %v2181_v16 = vld [vmem:[#allocation11 + $0x58] sm:$0xff] (%p1364_p13) }
 0x293   : >> { %3552 = vmatprep.subr.bf16.mxu1 (%p1364_p13), %v3551_v8  ;;  %v3617_v17 = vpack.c.bf16 (%p1364_p13), %v2048_v14, %v2046_v12  ;;  %v3555_v18 = vpack.c.bf16 (%p1364_p13), %v2181_v16, %v2179_v15  ;;  %v2051_v19 = vld [vmem:[#allocation9 + $0x48] sm:$0xff] (%p1364_p13)  ;;  %v2053_v20 = vld [vmem:[#allocation9 + $0x58] sm:$0xff] (%p1364_p13)  ;;  %v2178_v21 = vld [vmem:[#allocation11 + $0x40] sm:$0xff] (%p1364_p13)  ;;  %s3493_s28 = sshll.u32 (%p1364_p13), %s5733_s21, 8  ;;  %s1359_s7 = sadd.s32 (%p1364_p13), 1, %s5733_s21  }
 0x294   : >> { %3616 = vmatprep.subr.bf16.mxu0 (%p1364_p13), %v3615_v9  ;;  %v3619_v22 = vpack.c.bf16 (%p1364_p13), %v2053_v20, %v2051_v19  ;;  %v2180_v23 = vld [vmem:[#allocation11 + $0x50] sm:$0xff] (%p1364_p13)  ;;  %v2050_v24 = vld [vmem:[#allocation9 + $0x40] sm:$0xff] (%p1364_p13)  ;;  %v2183_v27 = vld [vmem:[#allocation11 + $0x68] sm:$0xff] (%p1364_p13)  ;;  %s5232_s1 = sshra.s32 (%p1364_p13), %s3493_s28, 3  ;;  %p1356_p6 = scmp.ge.s32.totalorder (%p1364_p13), %s1359_s7, 8  }
 0x295   : >> { %v2052_v25 = vld [vmem:[#allocation9 + $0x50] sm:$0xff]  ;;  %3554 = vmatpush1.bf16.msra.mxu1 %v3553_v13  ;;  %v3557_v26 = vpack.c.bf16 %v2180_v23, %v2178_v21  ;;  %v2185_v28 = vld [vmem:[#allocation11 + $0x78] sm:$0xff]  ;;  %v2055_v29 = vld [vmem:[#allocation9 + $0x68] sm:$0xff]  ;;  %s3544_s6 = sshll.u32 %s5232_s1, 4  ;;  %s5735_s14 = sld [smem:[#allocation24_spill]] (%p1356_p6) }
 0x296   : >> { %3618 = vmatpush1.bf16.msra.mxu0 %v3617_v17  ;;  %3556 = vmatprep.subr.bf16.mxu1 %v3555_v18  ;;  %v3621_v30 = vpack.c.bf16 %v2052_v25, %v2050_v24  ;;  %v3559_v31 = vpack.c.bf16 %v2185_v28, %v2183_v27  ;;  %v2057_v32 = vld [vmem:[#allocation9 + $0x78] sm:$0xff]  ;;  %v2182_v33 = vld [vmem:[#allocation11 + $0x60] sm:$0xff]  ;;  %v2184_v34 = vld [vmem:[#allocation11 + $0x70] sm:$0xff]  ;;  %s5235_s2 = scalar_lea.vmem [#allocation2], %s3544_s6  ;;  %s5736_s27 = sld [smem:[#allocation30_spill]] (%p1356_p6) }
 0x297   : >> { %3620 = vmatprep.subr.bf16.mxu0 %v3619_v22  ;;  %v3623_v35 = vpack.c.bf16 %v2057_v32, %v2055_v29  ;;  %v2054_v36 = vld [vmem:[#allocation9 + $0x60] sm:$0xff]  ;;  %v2056_v37 = vld [vmem:[#allocation9 + $0x70] sm:$0xff]  ;;  %v2187_v38 = vld [vmem:[#allocation11 + $0x88] sm:$0xff]  ;;  %v3561_v42 = vpack.c.bf16 %v2184_v34, %v2182_v33  ;;  %s5737_s19 = sld [smem:[#allocation29_spill]] (%p1356_p6)  ;;  %s5739_s20 = sld [smem:[#allocation57_spill]] (%p1356_p6) }
 0x298   : >> { %v2189_v39 = vld [vmem:[#allocation11 + $0x98] sm:$0xff]  ;;  %v2059_v40 = vld [vmem:[#allocation9 + $0x88] sm:$0xff]  ;;  %v3625_v43 = vpack.c.bf16 %v2056_v37, %v2054_v36  ;;  %v2186_v45 = vld [vmem:[#allocation11 + $0x80] sm:$0xff]  ;;  %s4064_s7 = smov (%p1356_p6), [#allocation14]  }
 0x299   : >> { %v2061_v41 = vld [vmem:[#allocation9 + $0x98] sm:$0xff]  ;;  %3558 = vmatpush1.bf16.msra.mxu1 %v3557_v26  ;;  %v3563_v44 = vpack.c.bf16 %v2189_v39, %v2187_v38  ;;  %v2188_v47 = vld [vmem:[#allocation11 + $0x90] sm:$0xff]  ;;  %v2058_v48 = vld [vmem:[#allocation9 + $0x80] sm:$0xff]  ;;  %s3966_s24 = sshll.u32 (%p1356_p6), %s4064_s7, 4  ;;  %s3967_s24 = int_to_ptr.vmem [resolvable:$false] %s3966_s24 }
 0x29a   : >> { %3622 = vmatpush1.bf16.msra.mxu0 %v3621_v30  ;;  %3560 = vmatprep.subr.bf16.mxu1 %v3559_v31  ;;  %v3627_v49 = vpack.c.bf16 %v2061_v41, %v2059_v40  ;;  %v2060_v51 = vld [vmem:[#allocation9 + $0x90] sm:$0xff]  ;;  %v2191_v52 = vld [vmem:[#allocation11 + $0xa8] sm:$0xff]  ;;  %v2193_v53 = vld [vmem:[#allocation11 + $0xb8] sm:$0xff]  ;;  %v3565_v56 = vpack.c.bf16 %v2188_v47, %v2186_v45  ;;  %s3968_s0 = scalar_lea.vmem (%p1356_p6), %s3967_s24, 16384 }
 0x29b   : >> { %3624 = vmatprep.subr.bf16.mxu0 %v3623_v35  ;;  %v2063_v54 = vld [vmem:[#allocation9 + $0xa8] sm:$0xff]  ;;  %v2065_v55 = vld [vmem:[#allocation9 + $0xb8] sm:$0xff]  ;;  %v3629_v57 = vpack.c.bf16 %v2060_v51, %v2058_v48  ;;  %v3567_v58 = vpack.c.bf16 %v2193_v53, %v2191_v52  ;;  %v2190_v59 = vld [vmem:[#allocation11 + $0xa0] sm:$0xff]  ;;  %s3546_s12 = sshll.u32 (%p1356_p6), %s5735_s14, 13 }
 0x29c   : >> { %v2192_v60 = vld [vmem:[#allocation11 + $0xb0] sm:$0xff]  ;;  %v2062_v61 = vld [vmem:[#allocation9 + $0xa0] sm:$0xff]  ;;  %v3631_v62 = vpack.c.bf16 %v2065_v55, %v2063_v54  ;;  %v2195_v1 = vld [vmem:[#allocation11 + $0xc8] sm:$0xff]  ;;  %s3158_s17 = sshll.u32 (%p1356_p6), %s5736_s27, 4  ;;  %s5575_s17 = int_to_ptr.vmem [resolvable:$true] %s3158_s17 }
 0x29d   : >> { %3562 = vmatpush1.bf16.msra.mxu1 %v3561_v42  ;;  %v2064_v63 = vld [vmem:[#allocation9 + $0xb0] sm:$0xff]  ;;  %v2197_v2 = vld [vmem:[#allocation11 + $0xd8] sm:$0xff]  ;;  %v2067_v3 = vld [vmem:[#allocation9 + $0xc8] sm:$0xff]  ;;  %v3569_v5 = vpack.c.bf16 %v2192_v60, %v2190_v59  ;;  %s5572_s9 = scalar_lea.hbm (%p1356_p6), %s5739_s20, %s3546_s12  ;;  %s3144_s25 = scalar_lea.sflag (%p1356_p6), [#allocation8], %s5737_s19 }
 0x29e   : >> { %3626 = vmatpush1.bf16.msra.mxu0 %v3625_v43  ;;  %3564 = vmatprep.subr.bf16.mxu1 %v3563_v44  ;;  %v2069_v4 = vld [vmem:[#allocation9 + $0xd8] sm:$0xff]  ;;  %v3633_v6 = vpack.c.bf16 %v2064_v63, %v2062_v61  ;;  %v3571_v7 = vpack.c.bf16 %v2197_v2, %v2195_v1  ;;  %v2194_v8 = vld [vmem:[#allocation11 + $0xc0] sm:$0xff]  ;;  %v2196_v9 = vld [vmem:[#allocation11 + $0xd0] sm:$0xff]  ;;  %s3962_s15 = scalar_lea.vmem (%p1356_p6), %s5575_s17, 8192  ;;  %p3969_p5 = scmp.lt.s32.totalorder (%p1356_p6), %s5575_s17, %s3967_s24 }
 0x29f   : >> { %3628 = vmatprep.subr.bf16.mxu0 %v3627_v49  ;;  %v2066_v10 = vld [vmem:[#allocation9 + $0xc0] sm:$0xff]  ;;  %v3635_v11 = vpack.c.bf16 %v2069_v4, %v2067_v3  ;;  %v2068_v12 = vld [vmem:[#allocation9 + $0xd0] sm:$0xff]  ;;  %v2199_v13 = vld [vmem:[#allocation11 + $0xe8] sm:$0xff]  ;;  %v3573_v17 = vpack.c.bf16 %v2196_v9, %v2194_v8  ;;  %p3963_p10 = scmp.ne.s32.totalorder (%p1356_p6), %s5575_s17, %s3962_s15  ;;  %p3970_p7 = scmp.lt.s32.totalorder (%p1356_p6), %s3968_s0, %s3962_s15 }
 0x2a0   : >> { %v2201_v14 = vld [vmem:[#allocation11 + $0xf8] sm:$0xff]  ;;  %v2071_v15 = vld [vmem:[#allocation9 + $0xe8] sm:$0xff]  ;;  %v3637_v18 = vpack.c.bf16 %v2068_v12, %v2066_v10  ;;  %v2198_v20 = vld [vmem:[#allocation11 + $0xe0] sm:$0xff] }
 0x2a1   : >> { %3566 = vmatpush1.bf16.msra.mxu1 %v3565_v56  ;;  %v2073_v16 = vld [vmem:[#allocation9 + $0xf8] sm:$0xff]  ;;  %v3575_v19 = vpack.c.bf16 %v2201_v14, %v2199_v13  ;;  %v2200_v21 = vld [vmem:[#allocation11 + $0xf0] sm:$0xff]  ;;  %v2070_v22 = vld [vmem:[#allocation9 + $0xe0] sm:$0xff]  ;;  %p3964_p1 = pnand (%p1356_p6), %p3963_p10, %p4260_p8  ;;  %p3971_p12 = por (%p1356_p6), %p3970_p7, %p3969_p5 }
 0x2a2   : >> { %3630 = vmatpush1.bf16.msra.mxu0 %v3629_v57  ;;  %3568 = vmatprep.subr.bf16.mxu1 %v3567_v58  ;;  %v3639_v23 = vpack.c.bf16 %v2073_v16, %v2071_v15  ;;  %v2072_v24 = vld [vmem:[#allocation9 + $0xf0] sm:$0xff]  ;;  %v2203_v25 = vld [vmem:[#allocation11 + $0x108] sm:$0xff]  ;;  %v2205_v26 = vld [vmem:[#allocation11 + $0x118] sm:$0xff]  ;;  %v3577_v29 = vpack.c.bf16 %v2200_v21, %v2198_v20 }
 0x2a3   : >> { %3632 = vmatprep.subr.bf16.mxu0 %v3631_v62  ;;  %v2075_v27 = vld [vmem:[#allocation9 + $0x108] sm:$0xff]  ;;  %v2077_v28 = vld [vmem:[#allocation9 + $0x118] sm:$0xff]  ;;  %v3641_v30 = vpack.c.bf16 %v2072_v24, %v2070_v22  ;;  %v3579_v31 = vpack.c.bf16 %v2205_v26, %v2203_v25  ;;  %v2202_v32 = vld [vmem:[#allocation11 + $0x100] sm:$0xff]  ;;  %p3965_p4 = pneg (%p1356_p6), %p3964_p1 }
 0x2a4   : >> { %v2204_v33 = vld [vmem:[#allocation11 + $0x110] sm:$0xff]  ;;  %v2074_v34 = vld [vmem:[#allocation9 + $0x100] sm:$0xff]  ;;  %v3643_v35 = vpack.c.bf16 %v2077_v28, %v2075_v27  ;;  %v2207_v37 = vld [vmem:[#allocation11 + $0x128] sm:$0xff] }
 0x2a5   : >> { %3570 = vmatpush1.bf16.msra.mxu1 %v3569_v5  ;;  %v2076_v36 = vld [vmem:[#allocation9 + $0x110] sm:$0xff]  ;;  %v2209_v38 = vld [vmem:[#allocation11 + $0x138] sm:$0xff]  ;;  %v2079_v39 = vld [vmem:[#allocation9 + $0x128] sm:$0xff]  ;;  %v3581_v41 = vpack.c.bf16 %v2204_v33, %v2202_v32  ;;  %p3972_p3 = pnand (%p1356_p6), %p3971_p12, %p3965_p4 }
 0x2a6   : >> { %3634 = vmatpush1.bf16.msra.mxu0 %v3633_v6  ;;  %3572 = vmatprep.subr.bf16.mxu1 %v3571_v7  ;;  %v2081_v40 = vld [vmem:[#allocation9 + $0x138] sm:$0xff]  ;;  %v3645_v42 = vpack.c.bf16 %v2076_v36, %v2074_v34  ;;  %v3583_v43 = vpack.c.bf16 %v2209_v38, %v2207_v37  ;;  %v2206_v44 = vld [vmem:[#allocation11 + $0x120] sm:$0xff]  ;;  %v2208_v45 = vld [vmem:[#allocation11 + $0x130] sm:$0xff] }
 0x2a7   : >> { %3636 = vmatprep.subr.bf16.mxu0 %v3635_v11  ;;  %v2078_v47 = vld [vmem:[#allocation9 + $0x120] sm:$0xff]  ;;  %v3647_v48 = vpack.c.bf16 %v2081_v40, %v2079_v39  ;;  %v2080_v49 = vld [vmem:[#allocation9 + $0x130] sm:$0xff]  ;;  %v2211_v51 = vld [vmem:[#allocation11 + $0x148] sm:$0xff]  ;;  %v3585_v55 = vpack.c.bf16 %v2208_v45, %v2206_v44 }
 0x2a8   : >> { %v2213_v52 = vld [vmem:[#allocation11 + $0x158] sm:$0xff]  ;;  %v2083_v53 = vld [vmem:[#allocation9 + $0x148] sm:$0xff]  ;;  %v3649_v56 = vpack.c.bf16 %v2080_v49, %v2078_v47  ;;  %v2210_v58 = vld [vmem:[#allocation11 + $0x140] sm:$0xff] }
 0x2a9   : >> { %3574 = vmatpush1.bf16.msra.mxu1 %v3573_v17  ;;  %v2085_v54 = vld [vmem:[#allocation9 + $0x158] sm:$0xff]  ;;  %v3587_v57 = vpack.c.bf16 %v2213_v52, %v2211_v51  ;;  %v2212_v59 = vld [vmem:[#allocation11 + $0x150] sm:$0xff]  ;;  %v2082_v60 = vld [vmem:[#allocation9 + $0x140] sm:$0xff] }
 0x2aa   : >> { %3638 = vmatpush1.bf16.msra.mxu0 %v3637_v18  ;;  %3576 = vmatprep.subr.bf16.mxu1 %v3575_v19  ;;  %v3651_v61 = vpack.c.bf16 %v2085_v54, %v2083_v53  ;;  %v2084_v62 = vld [vmem:[#allocation9 + $0x150] sm:$0xff]  ;;  %v2215_v63 = vld [vmem:[#allocation11 + $0x168] sm:$0xff]  ;;  %v2217_v1 = vld [vmem:[#allocation11 + $0x178] sm:$0xff]  ;;  %v3589_v4 = vpack.c.bf16 %v2212_v59, %v2210_v58 }
 0x2ab   : >> { %3640 = vmatprep.subr.bf16.mxu0 %v3639_v23  ;;  %v2087_v2 = vld [vmem:[#allocation9 + $0x168] sm:$0xff]  ;;  %v2089_v3 = vld [vmem:[#allocation9 + $0x178] sm:$0xff]  ;;  %v2214_v5 = vld [vmem:[#allocation11 + $0x160] sm:$0xff]  ;;  %v3653_v6 = vpack.c.bf16 %v2084_v62, %v2082_v60  ;;  %v3591_v7 = vpack.c.bf16 %v2217_v1, %v2215_v63 }
 0x2ac   : >> { %v2216_v8 = vld [vmem:[#allocation11 + $0x170] sm:$0xff]  ;;  %v2086_v9 = vld [vmem:[#allocation9 + $0x160] sm:$0xff]  ;;  %v3655_v11 = vpack.c.bf16 %v2089_v3, %v2087_v2  ;;  %v2219_v12 = vld [vmem:[#allocation11 + $0x188] sm:$0xff] }
 0x2ad   : >> { %3578 = vmatpush1.bf16.msra.mxu1 %v3577_v29  ;;  %v2088_v10 = vld [vmem:[#allocation9 + $0x170] sm:$0xff]  ;;  %v2221_v13 = vld [vmem:[#allocation11 + $0x198] sm:$0xff]  ;;  %v2107_v14 = vld [vmem:[#allocation3 + $0x8] sm:$0xff]  ;;  %v3593_v18 = vpack.c.bf16 %v2216_v8, %v2214_v5 }
 0x2ae   : >> { %3642 = vmatpush1.bf16.msra.mxu0 %v3641_v30  ;;  %3580 = vmatprep.subr.bf16.mxu1 %v3579_v31  ;;  %v2091_v15 = vld [vmem:[#allocation9 + $0x188] sm:$0xff]  ;;  %v2093_v16 = vld [vmem:[#allocation9 + $0x198] sm:$0xff]  ;;  %v3657_v19 = vpack.c.bf16 %v2088_v10, %v2086_v9  ;;  %v3595_v20 = vpack.c.bf16 %v2221_v13, %v2219_v12  ;;  %v2218_v21 = vld [vmem:[#allocation11 + $0x180] sm:$0xff] }
 0x2af   : >> { %3644 = vmatprep.subr.bf16.mxu0 %v3643_v35  ;;  %2298 = vmatprep.mubr.f32.mxu1 %v2107_v14  ;;  %v1979_v17 = vld [vmem:[%s5235_s2 + $0x8] sm:$0xff]  ;;  %v2220_v22 = vld [vmem:[#allocation11 + $0x190] sm:$0xff]  ;;  %v2090_v23 = vld [vmem:[#allocation9 + $0x180] sm:$0xff]  ;;  %v3659_v24 = vpack.c.bf16 %v2093_v16, %v2091_v15 }
 0x2b0   : >> { %2555 = vmatprep.mubr.f32.mxu0 %v1979_v17  ;;  %v2092_v25 = vld [vmem:[#allocation9 + $0x190] sm:$0xff]  ;;  %v2223_v26 = vld [vmem:[#allocation11 + $0x1a8] sm:$0xff]  ;;  %v2225_v27 = vld [vmem:[#allocation11 + $0x1b8] sm:$0xff]  ;;  %v3597_v30 = vpack.c.bf16 %v2220_v22, %v2218_v21 }
 0x2b1   : >> { %3582 = vmatpush1.bf16.msra.mxu1 %v3581_v41  ;;  %v2095_v28 = vld [vmem:[#allocation9 + $0x1a8] sm:$0xff]  ;;  %v2097_v29 = vld [vmem:[#allocation9 + $0x1b8] sm:$0xff]  ;;  %v3661_v31 = vpack.c.bf16 %v2092_v25, %v2090_v23  ;;  %v3599_v32 = vpack.c.bf16 %v2225_v27, %v2223_v26  ;;  %v2222_v33 = vld [vmem:[#allocation11 + $0x1a0] sm:$0xff] }
 0x2b2   : >> { %3646 = vmatpush1.bf16.msra.mxu0 %v3645_v42  ;;  %3584 = vmatprep.subr.bf16.mxu1 %v3583_v43  ;;  %v2224_v34 = vld [vmem:[#allocation11 + $0x1b0] sm:$0xff]  ;;  %v2094_v35 = vld [vmem:[#allocation9 + $0x1a0] sm:$0xff]  ;;  %v3663_v36 = vpack.c.bf16 %v2097_v29, %v2095_v28  ;;  %v2227_v38 = vld [vmem:[#allocation11 + $0x1c8] sm:$0xff] }
 0x2b3   : >> { %3648 = vmatprep.subr.bf16.mxu0 %v3647_v48  ;;  %v2096_v37 = vld [vmem:[#allocation9 + $0x1b0] sm:$0xff]  ;;  %v2229_v39 = vld [vmem:[#allocation11 + $0x1d8] sm:$0xff]  ;;  %v2099_v40 = vld [vmem:[#allocation9 + $0x1c8] sm:$0xff]  ;;  %v3601_v42 = vpack.c.bf16 %v2224_v34, %v2222_v33 }
 0x2b4   : >> { %v2101_v41 = vld [vmem:[#allocation9 + $0x1d8] sm:$0xff]  ;;  %v3665_v43 = vpack.c.bf16 %v2096_v37, %v2094_v35  ;;  %v3603_v44 = vpack.c.bf16 %v2229_v39, %v2227_v38  ;;  %v2226_v45 = vld [vmem:[#allocation11 + $0x1c0] sm:$0xff]  ;;  %v2228_v47 = vld [vmem:[#allocation11 + $0x1d0] sm:$0xff] }
 0x2b5   : >> { %3586 = vmatpush1.bf16.msra.mxu1 %v3585_v55  ;;  %v2098_v48 = vld [vmem:[#allocation9 + $0x1c0] sm:$0xff]  ;;  %v3667_v49 = vpack.c.bf16 %v2101_v41, %v2099_v40  ;;  %v2100_v51 = vld [vmem:[#allocation9 + $0x1d0] sm:$0xff]  ;;  %v2231_v52 = vld [vmem:[#allocation11 + $0x1e8] sm:$0xff] }
 0x2b6   : >> { %3650 = vmatpush1.bf16.msra.mxu0 %v3649_v56  ;;  %3588 = vmatprep.subr.bf16.mxu1 %v3587_v57  ;;  %v2233_v53 = vld [vmem:[#allocation11 + $0x1f8] sm:$0xff]  ;;  %v2103_v54 = vld [vmem:[#allocation9 + $0x1e8] sm:$0xff]  ;;  %v3605_v56 = vpack.c.bf16 %v2228_v47, %v2226_v45  ;;  %v3669_v57 = vpack.c.bf16 %v2100_v51, %v2098_v48  ;;  %v2230_v59 = vld [vmem:[#allocation11 + $0x1e0] sm:$0xff] }
 0x2b7   : >> { %3652 = vmatprep.subr.bf16.mxu0 %v3651_v61  ;;  %v2105_v55 = vld [vmem:[#allocation9 + $0x1f8] sm:$0xff]  ;;  %v3607_v58 = vpack.c.bf16 %v2233_v53, %v2231_v52  ;;  %v2232_v60 = vld [vmem:[#allocation11 + $0x1f0] sm:$0xff]  ;;  %v2102_v62 = vld [vmem:[#allocation9 + $0x1e0] sm:$0xff] }
 0x2b8   : >> { %v3671_v61 = vpack.c.bf16 %v2105_v55, %v2103_v54  ;;  %v2104_v63 = vld [vmem:[#allocation9 + $0x1f0] sm:$0xff]  ;;  %v3609_v1 = vpack.c.bf16 %v2232_v60, %v2230_v59  ;;  %v2106_v3 = vld [vmem:[#allocation3] sm:$0xff]  ;;  %v2109_v5 = vld [vmem:[#allocation3 + $0x18] sm:$0xff] }
 0x2b9   : >> { %3590 = vmatpush1.bf16.msra.mxu1 %v3589_v4  ;;  %v3673_v2 = vpack.c.bf16 %v2104_v63, %v2102_v62  ;;  %v1978_v4 = vld [vmem:[%s5235_s2] sm:$0xff]  ;;  %v1980_v8 = vld [vmem:[%s5235_s2 + $0x10] sm:$0xff]  ;;  %v2111_v9 = vld [vmem:[#allocation3 + $0x28] sm:$0xff] }
 0x2ba   : >> { %3654 = vmatpush1.bf16.msra.mxu0 %v3653_v6  ;;  %3592 = vmatprep.subr.bf16.mxu1 %v3591_v7  ;;  %v1981_v6 = vld [vmem:[%s5235_s2 + $0x18] sm:$0xff]  ;;  %v2108_v7 = vld [vmem:[#allocation3 + $0x10] sm:$0xff]  ;;  %v1983_v10 = vld [vmem:[%s5235_s2 + $0x28] sm:$0xff] }
 0x2bb   : >> { %3656 = vmatprep.subr.bf16.mxu0 %v3655_v11  ;;  %v2110_v11 = vld [vmem:[#allocation3 + $0x20] sm:$0xff]  ;;  %v2113_v13 = vld [vmem:[#allocation3 + $0x38] sm:$0xff]  ;;  %v2112_v15 = vld [vmem:[#allocation3 + $0x30] sm:$0xff] }
 0x2bc   : >> { %v1982_v12 = vld [vmem:[%s5235_s2 + $0x20] sm:$0xff]  ;;  %v1985_v14 = vld [vmem:[%s5235_s2 + $0x38] sm:$0xff]  ;;  %v1984_v16 = vld [vmem:[%s5235_s2 + $0x30] sm:$0xff] }
 0x2bd   : >> { %3594 = vmatpush1.bf16.msra.mxu1 %v3593_v18  ;;  %v2115_v17 = vld [vmem:[#allocation3 + $0x48] sm:$0xff]  ;;  %v2117_v21 = vld [vmem:[#allocation3 + $0x58] sm:$0xff]  ;;  %v2116_v23 = vld [vmem:[#allocation3 + $0x50] sm:$0xff] }
 0x2be   : >> { %3658 = vmatpush1.bf16.msra.mxu0 %v3657_v19  ;;  %3596 = vmatprep.subr.bf16.mxu1 %v3595_v20  ;;  %v1987_v18 = vld [vmem:[%s5235_s2 + $0x48] sm:$0xff]  ;;  %v2114_v19 = vld [vmem:[#allocation3 + $0x40] sm:$0xff]  ;;  %v1989_v22 = vld [vmem:[%s5235_s2 + $0x58] sm:$0xff] }
 0x2bf   : >> { %3660 = vmatprep.subr.bf16.mxu0 %v3659_v24  ;;  %v1986_v20 = vld [vmem:[%s5235_s2 + $0x40] sm:$0xff]  ;;  %v1988_v24 = vld [vmem:[%s5235_s2 + $0x50] sm:$0xff]  ;;  %v2119_v25 = vld [vmem:[#allocation3 + $0x68] sm:$0xff] }
 0x2c0   : >> { %v1991_v26 = vld [vmem:[%s5235_s2 + $0x68] sm:$0xff]  ;;  %v2118_v27 = vld [vmem:[#allocation3 + $0x60] sm:$0xff]  ;;  %v2121_v29 = vld [vmem:[#allocation3 + $0x78] sm:$0xff] }
 0x2c1   : >> { %3598 = vmatpush1.bf16.msra.mxu1 %v3597_v30  ;;  %v1990_v28 = vld [vmem:[%s5235_s2 + $0x60] sm:$0xff]  ;;  %v1993_v30 = vld [vmem:[%s5235_s2 + $0x78] sm:$0xff]  ;;  %v2123_v33 = vld [vmem:[#allocation3 + $0x88] sm:$0xff] }
 0x2c2   : >> { %3662 = vmatpush1.bf16.msra.mxu0 %v3661_v31  ;;  %3600 = vmatprep.subr.bf16.mxu1 %v3599_v32  ;;  %v2120_v31 = vld [vmem:[#allocation3 + $0x70] sm:$0xff]  ;;  %v1995_v34 = vld [vmem:[%s5235_s2 + $0x88] sm:$0xff]  ;;  %v2122_v35 = vld [vmem:[#allocation3 + $0x80] sm:$0xff] }
 0x2c3   : >> { %3664 = vmatprep.subr.bf16.mxu0 %v3663_v36  ;;  %v1992_v32 = vld [vmem:[%s5235_s2 + $0x70] sm:$0xff]  ;;  %v1994_v36 = vld [vmem:[%s5235_s2 + $0x80] sm:$0xff]  ;;  %v2125_v37 = vld [vmem:[#allocation3 + $0x98] sm:$0xff] }
 0x2c4   : >> { %v1997_v38 = vld [vmem:[%s5235_s2 + $0x98] sm:$0xff]  ;;  %v2124_v39 = vld [vmem:[#allocation3 + $0x90] sm:$0xff]  ;;  %v2127_v41 = vld [vmem:[#allocation3 + $0xa8] sm:$0xff] }
 0x2c5   : >> { %3602 = vmatpush1.bf16.msra.mxu1 %v3601_v42  ;;  %v1996_v40 = vld [vmem:[%s5235_s2 + $0x90] sm:$0xff]  ;;  %v1999_v42 = vld [vmem:[%s5235_s2 + $0xa8] sm:$0xff]  ;;  %v2129_v45 = vld [vmem:[#allocation3 + $0xb8] sm:$0xff] }
 0x2c6   : >> { %3666 = vmatpush1.bf16.msra.mxu0 %v3665_v43  ;;  %3604 = vmatprep.subr.bf16.mxu1 %v3603_v44  ;;  %v2126_v43 = vld [vmem:[#allocation3 + $0xa0] sm:$0xff]  ;;  %v2001_v47 = vld [vmem:[%s5235_s2 + $0xb8] sm:$0xff]  ;;  %v2128_v48 = vld [vmem:[#allocation3 + $0xb0] sm:$0xff] }
 0x2c7   : >> { %3668 = vmatprep.subr.bf16.mxu0 %v3667_v49  ;;  %v1998_v44 = vld [vmem:[%s5235_s2 + $0xa0] sm:$0xff]  ;;  %v2000_v49 = vld [vmem:[%s5235_s2 + $0xb0] sm:$0xff]  ;;  %v2131_v51 = vld [vmem:[#allocation3 + $0xc8] sm:$0xff] }
 0x2c8   : >> { %v2003_v52 = vld [vmem:[%s5235_s2 + $0xc8] sm:$0xff]  ;;  %v2130_v53 = vld [vmem:[#allocation3 + $0xc0] sm:$0xff]  ;;  %v2133_v55 = vld [vmem:[#allocation3 + $0xd8] sm:$0xff] }
 0x2c9   : >> { %3606 = vmatpush1.bf16.msra.mxu1 %v3605_v56  ;;  %v2002_v54 = vld [vmem:[%s5235_s2 + $0xc0] sm:$0xff]  ;;  %v2005_v56 = vld [vmem:[%s5235_s2 + $0xd8] sm:$0xff]  ;;  %v2135_v59 = vld [vmem:[#allocation3 + $0xe8] sm:$0xff] }
 0x2ca   : >> { %3670 = vmatpush1.bf16.msra.mxu0 %v3669_v57  ;;  %3608 = vmatprep.subr.bf16.mxu1 %v3607_v58  ;;  %v2132_v57 = vld [vmem:[#allocation3 + $0xd0] sm:$0xff]  ;;  %v2007_v60 = vld [vmem:[%s5235_s2 + $0xe8] sm:$0xff]  ;;  %v2006_v62 = vld [vmem:[%s5235_s2 + $0xe0] sm:$0xff] }
 0x2cb   : >> { %3672 = vmatprep.subr.bf16.mxu0 %v3671_v61  ;;  %v2004_v58 = vld [vmem:[%s5235_s2 + $0xd0] sm:$0xff]  ;;  %v2134_v61 = vld [vmem:[#allocation3 + $0xe0] sm:$0xff]  ;;  %v2137_v63 = vld [vmem:[#allocation3 + $0xf8] sm:$0xff] }
 0x2cd   : >> { %3610 = vmatpush1.bf16.msra.mxu1 %v3609_v1  ;;  %v2009_v1 = vld [vmem:[%s5235_s2 + $0xf8] sm:$0xff] }
 0x2ce   : >> { %3674 = vmatpush1.bf16.msra.mxu0 %v3673_v2  ;;  %v2136_v2 = vld [vmem:[#allocation3 + $0xf0] sm:$0xff] }
 0x2d0   : >> { %2299 = vmatmul.mubr.f32.vlgmr.msra.gmra.mrb[0].mxu1 %v2106_v3  ;;  %v2008_v3 = vld [vmem:[%s5235_s2 + $0xf0] sm:$0xff] }
 0x2d1   : >> { %2556 = vmatmul.mubr.f32.vlgmr.msra.gmra.mrb[0].mxu0 %v1978_v4  ;;  %2304 = vmatprep.mubr.f32.mxu1 %v2109_v5  ;;  %v2139_v4 = vld [vmem:[#allocation3 + $0x108] sm:$0xff] }
 0x2d2   : >> { %2561 = vmatprep.mubr.f32.mxu0 %v1981_v6  ;;  %v2011_v5 = vld [vmem:[%s5235_s2 + $0x108] sm:$0xff]  ;;  %v2138_v6 = vld [vmem:[#allocation3 + $0x100] sm:$0xff] }
 0x2d4   : >> { %2305 = vmatmul.mubr.f32.gmra.mrb[2].mxu1 %v2108_v7  ;;  %v2010_v7 = vld [vmem:[%s5235_s2 + $0x100] sm:$0xff] }
 0x2d5   : >> { %2562 = vmatmul.mubr.f32.gmra.mrb[2].mxu0 %v1980_v8  ;;  %2310 = vmatprep.mubr.f32.mxu1 %v2111_v9  ;;  %v2141_v8 = vld [vmem:[#allocation3 + $0x118] sm:$0xff] }
 0x2d6   : >> { %2567 = vmatprep.mubr.f32.mxu0 %v1983_v10  ;;  %v2013_v9 = vld [vmem:[%s5235_s2 + $0x118] sm:$0xff]  ;;  %v2140_v10 = vld [vmem:[#allocation3 + $0x110] sm:$0xff] }
 0x2d8   : >> { %2311 = vmatmul.mubr.f32.gmra.mrb[4].mxu1 %v2110_v11  ;;  %v2012_v11 = vld [vmem:[%s5235_s2 + $0x110] sm:$0xff] }
 0x2d9   : >> { %2568 = vmatmul.mubr.f32.gmra.mrb[4].mxu0 %v1982_v12  ;;  %2316 = vmatprep.mubr.f32.mxu1 %v2113_v13  ;;  %v2143_v12 = vld [vmem:[#allocation3 + $0x128] sm:$0xff] }
 0x2da   : >> { %2573 = vmatprep.mubr.f32.mxu0 %v1985_v14  ;;  %v2015_v13 = vld [vmem:[%s5235_s2 + $0x128] sm:$0xff]  ;;  %v2142_v14 = vld [vmem:[#allocation3 + $0x120] sm:$0xff] }
 0x2dc   : >> { %2317 = vmatmul.mubr.f32.gmra.mrb[6].mxu1 %v2112_v15  ;;  %v2014_v15 = vld [vmem:[%s5235_s2 + $0x120] sm:$0xff] }
 0x2dd   : >> { %2574 = vmatmul.mubr.f32.gmra.mrb[6].mxu0 %v1984_v16  ;;  %2322 = vmatprep.mubr.f32.mxu1 %v2115_v17  ;;  %v2145_v16 = vld [vmem:[#allocation3 + $0x138] sm:$0xff] }
 0x2de   : >> { %2579 = vmatprep.mubr.f32.mxu0 %v1987_v18  ;;  %v2017_v17 = vld [vmem:[%s5235_s2 + $0x138] sm:$0xff]  ;;  %v2144_v18 = vld [vmem:[#allocation3 + $0x130] sm:$0xff] }
 0x2e0   : >> { %2323 = vmatmul.mubr.f32.gmra.mrb[8].mxu1 %v2114_v19  ;;  %v2016_v19 = vld [vmem:[%s5235_s2 + $0x130] sm:$0xff] }
 0x2e1   : >> { %2580 = vmatmul.mubr.f32.gmra.mrb[8].mxu0 %v1986_v20  ;;  %2328 = vmatprep.mubr.f32.mxu1 %v2117_v21  ;;  %v2147_v20 = vld [vmem:[#allocation3 + $0x148] sm:$0xff] }
 0x2e2   : >> { %2585 = vmatprep.mubr.f32.mxu0 %v1989_v22  ;;  %v2019_v21 = vld [vmem:[%s5235_s2 + $0x148] sm:$0xff]  ;;  %v2146_v22 = vld [vmem:[#allocation3 + $0x140] sm:$0xff] }
 0x2e4   : >> { %2329 = vmatmul.mubr.f32.gmra.mrb[10].mxu1 %v2116_v23  ;;  %v2018_v23 = vld [vmem:[%s5235_s2 + $0x140] sm:$0xff] }
 0x2e5   : >> { %2586 = vmatmul.mubr.f32.gmra.mrb[10].mxu0 %v1988_v24  ;;  %2334 = vmatprep.mubr.f32.mxu1 %v2119_v25  ;;  %v2149_v24 = vld [vmem:[#allocation3 + $0x158] sm:$0xff] }
 0x2e6   : >> { %2591 = vmatprep.mubr.f32.mxu0 %v1991_v26  ;;  %v2021_v25 = vld [vmem:[%s5235_s2 + $0x158] sm:$0xff]  ;;  %v2148_v26 = vld [vmem:[#allocation3 + $0x150] sm:$0xff] }
 0x2e8   : >> { %2335 = vmatmul.mubr.f32.gmra.mrb[12].mxu1 %v2118_v27  ;;  %v2020_v27 = vld [vmem:[%s5235_s2 + $0x150] sm:$0xff] }
 0x2e9   : >> { %2592 = vmatmul.mubr.f32.gmra.mrb[12].mxu0 %v1990_v28  ;;  %2340 = vmatprep.mubr.f32.mxu1 %v2121_v29  ;;  %v2151_v28 = vld [vmem:[#allocation3 + $0x168] sm:$0xff] }
 0x2ea   : >> { %2597 = vmatprep.mubr.f32.mxu0 %v1993_v30  ;;  %v2023_v29 = vld [vmem:[%s5235_s2 + $0x168] sm:$0xff]  ;;  %v2150_v30 = vld [vmem:[#allocation3 + $0x160] sm:$0xff] }
 0x2ec   : >> { %2341 = vmatmul.mubr.f32.gmra.mrb[14].mxu1 %v2120_v31  ;;  %v2022_v31 = vld [vmem:[%s5235_s2 + $0x160] sm:$0xff] }
 0x2ed   : >> { %2598 = vmatmul.mubr.f32.gmra.mrb[14].mxu0 %v1992_v32  ;;  %2346 = vmatprep.mubr.f32.mxu1 %v2123_v33  ;;  %v2153_v32 = vld [vmem:[#allocation3 + $0x178] sm:$0xff] }
 0x2ee   : >> { %2603 = vmatprep.mubr.f32.mxu0 %v1995_v34  ;;  %v2025_v33 = vld [vmem:[%s5235_s2 + $0x178] sm:$0xff]  ;;  %v2152_v34 = vld [vmem:[#allocation3 + $0x170] sm:$0xff] }
 0x2f0   : >> { %2347 = vmatmul.mubr.f32.gmra.mrb[16].mxu1 %v2122_v35  ;;  %v2024_v35 = vld [vmem:[%s5235_s2 + $0x170] sm:$0xff] }
 0x2f1   : >> { %2604 = vmatmul.mubr.f32.gmra.mrb[16].mxu0 %v1994_v36  ;;  %2352 = vmatprep.mubr.f32.mxu1 %v2125_v37  ;;  %v2155_v36 = vld [vmem:[#allocation3 + $0x188] sm:$0xff] }
 0x2f2   : >> { %2609 = vmatprep.mubr.f32.mxu0 %v1997_v38  ;;  %v2027_v37 = vld [vmem:[%s5235_s2 + $0x188] sm:$0xff]  ;;  %v2154_v38 = vld [vmem:[#allocation3 + $0x180] sm:$0xff] }
 0x2f4   : >> { %2353 = vmatmul.mubr.f32.gmra.mrb[18].mxu1 %v2124_v39  ;;  %v2026_v39 = vld [vmem:[%s5235_s2 + $0x180] sm:$0xff] }
 0x2f5   : >> { %2610 = vmatmul.mubr.f32.gmra.mrb[18].mxu0 %v1996_v40  ;;  %2358 = vmatprep.mubr.f32.mxu1 %v2127_v41  ;;  %v2157_v40 = vld [vmem:[#allocation3 + $0x198] sm:$0xff] }
 0x2f6   : >> { %2615 = vmatprep.mubr.f32.mxu0 %v1999_v42  ;;  %v2029_v41 = vld [vmem:[%s5235_s2 + $0x198] sm:$0xff]  ;;  %v2156_v42 = vld [vmem:[#allocation3 + $0x190] sm:$0xff] }
 0x2f8   : >> { %2359 = vmatmul.mubr.f32.gmra.mrb[20].mxu1 %v2126_v43  ;;  %v2028_v43 = vld [vmem:[%s5235_s2 + $0x190] sm:$0xff] }
 0x2f9   : >> { %2616 = vmatmul.mubr.f32.gmra.mrb[20].mxu0 %v1998_v44  ;;  %2364 = vmatprep.mubr.f32.mxu1 %v2129_v45  ;;  %v2159_v44 = vld [vmem:[#allocation3 + $0x1a8] sm:$0xff] }
 0x2fa   : >> { %2621 = vmatprep.mubr.f32.mxu0 %v2001_v47  ;;  %v2031_v45 = vld [vmem:[%s5235_s2 + $0x1a8] sm:$0xff]  ;;  %v2158_v47 = vld [vmem:[#allocation3 + $0x1a0] sm:$0xff] }
 0x2fc   : >> { %2365 = vmatmul.mubr.f32.gmra.mrb[22].mxu1 %v2128_v48  ;;  %v2030_v48 = vld [vmem:[%s5235_s2 + $0x1a0] sm:$0xff] }
 0x2fd   : >> { %2622 = vmatmul.mubr.f32.gmra.mrb[22].mxu0 %v2000_v49  ;;  %2370 = vmatprep.mubr.f32.mxu1 %v2131_v51  ;;  %v2161_v49 = vld [vmem:[#allocation3 + $0x1b8] sm:$0xff] }
 0x2fe   : >> { %2627 = vmatprep.mubr.f32.mxu0 %v2003_v52  ;;  %v2033_v51 = vld [vmem:[%s5235_s2 + $0x1b8] sm:$0xff]  ;;  %v2160_v52 = vld [vmem:[#allocation3 + $0x1b0] sm:$0xff] }
 0x300   : >> { %2371 = vmatmul.mubr.f32.gmra.mrb[24].mxu1 %v2130_v53  ;;  %v2032_v53 = vld [vmem:[%s5235_s2 + $0x1b0] sm:$0xff] }
 0x301   : >> { %2628 = vmatmul.mubr.f32.gmra.mrb[24].mxu0 %v2002_v54  ;;  %2376 = vmatprep.mubr.f32.mxu1 %v2133_v55  ;;  %v2163_v54 = vld [vmem:[#allocation3 + $0x1c8] sm:$0xff] }
 0x302   : >> { %2633 = vmatprep.mubr.f32.mxu0 %v2005_v56  ;;  %v2035_v55 = vld [vmem:[%s5235_s2 + $0x1c8] sm:$0xff]  ;;  %v2162_v56 = vld [vmem:[#allocation3 + $0x1c0] sm:$0xff] }
 0x304   : >> { %2377 = vmatmul.mubr.f32.gmra.mrb[26].mxu1 %v2132_v57  ;;  %v2034_v57 = vld [vmem:[%s5235_s2 + $0x1c0] sm:$0xff] }
 0x305   : >> { %2634 = vmatmul.mubr.f32.gmra.mrb[26].mxu0 %v2004_v58  ;;  %2382 = vmatprep.mubr.f32.mxu1 %v2135_v59  ;;  %v2165_v58 = vld [vmem:[#allocation3 + $0x1d8] sm:$0xff] }
 0x306   : >> { %2639 = vmatprep.mubr.f32.mxu0 %v2007_v60  ;;  %v2037_v59 = vld [vmem:[%s5235_s2 + $0x1d8] sm:$0xff]  ;;  %v2164_v60 = vld [vmem:[#allocation3 + $0x1d0] sm:$0xff] }
 0x308   : >> { %2383 = vmatmul.mubr.f32.gmra.mrb[28].mxu1 %v2134_v61  ;;  %v2036_v61 = vld [vmem:[%s5235_s2 + $0x1d0] sm:$0xff] }
 0x309   : >> { %2640 = vmatmul.mubr.f32.gmra.mrb[28].mxu0 %v2006_v62  ;;  %2388 = vmatprep.mubr.f32.mxu1 %v2137_v63  ;;  %v2167_v62 = vld [vmem:[#allocation3 + $0x1e8] sm:$0xff] }
 0x30a   : >> { %2645 = vmatprep.mubr.f32.mxu0 %v2009_v1  ;;  %v2039_v63 = vld [vmem:[%s5235_s2 + $0x1e8] sm:$0xff]  ;;  %v2166_v1 = vld [vmem:[#allocation3 + $0x1e0] sm:$0xff] }
 0x30c   : >> { %2389 = vmatmul.mubr.f32.gmra.mrb[30].mxu1 %v2136_v2  ;;  %v2038_v2 = vld [vmem:[%s5235_s2 + $0x1e0] sm:$0xff] }
 0x30d   : >> { %2646 = vmatmul.mubr.f32.gmra.mrb[30].mxu0 %v2008_v3  ;;  %2394 = vmatprep.mubr.f32.mxu1 %v2139_v4  ;;  %v2169_v3 = vld [vmem:[#allocation3 + $0x1f8] sm:$0xff] }
 0x30e   : >> { %2651 = vmatprep.mubr.f32.mxu0 %v2011_v5  ;;  %v2041_v4 = vld [vmem:[%s5235_s2 + $0x1f8] sm:$0xff]  ;;  %v2168_v5 = vld [vmem:[#allocation3 + $0x1f0] sm:$0xff] }
 0x310   : >> { %2395 = vmatmul.mubr.f32.gmra.mrb[32].mxu1 %v2138_v6  ;;  %v2040_v6 = vld [vmem:[%s5235_s2 + $0x1f0] sm:$0xff] }
 0x311   : >> { %2652 = vmatmul.mubr.f32.gmra.mrb[32].mxu0 %v2010_v7  ;;  %2400 = vmatprep.mubr.f32.mxu1 %v2141_v8  ;;  %v5303_v8 = vrot.slane %v4330_v0, %v5158_v46 }
 0x312   : >> { %2657 = vmatprep.mubr.f32.mxu0 %v2013_v9 }
 0x314   : >> { %2401 = vmatmul.mubr.f32.gmra.mrb[34].mxu1 %v2140_v10 }
 0x315   : >> { %2658 = vmatmul.mubr.f32.gmra.mrb[34].mxu0 %v2012_v11  ;;  %2406 = vmatprep.mubr.f32.mxu1 %v2143_v12  ;;  %v5307_v11 = vrot.slane %v4330_v0, %v5161_v50 }
 0x316   : >> { %2663 = vmatprep.mubr.f32.mxu0 %v2015_v13 }
 0x318   : >> { %2407 = vmatmul.mubr.f32.gmra.mrb[36].mxu1 %v2142_v14 }
 0x319   : >> { %2664 = vmatmul.mubr.f32.gmra.mrb[36].mxu0 %v2014_v15  ;;  %2412 = vmatprep.mubr.f32.mxu1 %v2145_v16 }
 0x31a   : >> { %2669 = vmatprep.mubr.f32.mxu0 %v2017_v17  ;;  %v2951_v17 = vld [vmem:[%s5734_s16] sm:$0xff] }
 0x31c   : >> { %2413 = vmatmul.mubr.f32.gmra.mrb[38].mxu1 %v2144_v18 }
 0x31d   : >> { %2670 = vmatmul.mubr.f32.gmra.mrb[38].mxu0 %v2016_v19  ;;  %2418 = vmatprep.mubr.f32.mxu1 %v2147_v20 }
 0x31e   : >> { %2675 = vmatprep.mubr.f32.mxu0 %v2019_v21  ;;  %v2952_v21 = vld [vmem:[%s5734_s16 + $0x8] sm:$0xff] }
 0x320   : >> { %2419 = vmatmul.mubr.f32.gmra.mrb[40].mxu1 %v2146_v22 }
 0x321   : >> { %2676 = vmatmul.mubr.f32.gmra.mrb[40].mxu0 %v2018_v23  ;;  %2424 = vmatprep.mubr.f32.mxu1 %v2149_v24 }
 0x322   : >> { %2681 = vmatprep.mubr.f32.mxu0 %v2021_v25 }
 0x324   : >> { %2425 = vmatmul.mubr.f32.gmra.mrb[42].mxu1 %v2148_v26 }
 0x325   : >> { %2682 = vmatmul.mubr.f32.gmra.mrb[42].mxu0 %v2020_v27  ;;  %2430 = vmatprep.mubr.f32.mxu1 %v2151_v28 }
 0x326   : >> { %2687 = vmatprep.mubr.f32.mxu0 %v2023_v29  ;;  %v2953_v29 = vld [vmem:[%s5734_s16 + $0x10] sm:$0xff] }
 0x328   : >> { %2431 = vmatmul.mubr.f32.gmra.mrb[44].mxu1 %v2150_v30 }
 0x329   : >> { %2688 = vmatmul.mubr.f32.gmra.mrb[44].mxu0 %v2022_v31  ;;  %2436 = vmatprep.mubr.f32.mxu1 %v2153_v32 }
 0x32a   : >> { %2693 = vmatprep.mubr.f32.mxu0 %v2025_v33 }
 0x32c   : >> { %2437 = vmatmul.mubr.f32.gmra.mrb[46].mxu1 %v2152_v34  ;;  %v2954_v34 = vld [vmem:[%s5734_s16 + $0x18] sm:$0xff] }
 0x32d   : >> { %2694 = vmatmul.mubr.f32.gmra.mrb[46].mxu0 %v2024_v35  ;;  %2442 = vmatprep.mubr.f32.mxu1 %v2155_v36 }
 0x32e   : >> { %2699 = vmatprep.mubr.f32.mxu0 %v2027_v37 }
 0x330   : >> { %2443 = vmatmul.mubr.f32.gmra.mrb[48].mxu1 %v2154_v38 }
 0x331   : >> { %2700 = vmatmul.mubr.f32.gmra.mrb[48].mxu0 %v2026_v39  ;;  %2448 = vmatprep.mubr.f32.mxu1 %v2157_v40 }
 0x332   : >> { %2705 = vmatprep.mubr.f32.mxu0 %v2029_v41 }
 0x334   : >> { %2449 = vmatmul.mubr.f32.gmra.mrb[50].mxu1 %v2156_v42 }
 0x335   : >> { %2706 = vmatmul.mubr.f32.gmra.mrb[50].mxu0 %v2028_v43  ;;  %2454 = vmatprep.mubr.f32.mxu1 %v2159_v44  ;;  %v2955_v43 = vld [vmem:[%s5734_s16 + $0x20] sm:$0xff] }
 0x336   : >> { %2711 = vmatprep.mubr.f32.mxu0 %v2031_v45 }
 0x338   : >> { %2455 = vmatmul.mubr.f32.gmra.mrb[52].mxu1 %v2158_v47 }
 0x339   : >> { %2712 = vmatmul.mubr.f32.gmra.mrb[52].mxu0 %v2030_v48  ;;  %2460 = vmatprep.mubr.f32.mxu1 %v2161_v49  ;;  %v2956_v49 = vld [vmem:[%s5734_s16 + $0x28] sm:$0xff] }
 0x33a   : >> { %2717 = vmatprep.mubr.f32.mxu0 %v2033_v51 }
 0x33c   : >> { %2461 = vmatmul.mubr.f32.gmra.mrb[54].mxu1 %v2160_v52 }
 0x33d   : >> { %2718 = vmatmul.mubr.f32.gmra.mrb[54].mxu0 %v2032_v53  ;;  %2466 = vmatprep.mubr.f32.mxu1 %v2163_v54 }
 0x33e   : >> { %2723 = vmatprep.mubr.f32.mxu0 %v2035_v55 }
 0x340   : >> { %2467 = vmatmul.mubr.f32.gmra.mrb[56].mxu1 %v2162_v56 }
 0x341   : >> { %2724 = vmatmul.mubr.f32.gmra.mrb[56].mxu0 %v2034_v57  ;;  %2472 = vmatprep.mubr.f32.mxu1 %v2165_v58 }
 0x342   : >> { %2729 = vmatprep.mubr.f32.mxu0 %v2037_v59  ;;  %v2957_v59 = vld [vmem:[%s5734_s16 + $0x30] sm:$0xff] }
 0x344   : >> { %2473 = vmatmul.mubr.f32.gmra.mrb[58].mxu1 %v2164_v60 }
 0x345   : >> { %2730 = vmatmul.mubr.f32.gmra.mrb[58].mxu0 %v2036_v61  ;;  %2478 = vmatprep.mubr.f32.mxu1 %v2167_v62 }
 0x346   : >> { %2735 = vmatprep.mubr.f32.mxu0 %v2039_v63 }
 0x348   : >> { %2479 = vmatmul.mubr.f32.gmra.mrb[60].mxu1 %v2166_v1  ;;  %v2958_v1 = vld [vmem:[%s5734_s16 + $0x38] sm:$0xff] }
 0x349   : >> { %2736 = vmatmul.mubr.f32.gmra.mrb[60].mxu0 %v2038_v2  ;;  %2484 = vmatprep.mubr.f32.mxu1 %v2169_v3 }
 0x34a   : >> { %2741 = vmatprep.mubr.f32.mxu0 %v2041_v4 }
 0x34c   : >> { %2485 = vmatmul.mubr.f32.gmra.mrb[62].mxu1 %v2168_v5 }
 0x34d   : >> { %2742 = vmatmul.mubr.f32.gmra.mrb[62].mxu0 %v2040_v6 }
 0x3a3   : >> { %v2300_v7 = vpop.f32.mrb[0].mxu1 }
 0x3a4   : >> { %v2557_v9 = vpop.f32.mrb[0].mxu0  ;;  %v2302_v10 = vpop.f32.mrb[1].mxu1 }
 0x3a5   : >> { %v2558_v12 = vadd.f32 %v2557_v9, %v2300_v7  ;;  %v2559_v13 = vpop.f32.mrb[1].mxu0 }
 0x3a6   : >> { %v2560_v14 = vadd.f32 %v2559_v13, %v2302_v10 }
 0x3a7   : >> { %v2759_v15 = vadd.f32 %v5303_v8, %v2558_v12  ;;  %v2306_v16 = vpop.f32.mrb[2].mxu1  ;;  %v2959_v12 = vld [vmem:[%s5734_s16 + $0x40] sm:$0xff] }
 0x3a8   : >> { %v2760_v18 = vadd.f32 %v5307_v11, %v2560_v14  ;;  %v2563_v46 = vpop.f32.mrb[2].mxu0  ;;  %v2308_v19 = vpop.f32.mrb[3].mxu1 }
 0x3a9   : >> { %v2823_v20 = vmax.f32 %v2759_v15, 0.0  ;;  %v2564_v22 = vadd.f32 %v2563_v46, %v2306_v16  ;;  %v2565_v50 = vpop.f32.mrb[3].mxu0 }
 0x3aa   : >> { %v2824_v23 = vmax.f32 %v2760_v18, 0.0  ;;  %v2566_v24 = vadd.f32 %v2565_v50, %v2308_v19 }
 0x3ab   : >> { %2887 = vst [vmem:[%s5235_s2] sm:$0xff] %v2823_v20  ;;  %v3015_v25 = vadd.f32 %v2951_v17, %v2823_v20  ;;  %v2761_v26 = vadd.f32 %v5303_v8, %v2564_v22  ;;  %v2312_v27 = vpop.f32.mrb[4].mxu1  ;;  %v2960_v17 = vld [vmem:[%s5734_s16 + $0x48] sm:$0xff] }
 0x3ac   : >> { %2888 = vst [vmem:[%s5235_s2 + $0x8] sm:$0xff] %v2824_v23  ;;  %v3016_v28 = vadd.f32 %v2952_v21, %v2824_v23  ;;  %v2762_v30 = vadd.f32 %v5307_v11, %v2566_v24  ;;  %v2569_v31 = vpop.f32.mrb[4].mxu0  ;;  %v2314_v32 = vpop.f32.mrb[5].mxu1  ;;  %v2961_v24 = vld [vmem:[%s5734_s16 + $0x50] sm:$0xff] }
 0x3ad   : >> { %3079 = vst [vmem:[%s5734_s16] sm:$0xff] %v3015_v25  ;;  %v2825_v33 = vmax.f32 %v2761_v26, 0.0  ;;  %v2570_v35 = vadd.f32 %v2569_v31, %v2312_v27  ;;  %v2571_v36 = vpop.f32.mrb[5].mxu0 }
 0x3ae   : >> { %3080 = vst [vmem:[%s5734_s16 + $0x8] sm:$0xff] %v3016_v28  ;;  %v2826_v37 = vmax.f32 %v2762_v30, 0.0  ;;  %v2572_v38 = vadd.f32 %v2571_v36, %v2314_v32 }
 0x3af   : >> { %2889 = vst [vmem:[%s5235_s2 + $0x10] sm:$0xff] %v2825_v33  ;;  %v3017_v39 = vadd.f32 %v2953_v29, %v2825_v33  ;;  %v2763_v40 = vadd.f32 %v5303_v8, %v2570_v35  ;;  %v2318_v41 = vpop.f32.mrb[6].mxu1  ;;  %v2962_v29 = vld [vmem:[%s5734_s16 + $0x58] sm:$0xff] }
 0x3b0   : >> { %2890 = vst [vmem:[%s5235_s2 + $0x18] sm:$0xff] %v2826_v37  ;;  %v3018_v42 = vadd.f32 %v2954_v34, %v2826_v37  ;;  %v2764_v44 = vadd.f32 %v5307_v11, %v2572_v38  ;;  %v2575_v45 = vpop.f32.mrb[6].mxu0  ;;  %v2320_v47 = vpop.f32.mrb[7].mxu1  ;;  %v2963_v38 = vld [vmem:[%s5734_s16 + $0x60] sm:$0xff] }
 0x3b1   : >> { %3081 = vst [vmem:[%s5734_s16 + $0x10] sm:$0xff] %v3017_v39  ;;  %v2827_v48 = vmax.f32 %v2763_v40, 0.0  ;;  %v2576_v51 = vadd.f32 %v2575_v45, %v2318_v41  ;;  %v2577_v52 = vpop.f32.mrb[7].mxu0 }
 0x3b2   : >> { %3082 = vst [vmem:[%s5734_s16 + $0x18] sm:$0xff] %v3018_v42  ;;  %v2828_v53 = vmax.f32 %v2764_v44, 0.0  ;;  %v2578_v54 = vadd.f32 %v2577_v52, %v2320_v47 }
 0x3b3   : >> { %2891 = vst [vmem:[%s5235_s2 + $0x20] sm:$0xff] %v2827_v48  ;;  %v3019_v55 = vadd.f32 %v2955_v43, %v2827_v48  ;;  %v2765_v56 = vadd.f32 %v5303_v8, %v2576_v51  ;;  %v2324_v57 = vpop.f32.mrb[8].mxu1  ;;  %v2964_v43 = vld [vmem:[%s5734_s16 + $0x68] sm:$0xff] }
 0x3b4   : >> { %2892 = vst [vmem:[%s5235_s2 + $0x28] sm:$0xff] %v2828_v53  ;;  %v3020_v58 = vadd.f32 %v2956_v49, %v2828_v53  ;;  %v2766_v60 = vadd.f32 %v5307_v11, %v2578_v54  ;;  %v2581_v61 = vpop.f32.mrb[8].mxu0  ;;  %v2326_v62 = vpop.f32.mrb[9].mxu1  ;;  %v2965_v54 = vld [vmem:[%s5734_s16 + $0x70] sm:$0xff] }
 0x3b5   : >> { %3083 = vst [vmem:[%s5734_s16 + $0x20] sm:$0xff] %v3019_v55  ;;  %v2829_v63 = vmax.f32 %v2765_v56, 0.0  ;;  %v2582_v2 = vadd.f32 %v2581_v61, %v2324_v57  ;;  %v2583_v3 = vpop.f32.mrb[9].mxu0 }
 0x3b6   : >> { %3084 = vst [vmem:[%s5734_s16 + $0x28] sm:$0xff] %v3020_v58  ;;  %v2830_v4 = vmax.f32 %v2766_v60, 0.0  ;;  %v2584_v5 = vadd.f32 %v2583_v3, %v2326_v62 }
 0x3b7   : >> { %2893 = vst [vmem:[%s5235_s2 + $0x30] sm:$0xff] %v2829_v63  ;;  %v3021_v6 = vadd.f32 %v2957_v59, %v2829_v63  ;;  %v2767_v7 = vadd.f32 %v5303_v8, %v2582_v2  ;;  %v2330_v9 = vpop.f32.mrb[10].mxu1  ;;  %v2966_v59 = vld [vmem:[%s5734_s16 + $0x78] sm:$0xff] }
 0x3b8   : >> { %2894 = vst [vmem:[%s5235_s2 + $0x38] sm:$0xff] %v2830_v4  ;;  %v3022_v10 = vadd.f32 %v2958_v1, %v2830_v4  ;;  %v2768_v13 = vadd.f32 %v5307_v11, %v2584_v5  ;;  %v2587_v14 = vpop.f32.mrb[10].mxu0  ;;  %v2332_v15 = vpop.f32.mrb[11].mxu1  ;;  %v2967_v5 = vld [vmem:[%s5734_s16 + $0x80] sm:$0xff] }
 0x3b9   : >> { %3085 = vst [vmem:[%s5734_s16 + $0x30] sm:$0xff] %v3021_v6  ;;  %v2831_v16 = vmax.f32 %v2767_v7, 0.0  ;;  %v2588_v18 = vadd.f32 %v2587_v14, %v2330_v9  ;;  %v2589_v46 = vpop.f32.mrb[11].mxu0 }
 0x3ba   : >> { %3086 = vst [vmem:[%s5734_s16 + $0x38] sm:$0xff] %v3022_v10  ;;  %v2832_v19 = vmax.f32 %v2768_v13, 0.0  ;;  %v2590_v20 = vadd.f32 %v2589_v46, %v2332_v15 }
 0x3bb   : >> { %2895 = vst [vmem:[%s5235_s2 + $0x40] sm:$0xff] %v2831_v16  ;;  %v3023_v21 = vadd.f32 %v2959_v12, %v2831_v16  ;;  %v2769_v22 = vadd.f32 %v5303_v8, %v2588_v18  ;;  %v2336_v50 = vpop.f32.mrb[12].mxu1  ;;  %v2968_v12 = vld [vmem:[%s5734_s16 + $0x88] sm:$0xff] }
 0x3bc   : >> { %2896 = vst [vmem:[%s5235_s2 + $0x48] sm:$0xff] %v2832_v19  ;;  %v3024_v23 = vadd.f32 %v2960_v17, %v2832_v19  ;;  %v2770_v25 = vadd.f32 %v5307_v11, %v2590_v20  ;;  %v2593_v26 = vpop.f32.mrb[12].mxu0  ;;  %v2338_v27 = vpop.f32.mrb[13].mxu1  ;;  %v2969_v20 = vld [vmem:[%s5734_s16 + $0x90] sm:$0xff] }
 0x3bd   : >> { %3087 = vst [vmem:[%s5734_s16 + $0x40] sm:$0xff] %v3023_v21  ;;  %v2833_v28 = vmax.f32 %v2769_v22, 0.0  ;;  %v2594_v30 = vadd.f32 %v2593_v26, %v2336_v50  ;;  %v2595_v31 = vpop.f32.mrb[13].mxu0 }
 0x3be   : >> { %3088 = vst [vmem:[%s5734_s16 + $0x48] sm:$0xff] %v3024_v23  ;;  %v2834_v32 = vmax.f32 %v2770_v25, 0.0  ;;  %v2596_v33 = vadd.f32 %v2595_v31, %v2338_v27 }
 0x3bf   : >> { %2897 = vst [vmem:[%s5235_s2 + $0x50] sm:$0xff] %v2833_v28  ;;  %v3025_v34 = vadd.f32 %v2961_v24, %v2833_v28  ;;  %v2771_v35 = vadd.f32 %v5303_v8, %v2594_v30  ;;  %v2342_v36 = vpop.f32.mrb[14].mxu1  ;;  %v2970_v24 = vld [vmem:[%s5734_s16 + $0x98] sm:$0xff] }
 0x3c0   : >> { %2898 = vst [vmem:[%s5235_s2 + $0x58] sm:$0xff] %v2834_v32  ;;  %v3026_v37 = vadd.f32 %v2962_v29, %v2834_v32  ;;  %v2772_v39 = vadd.f32 %v5307_v11, %v2596_v33  ;;  %v2599_v40 = vpop.f32.mrb[14].mxu0  ;;  %v2344_v41 = vpop.f32.mrb[15].mxu1  ;;  %v2971_v33 = vld [vmem:[%s5734_s16 + $0xa0] sm:$0xff] }
 0x3c1   : >> { %3089 = vst [vmem:[%s5734_s16 + $0x50] sm:$0xff] %v3025_v34  ;;  %v2835_v42 = vmax.f32 %v2771_v35, 0.0  ;;  %v2600_v44 = vadd.f32 %v2599_v40, %v2342_v36  ;;  %v2601_v45 = vpop.f32.mrb[15].mxu0 }
 0x3c2   : >> { %3090 = vst [vmem:[%s5734_s16 + $0x58] sm:$0xff] %v3026_v37  ;;  %v2836_v47 = vmax.f32 %v2772_v39, 0.0  ;;  %v2602_v48 = vadd.f32 %v2601_v45, %v2344_v41 }
 0x3c3   : >> { %2899 = vst [vmem:[%s5235_s2 + $0x60] sm:$0xff] %v2835_v42  ;;  %v3027_v49 = vadd.f32 %v2963_v38, %v2835_v42  ;;  %v2773_v51 = vadd.f32 %v5303_v8, %v2600_v44  ;;  %v2348_v52 = vpop.f32.mrb[16].mxu1  ;;  %v2972_v38 = vld [vmem:[%s5734_s16 + $0xa8] sm:$0xff] }
 0x3c4   : >> { %2900 = vst [vmem:[%s5235_s2 + $0x68] sm:$0xff] %v2836_v47  ;;  %v3028_v53 = vadd.f32 %v2964_v43, %v2836_v47  ;;  %v2774_v55 = vadd.f32 %v5307_v11, %v2602_v48  ;;  %v2605_v56 = vpop.f32.mrb[16].mxu0  ;;  %v2350_v57 = vpop.f32.mrb[17].mxu1  ;;  %v2973_v48 = vld [vmem:[%s5734_s16 + $0xb0] sm:$0xff] }
 0x3c5   : >> { %3091 = vst [vmem:[%s5734_s16 + $0x60] sm:$0xff] %v3027_v49  ;;  %v2837_v58 = vmax.f32 %v2773_v51, 0.0  ;;  %v2606_v60 = vadd.f32 %v2605_v56, %v2348_v52  ;;  %v2607_v61 = vpop.f32.mrb[17].mxu0 }
 0x3c6   : >> { %3092 = vst [vmem:[%s5734_s16 + $0x68] sm:$0xff] %v3028_v53  ;;  %v2838_v62 = vmax.f32 %v2774_v55, 0.0  ;;  %v2608_v63 = vadd.f32 %v2607_v61, %v2350_v57 }
 0x3c7   : >> { %2901 = vst [vmem:[%s5235_s2 + $0x70] sm:$0xff] %v2837_v58  ;;  %v3029_v1 = vadd.f32 %v2965_v54, %v2837_v58  ;;  %v2775_v2 = vadd.f32 %v5303_v8, %v2606_v60  ;;  %v2354_v3 = vpop.f32.mrb[18].mxu1  ;;  %v2974_v54 = vld [vmem:[%s5734_s16 + $0xb8] sm:$0xff] }
 0x3c8   : >> { %2902 = vst [vmem:[%s5235_s2 + $0x78] sm:$0xff] %v2838_v62  ;;  %v3030_v4 = vadd.f32 %v2966_v59, %v2838_v62  ;;  %v2776_v6 = vadd.f32 %v5307_v11, %v2608_v63  ;;  %v2611_v7 = vpop.f32.mrb[18].mxu0  ;;  %v2356_v9 = vpop.f32.mrb[19].mxu1  ;;  %v2975_v63 = vld [vmem:[%s5734_s16 + $0xc0] sm:$0xff] }
 0x3c9   : >> { %3093 = vst [vmem:[%s5734_s16 + $0x70] sm:$0xff] %v3029_v1  ;;  %v2839_v10 = vmax.f32 %v2775_v2, 0.0  ;;  %v2612_v13 = vadd.f32 %v2611_v7, %v2354_v3  ;;  %v2613_v14 = vpop.f32.mrb[19].mxu0 }
 0x3ca   : >> { %3094 = vst [vmem:[%s5734_s16 + $0x78] sm:$0xff] %v3030_v4  ;;  %v2840_v15 = vmax.f32 %v2776_v6, 0.0  ;;  %v2614_v16 = vadd.f32 %v2613_v14, %v2356_v9 }
 0x3cb   : >> { %2903 = vst [vmem:[%s5235_s2 + $0x80] sm:$0xff] %v2839_v10  ;;  %v3031_v17 = vadd.f32 %v2967_v5, %v2839_v10  ;;  %v2777_v18 = vadd.f32 %v5303_v8, %v2612_v13  ;;  %v2360_v46 = vpop.f32.mrb[20].mxu1  ;;  %v2976_v5 = vld [vmem:[%s5734_s16 + $0xc8] sm:$0xff] }
 0x3cc   : >> { %2904 = vst [vmem:[%s5235_s2 + $0x88] sm:$0xff] %v2840_v15  ;;  %v3032_v19 = vadd.f32 %v2968_v12, %v2840_v15  ;;  %v2778_v21 = vadd.f32 %v5307_v11, %v2614_v16  ;;  %v2617_v22 = vpop.f32.mrb[20].mxu0  ;;  %v2362_v50 = vpop.f32.mrb[21].mxu1  ;;  %v2977_v16 = vld [vmem:[%s5734_s16 + $0xd0] sm:$0xff] }
 0x3cd   : >> { %3095 = vst [vmem:[%s5734_s16 + $0x80] sm:$0xff] %v3031_v17  ;;  %v2841_v23 = vmax.f32 %v2777_v18, 0.0  ;;  %v2618_v25 = vadd.f32 %v2617_v22, %v2360_v46  ;;  %v2619_v26 = vpop.f32.mrb[21].mxu0 }
 0x3ce   : >> { %3096 = vst [vmem:[%s5734_s16 + $0x88] sm:$0xff] %v3032_v19  ;;  %v2842_v27 = vmax.f32 %v2778_v21, 0.0  ;;  %v2620_v28 = vadd.f32 %v2619_v26, %v2362_v50 }
 0x3cf   : >> { %2905 = vst [vmem:[%s5235_s2 + $0x90] sm:$0xff] %v2841_v23  ;;  %v3033_v29 = vadd.f32 %v2969_v20, %v2841_v23  ;;  %v2779_v30 = vadd.f32 %v5303_v8, %v2618_v25  ;;  %v2366_v31 = vpop.f32.mrb[22].mxu1  ;;  %v2978_v20 = vld [vmem:[%s5734_s16 + $0xd8] sm:$0xff] }
 0x3d0   : >> { %2906 = vst [vmem:[%s5235_s2 + $0x98] sm:$0xff] %v2842_v27  ;;  %v3034_v32 = vadd.f32 %v2970_v24, %v2842_v27  ;;  %v2780_v34 = vadd.f32 %v5307_v11, %v2620_v28  ;;  %v2623_v35 = vpop.f32.mrb[22].mxu0  ;;  %v2368_v36 = vpop.f32.mrb[23].mxu1  ;;  %v2979_v28 = vld [vmem:[%s5734_s16 + $0xe0] sm:$0xff] }
 0x3d1   : >> { %3097 = vst [vmem:[%s5734_s16 + $0x90] sm:$0xff] %v3033_v29  ;;  %v2843_v37 = vmax.f32 %v2779_v30, 0.0  ;;  %v2624_v39 = vadd.f32 %v2623_v35, %v2366_v31  ;;  %v2625_v40 = vpop.f32.mrb[23].mxu0 }
 0x3d2   : >> { %3098 = vst [vmem:[%s5734_s16 + $0x98] sm:$0xff] %v3034_v32  ;;  %v2844_v41 = vmax.f32 %v2780_v34, 0.0  ;;  %v2626_v42 = vadd.f32 %v2625_v40, %v2368_v36 }
 0x3d3   : >> { %2907 = vst [vmem:[%s5235_s2 + $0xa0] sm:$0xff] %v2843_v37  ;;  %v3035_v43 = vadd.f32 %v2971_v33, %v2843_v37  ;;  %v2781_v44 = vadd.f32 %v5303_v8, %v2624_v39  ;;  %v2372_v45 = vpop.f32.mrb[24].mxu1  ;;  %v2980_v33 = vld [vmem:[%s5734_s16 + $0xe8] sm:$0xff] }
 0x3d4   : >> { %2908 = vst [vmem:[%s5235_s2 + $0xa8] sm:$0xff] %v2844_v41  ;;  %v3036_v47 = vadd.f32 %v2972_v38, %v2844_v41  ;;  %v2782_v49 = vadd.f32 %v5307_v11, %v2626_v42  ;;  %v2629_v51 = vpop.f32.mrb[24].mxu0  ;;  %v2374_v52 = vpop.f32.mrb[25].mxu1  ;;  %v2981_v42 = vld [vmem:[%s5734_s16 + $0xf0] sm:$0xff] }
 0x3d5   : >> { %3099 = vst [vmem:[%s5734_s16 + $0xa0] sm:$0xff] %v3035_v43  ;;  %v2845_v53 = vmax.f32 %v2781_v44, 0.0  ;;  %v2630_v55 = vadd.f32 %v2629_v51, %v2372_v45  ;;  %v2631_v56 = vpop.f32.mrb[25].mxu0 }
 0x3d6   : >> { %3100 = vst [vmem:[%s5734_s16 + $0xa8] sm:$0xff] %v3036_v47  ;;  %v2846_v57 = vmax.f32 %v2782_v49, 0.0  ;;  %v2632_v58 = vadd.f32 %v2631_v56, %v2374_v52 }
 0x3d7   : >> { %2909 = vst [vmem:[%s5235_s2 + $0xb0] sm:$0xff] %v2845_v53  ;;  %v3037_v59 = vadd.f32 %v2973_v48, %v2845_v53  ;;  %v2783_v60 = vadd.f32 %v5303_v8, %v2630_v55  ;;  %v2378_v61 = vpop.f32.mrb[26].mxu1  ;;  %v2982_v48 = vld [vmem:[%s5734_s16 + $0xf8] sm:$0xff] }
 0x3d8   : >> { %2910 = vst [vmem:[%s5235_s2 + $0xb8] sm:$0xff] %v2846_v57  ;;  %v3038_v62 = vadd.f32 %v2974_v54, %v2846_v57  ;;  %v2784_v1 = vadd.f32 %v5307_v11, %v2632_v58  ;;  %v2635_v2 = vpop.f32.mrb[26].mxu0  ;;  %v2380_v3 = vpop.f32.mrb[27].mxu1  ;;  %v2983_v58 = vld [vmem:[%s5734_s16 + $0x100] sm:$0xff] }
 0x3d9   : >> { %3101 = vst [vmem:[%s5734_s16 + $0xb0] sm:$0xff] %v3037_v59  ;;  %v2847_v4 = vmax.f32 %v2783_v60, 0.0  ;;  %v2636_v6 = vadd.f32 %v2635_v2, %v2378_v61  ;;  %v2637_v7 = vpop.f32.mrb[27].mxu0 }
 0x3da   : >> { %3102 = vst [vmem:[%s5734_s16 + $0xb8] sm:$0xff] %v3038_v62  ;;  %v2848_v9 = vmax.f32 %v2784_v1, 0.0  ;;  %v2638_v10 = vadd.f32 %v2637_v7, %v2380_v3 }
 0x3db   : >> { %2911 = vst [vmem:[%s5235_s2 + $0xc0] sm:$0xff] %v2847_v4  ;;  %v3039_v12 = vadd.f32 %v2975_v63, %v2847_v4  ;;  %v2785_v13 = vadd.f32 %v5303_v8, %v2636_v6  ;;  %v2384_v14 = vpop.f32.mrb[28].mxu1  ;;  %v2984_v63 = vld [vmem:[%s5734_s16 + $0x108] sm:$0xff] }
 0x3dc   : >> { %2912 = vst [vmem:[%s5235_s2 + $0xc8] sm:$0xff] %v2848_v9  ;;  %v3040_v15 = vadd.f32 %v2976_v5, %v2848_v9  ;;  %v2786_v17 = vadd.f32 %v5307_v11, %v2638_v10  ;;  %v2641_v18 = vpop.f32.mrb[28].mxu0  ;;  %v2386_v46 = vpop.f32.mrb[29].mxu1  ;;  %v2985_v10 = vld [vmem:[%s5734_s16 + $0x110] sm:$0xff] }
 0x3dd   : >> { %3103 = vst [vmem:[%s5734_s16 + $0xc0] sm:$0xff] %v3039_v12  ;;  %v2849_v19 = vmax.f32 %v2785_v13, 0.0  ;;  %v2642_v21 = vadd.f32 %v2641_v18, %v2384_v14  ;;  %v2643_v22 = vpop.f32.mrb[29].mxu0 }
 0x3de   : >> { %3104 = vst [vmem:[%s5734_s16 + $0xc8] sm:$0xff] %v3040_v15  ;;  %v2850_v50 = vmax.f32 %v2786_v17, 0.0  ;;  %v2644_v23 = vadd.f32 %v2643_v22, %v2386_v46 }
 0x3df   : >> { %2913 = vst [vmem:[%s5235_s2 + $0xd0] sm:$0xff] %v2849_v19  ;;  %v3041_v24 = vadd.f32 %v2977_v16, %v2849_v19  ;;  %v2787_v25 = vadd.f32 %v5303_v8, %v2642_v21  ;;  %v2390_v26 = vpop.f32.mrb[30].mxu1  ;;  %v2986_v16 = vld [vmem:[%s5734_s16 + $0x118] sm:$0xff] }
 0x3e0   : >> { %2914 = vst [vmem:[%s5235_s2 + $0xd8] sm:$0xff] %v2850_v50  ;;  %v3042_v27 = vadd.f32 %v2978_v20, %v2850_v50  ;;  %v2788_v29 = vadd.f32 %v5307_v11, %v2644_v23  ;;  %v2647_v30 = vpop.f32.mrb[30].mxu0  ;;  %v2392_v31 = vpop.f32.mrb[31].mxu1  ;;  %v2987_v23 = vld [vmem:[%s5734_s16 + $0x120] sm:$0xff] }
 0x3e1   : >> { %3105 = vst [vmem:[%s5734_s16 + $0xd0] sm:$0xff] %v3041_v24  ;;  %v2851_v32 = vmax.f32 %v2787_v25, 0.0  ;;  %v2648_v34 = vadd.f32 %v2647_v30, %v2390_v26  ;;  %v2649_v35 = vpop.f32.mrb[31].mxu0 }
 0x3e2   : >> { %3106 = vst [vmem:[%s5734_s16 + $0xd8] sm:$0xff] %v3042_v27  ;;  %v2852_v36 = vmax.f32 %v2788_v29, 0.0  ;;  %v2650_v37 = vadd.f32 %v2649_v35, %v2392_v31 }
 0x3e3   : >> { %2915 = vst [vmem:[%s5235_s2 + $0xe0] sm:$0xff] %v2851_v32  ;;  %v3043_v38 = vadd.f32 %v2979_v28, %v2851_v32  ;;  %v2789_v39 = vadd.f32 %v5303_v8, %v2648_v34  ;;  %v2396_v40 = vpop.f32.mrb[32].mxu1  ;;  %v2988_v28 = vld [vmem:[%s5734_s16 + $0x128] sm:$0xff] }
 0x3e4   : >> { %2916 = vst [vmem:[%s5235_s2 + $0xe8] sm:$0xff] %v2852_v36  ;;  %v3044_v41 = vadd.f32 %v2980_v33, %v2852_v36  ;;  %v2790_v43 = vadd.f32 %v5307_v11, %v2650_v37  ;;  %v2653_v44 = vpop.f32.mrb[32].mxu0  ;;  %v2398_v45 = vpop.f32.mrb[33].mxu1  ;;  %v2989_v37 = vld [vmem:[%s5734_s16 + $0x130] sm:$0xff] }
 0x3e5   : >> { %3107 = vst [vmem:[%s5734_s16 + $0xe0] sm:$0xff] %v3043_v38  ;;  %v2853_v47 = vmax.f32 %v2789_v39, 0.0  ;;  %v2654_v49 = vadd.f32 %v2653_v44, %v2396_v40  ;;  %v2655_v51 = vpop.f32.mrb[33].mxu0 }
 0x3e6   : >> { %3108 = vst [vmem:[%s5734_s16 + $0xe8] sm:$0xff] %v3044_v41  ;;  %v2854_v52 = vmax.f32 %v2790_v43, 0.0  ;;  %v2656_v53 = vadd.f32 %v2655_v51, %v2398_v45 }
 0x3e7   : >> { %2917 = vst [vmem:[%s5235_s2 + $0xf0] sm:$0xff] %v2853_v47  ;;  %v3045_v54 = vadd.f32 %v2981_v42, %v2853_v47  ;;  %v2791_v55 = vadd.f32 %v5303_v8, %v2654_v49  ;;  %v2402_v56 = vpop.f32.mrb[34].mxu1  ;;  %v2990_v42 = vld [vmem:[%s5734_s16 + $0x138] sm:$0xff] }
 0x3e8   : >> { %2918 = vst [vmem:[%s5235_s2 + $0xf8] sm:$0xff] %v2854_v52  ;;  %v3046_v57 = vadd.f32 %v2982_v48, %v2854_v52  ;;  %v2792_v59 = vadd.f32 %v5307_v11, %v2656_v53  ;;  %v2659_v60 = vpop.f32.mrb[34].mxu0  ;;  %v2404_v61 = vpop.f32.mrb[35].mxu1  ;;  %v2991_v53 = vld [vmem:[%s5734_s16 + $0x140] sm:$0xff] }
 0x3e9   : >> { %3109 = vst [vmem:[%s5734_s16 + $0xf0] sm:$0xff] %v3045_v54  ;;  %v2855_v62 = vmax.f32 %v2791_v55, 0.0  ;;  %v2660_v1 = vadd.f32 %v2659_v60, %v2402_v56  ;;  %v2661_v2 = vpop.f32.mrb[35].mxu0 }
 0x3ea   : >> { %3110 = vst [vmem:[%s5734_s16 + $0xf8] sm:$0xff] %v3046_v57  ;;  %v2856_v3 = vmax.f32 %v2792_v59, 0.0  ;;  %v2662_v4 = vadd.f32 %v2661_v2, %v2404_v61 }
 0x3eb   : >> { %2919 = vst [vmem:[%s5235_s2 + $0x100] sm:$0xff] %v2855_v62  ;;  %v3047_v5 = vadd.f32 %v2983_v58, %v2855_v62  ;;  %v2793_v6 = vadd.f32 %v5303_v8, %v2660_v1  ;;  %v2408_v7 = vpop.f32.mrb[36].mxu1  ;;  %v2992_v58 = vld [vmem:[%s5734_s16 + $0x148] sm:$0xff] }
 0x3ec   : >> { %2920 = vst [vmem:[%s5235_s2 + $0x108] sm:$0xff] %v2856_v3  ;;  %v3048_v9 = vadd.f32 %v2984_v63, %v2856_v3  ;;  %v2794_v12 = vadd.f32 %v5307_v11, %v2662_v4  ;;  %v2665_v13 = vpop.f32.mrb[36].mxu0  ;;  %v2410_v14 = vpop.f32.mrb[37].mxu1  ;;  %v2993_v4 = vld [vmem:[%s5734_s16 + $0x150] sm:$0xff] }
 0x3ed   : >> { %3111 = vst [vmem:[%s5734_s16 + $0x100] sm:$0xff] %v3047_v5  ;;  %v2857_v15 = vmax.f32 %v2793_v6, 0.0  ;;  %v2666_v17 = vadd.f32 %v2665_v13, %v2408_v7  ;;  %v2667_v18 = vpop.f32.mrb[37].mxu0 }
 0x3ee   : >> { %3112 = vst [vmem:[%s5734_s16 + $0x108] sm:$0xff] %v3048_v9  ;;  %v2858_v46 = vmax.f32 %v2794_v12, 0.0  ;;  %v2668_v19 = vadd.f32 %v2667_v18, %v2410_v14 }
 0x3ef   : >> { %2921 = vst [vmem:[%s5235_s2 + $0x110] sm:$0xff] %v2857_v15  ;;  %v3049_v20 = vadd.f32 %v2985_v10, %v2857_v15  ;;  %v2795_v21 = vadd.f32 %v5303_v8, %v2666_v17  ;;  %v2414_v22 = vpop.f32.mrb[38].mxu1  ;;  %v2994_v10 = vld [vmem:[%s5734_s16 + $0x158] sm:$0xff] }
 0x3f0   : >> { %2922 = vst [vmem:[%s5235_s2 + $0x118] sm:$0xff] %v2858_v46  ;;  %v3050_v50 = vadd.f32 %v2986_v16, %v2858_v46  ;;  %v2796_v24 = vadd.f32 %v5307_v11, %v2668_v19  ;;  %v2671_v25 = vpop.f32.mrb[38].mxu0  ;;  %v2416_v26 = vpop.f32.mrb[39].mxu1  ;;  %v2995_v19 = vld [vmem:[%s5734_s16 + $0x160] sm:$0xff] }
 0x3f1   : >> { %3113 = vst [vmem:[%s5734_s16 + $0x110] sm:$0xff] %v3049_v20  ;;  %v2859_v27 = vmax.f32 %v2795_v21, 0.0  ;;  %v2672_v29 = vadd.f32 %v2671_v25, %v2414_v22  ;;  %v2673_v30 = vpop.f32.mrb[39].mxu0 }
 0x3f2   : >> { %3114 = vst [vmem:[%s5734_s16 + $0x118] sm:$0xff] %v3050_v50  ;;  %v2860_v31 = vmax.f32 %v2796_v24, 0.0  ;;  %v2674_v32 = vadd.f32 %v2673_v30, %v2416_v26 }
 0x3f3   : >> { %2923 = vst [vmem:[%s5235_s2 + $0x120] sm:$0xff] %v2859_v27  ;;  %v3051_v33 = vadd.f32 %v2987_v23, %v2859_v27  ;;  %v2797_v34 = vadd.f32 %v5303_v8, %v2672_v29  ;;  %v2420_v35 = vpop.f32.mrb[40].mxu1  ;;  %v2996_v23 = vld [vmem:[%s5734_s16 + $0x168] sm:$0xff] }
 0x3f4   : >> { %2924 = vst [vmem:[%s5235_s2 + $0x128] sm:$0xff] %v2860_v31  ;;  %v3052_v36 = vadd.f32 %v2988_v28, %v2860_v31  ;;  %v2798_v38 = vadd.f32 %v5307_v11, %v2674_v32  ;;  %v2677_v39 = vpop.f32.mrb[40].mxu0  ;;  %v2422_v40 = vpop.f32.mrb[41].mxu1  ;;  %v2997_v32 = vld [vmem:[%s5734_s16 + $0x170] sm:$0xff] }
 0x3f5   : >> { %3115 = vst [vmem:[%s5734_s16 + $0x120] sm:$0xff] %v3051_v33  ;;  %v2861_v41 = vmax.f32 %v2797_v34, 0.0  ;;  %v2678_v43 = vadd.f32 %v2677_v39, %v2420_v35  ;;  %v2679_v44 = vpop.f32.mrb[41].mxu0 }
 0x3f6   : >> { %3116 = vst [vmem:[%s5734_s16 + $0x128] sm:$0xff] %v3052_v36  ;;  %v2862_v45 = vmax.f32 %v2798_v38, 0.0  ;;  %v2680_v47 = vadd.f32 %v2679_v44, %v2422_v40 }
 0x3f7   : >> { %2925 = vst [vmem:[%s5235_s2 + $0x130] sm:$0xff] %v2861_v41  ;;  %v3053_v48 = vadd.f32 %v2989_v37, %v2861_v41  ;;  %v2799_v49 = vadd.f32 %v5303_v8, %v2678_v43  ;;  %v2426_v51 = vpop.f32.mrb[42].mxu1  ;;  %v2998_v37 = vld [vmem:[%s5734_s16 + $0x178] sm:$0xff] }
 0x3f8   : >> { %2926 = vst [vmem:[%s5235_s2 + $0x138] sm:$0xff] %v2862_v45  ;;  %v3054_v52 = vadd.f32 %v2990_v42, %v2862_v45  ;;  %v2800_v54 = vadd.f32 %v5307_v11, %v2680_v47  ;;  %v2683_v55 = vpop.f32.mrb[42].mxu0  ;;  %v2428_v56 = vpop.f32.mrb[43].mxu1  ;;  %v2999_v47 = vld [vmem:[%s5734_s16 + $0x180] sm:$0xff] }
 0x3f9   : >> { %3117 = vst [vmem:[%s5734_s16 + $0x130] sm:$0xff] %v3053_v48  ;;  %v2863_v57 = vmax.f32 %v2799_v49, 0.0  ;;  %v2684_v59 = vadd.f32 %v2683_v55, %v2426_v51  ;;  %v2685_v60 = vpop.f32.mrb[43].mxu0 }
 0x3fa   : >> { %3118 = vst [vmem:[%s5734_s16 + $0x138] sm:$0xff] %v3054_v52  ;;  %v2864_v61 = vmax.f32 %v2800_v54, 0.0  ;;  %v2686_v62 = vadd.f32 %v2685_v60, %v2428_v56 }
 0x3fb   : >> { %2927 = vst [vmem:[%s5235_s2 + $0x140] sm:$0xff] %v2863_v57  ;;  %v3055_v63 = vadd.f32 %v2991_v53, %v2863_v57  ;;  %v2801_v1 = vadd.f32 %v5303_v8, %v2684_v59  ;;  %v2432_v2 = vpop.f32.mrb[44].mxu1  ;;  %v3000_v53 = vld [vmem:[%s5734_s16 + $0x188] sm:$0xff] }
 0x3fc   : >> { %2928 = vst [vmem:[%s5235_s2 + $0x148] sm:$0xff] %v2864_v61  ;;  %v3056_v3 = vadd.f32 %v2992_v58, %v2864_v61  ;;  %v2802_v5 = vadd.f32 %v5307_v11, %v2686_v62  ;;  %v2689_v6 = vpop.f32.mrb[44].mxu0  ;;  %v2434_v7 = vpop.f32.mrb[45].mxu1  ;;  %v3001_v62 = vld [vmem:[%s5734_s16 + $0x190] sm:$0xff] }
 0x3fd   : >> { %3119 = vst [vmem:[%s5734_s16 + $0x140] sm:$0xff] %v3055_v63  ;;  %v2865_v9 = vmax.f32 %v2801_v1, 0.0  ;;  %v2690_v12 = vadd.f32 %v2689_v6, %v2432_v2  ;;  %v2691_v13 = vpop.f32.mrb[45].mxu0 }
 0x3fe   : >> { %3120 = vst [vmem:[%s5734_s16 + $0x148] sm:$0xff] %v3056_v3  ;;  %v2866_v14 = vmax.f32 %v2802_v5, 0.0  ;;  %v2692_v15 = vadd.f32 %v2691_v13, %v2434_v7 }
 0x3ff   : >> { %2929 = vst [vmem:[%s5235_s2 + $0x150] sm:$0xff] %v2865_v9  ;;  %v3057_v16 = vadd.f32 %v2993_v4, %v2865_v9  ;;  %v2803_v17 = vadd.f32 %v5303_v8, %v2690_v12  ;;  %v2438_v18 = vpop.f32.mrb[46].mxu1  ;;  %v3002_v4 = vld [vmem:[%s5734_s16 + $0x198] sm:$0xff] }
 0x400   : >> { %2930 = vst [vmem:[%s5235_s2 + $0x158] sm:$0xff] %v2866_v14  ;;  %v3058_v46 = vadd.f32 %v2994_v10, %v2866_v14  ;;  %v2804_v20 = vadd.f32 %v5307_v11, %v2692_v15  ;;  %v2695_v21 = vpop.f32.mrb[46].mxu0  ;;  %v2440_v22 = vpop.f32.mrb[47].mxu1  ;;  %v3003_v15 = vld [vmem:[%s5734_s16 + $0x1a0] sm:$0xff] }
 0x401   : >> { %3121 = vst [vmem:[%s5734_s16 + $0x150] sm:$0xff] %v3057_v16  ;;  %v2867_v50 = vmax.f32 %v2803_v17, 0.0  ;;  %v2696_v24 = vadd.f32 %v2695_v21, %v2438_v18  ;;  %v2697_v25 = vpop.f32.mrb[47].mxu0 }
 0x402   : >> { %3122 = vst [vmem:[%s5734_s16 + $0x158] sm:$0xff] %v3058_v46  ;;  %v2868_v26 = vmax.f32 %v2804_v20, 0.0  ;;  %v2698_v27 = vadd.f32 %v2697_v25, %v2440_v22 }
 0x403   : >> { %2931 = vst [vmem:[%s5235_s2 + $0x160] sm:$0xff] %v2867_v50  ;;  %v3059_v28 = vadd.f32 %v2995_v19, %v2867_v50  ;;  %v2805_v29 = vadd.f32 %v5303_v8, %v2696_v24  ;;  %v2444_v30 = vpop.f32.mrb[48].mxu1  ;;  %v3004_v19 = vld [vmem:[%s5734_s16 + $0x1a8] sm:$0xff] }
 0x404   : >> { %2932 = vst [vmem:[%s5235_s2 + $0x168] sm:$0xff] %v2868_v26  ;;  %v3060_v31 = vadd.f32 %v2996_v23, %v2868_v26  ;;  %v2806_v33 = vadd.f32 %v5307_v11, %v2698_v27  ;;  %v2701_v34 = vpop.f32.mrb[48].mxu0  ;;  %v2446_v35 = vpop.f32.mrb[49].mxu1  ;;  %v3005_v27 = vld [vmem:[%s5734_s16 + $0x1b0] sm:$0xff] }
 0x405   : >> { %3123 = vst [vmem:[%s5734_s16 + $0x160] sm:$0xff] %v3059_v28  ;;  %v2869_v36 = vmax.f32 %v2805_v29, 0.0  ;;  %v2702_v38 = vadd.f32 %v2701_v34, %v2444_v30  ;;  %v2703_v39 = vpop.f32.mrb[49].mxu0 }
 0x406   : >> { %3124 = vst [vmem:[%s5734_s16 + $0x168] sm:$0xff] %v3060_v31  ;;  %v2870_v40 = vmax.f32 %v2806_v33, 0.0  ;;  %v2704_v41 = vadd.f32 %v2703_v39, %v2446_v35 }
 0x407   : >> { %2933 = vst [vmem:[%s5235_s2 + $0x170] sm:$0xff] %v2869_v36  ;;  %v3061_v42 = vadd.f32 %v2997_v32, %v2869_v36  ;;  %v2807_v43 = vadd.f32 %v5303_v8, %v2702_v38  ;;  %v2450_v44 = vpop.f32.mrb[50].mxu1  ;;  %v3006_v32 = vld [vmem:[%s5734_s16 + $0x1b8] sm:$0xff] }
 0x408   : >> { %2934 = vst [vmem:[%s5235_s2 + $0x178] sm:$0xff] %v2870_v40  ;;  %v3062_v45 = vadd.f32 %v2998_v37, %v2870_v40  ;;  %v2808_v48 = vadd.f32 %v5307_v11, %v2704_v41  ;;  %v2707_v49 = vpop.f32.mrb[50].mxu0  ;;  %v2452_v51 = vpop.f32.mrb[51].mxu1  ;;  %v3007_v41 = vld [vmem:[%s5734_s16 + $0x1c0] sm:$0xff] }
 0x409   : >> { %3125 = vst [vmem:[%s5734_s16 + $0x170] sm:$0xff] %v3061_v42  ;;  %v2871_v52 = vmax.f32 %v2807_v43, 0.0  ;;  %v2708_v54 = vadd.f32 %v2707_v49, %v2450_v44  ;;  %v2709_v55 = vpop.f32.mrb[51].mxu0 }
 0x40a   : >> { %3126 = vst [vmem:[%s5734_s16 + $0x178] sm:$0xff] %v3062_v45  ;;  %v2872_v56 = vmax.f32 %v2808_v48, 0.0  ;;  %v2710_v57 = vadd.f32 %v2709_v55, %v2452_v51 }
 0x40b   : >> { %2935 = vst [vmem:[%s5235_s2 + $0x180] sm:$0xff] %v2871_v52  ;;  %v3063_v58 = vadd.f32 %v2999_v47, %v2871_v52  ;;  %v2809_v59 = vadd.f32 %v5303_v8, %v2708_v54  ;;  %v2456_v60 = vpop.f32.mrb[52].mxu1  ;;  %v3008_v47 = vld [vmem:[%s5734_s16 + $0x1c8] sm:$0xff] }
 0x40c   : >> { %2936 = vst [vmem:[%s5235_s2 + $0x188] sm:$0xff] %v2872_v56  ;;  %v3064_v61 = vadd.f32 %v3000_v53, %v2872_v56  ;;  %v2810_v63 = vadd.f32 %v5307_v11, %v2710_v57  ;;  %v2713_v1 = vpop.f32.mrb[52].mxu0  ;;  %v2458_v2 = vpop.f32.mrb[53].mxu1  ;;  %v3009_v57 = vld [vmem:[%s5734_s16 + $0x1d0] sm:$0xff] }
 0x40d   : >> { %3127 = vst [vmem:[%s5734_s16 + $0x180] sm:$0xff] %v3063_v58  ;;  %v2873_v3 = vmax.f32 %v2809_v59, 0.0  ;;  %v2714_v5 = vadd.f32 %v2713_v1, %v2456_v60  ;;  %v2715_v6 = vpop.f32.mrb[53].mxu0 }
 0x40e   : >> { %3128 = vst [vmem:[%s5734_s16 + $0x188] sm:$0xff] %v3064_v61  ;;  %v2874_v7 = vmax.f32 %v2810_v63, 0.0  ;;  %v2716_v9 = vadd.f32 %v2715_v6, %v2458_v2 }
 0x40f   : >> { %2937 = vst [vmem:[%s5235_s2 + $0x190] sm:$0xff] %v2873_v3  ;;  %v3065_v10 = vadd.f32 %v3001_v62, %v2873_v3  ;;  %v2811_v12 = vadd.f32 %v5303_v8, %v2714_v5  ;;  %v2462_v13 = vpop.f32.mrb[54].mxu1  ;;  %v3010_v62 = vld [vmem:[%s5734_s16 + $0x1d8] sm:$0xff] }
 0x410   : >> { %2938 = vst [vmem:[%s5235_s2 + $0x198] sm:$0xff] %v2874_v7  ;;  %v3066_v14 = vadd.f32 %v3002_v4, %v2874_v7  ;;  %v2812_v16 = vadd.f32 %v5307_v11, %v2716_v9  ;;  %v2719_v17 = vpop.f32.mrb[54].mxu0  ;;  %v2464_v18 = vpop.f32.mrb[55].mxu1  ;;  %v3011_v9 = vld [vmem:[%s5734_s16 + $0x1e0] sm:$0xff] }
 0x411   : >> { %3129 = vst [vmem:[%s5734_s16 + $0x190] sm:$0xff] %v3065_v10  ;;  %v2875_v46 = vmax.f32 %v2811_v12, 0.0  ;;  %v2720_v20 = vadd.f32 %v2719_v17, %v2462_v13  ;;  %v2721_v21 = vpop.f32.mrb[55].mxu0 }
 0x412   : >> { %3130 = vst [vmem:[%s5734_s16 + $0x198] sm:$0xff] %v3066_v14  ;;  %v2876_v22 = vmax.f32 %v2812_v16, 0.0  ;;  %v2722_v50 = vadd.f32 %v2721_v21, %v2464_v18 }
 0x413   : >> { %2939 = vst [vmem:[%s5235_s2 + $0x1a0] sm:$0xff] %v2875_v46  ;;  %v3067_v23 = vadd.f32 %v3003_v15, %v2875_v46  ;;  %v2813_v24 = vadd.f32 %v5303_v8, %v2720_v20  ;;  %v2468_v25 = vpop.f32.mrb[56].mxu1  ;;  %v3012_v15 = vld [vmem:[%s5734_s16 + $0x1e8] sm:$0xff] }
 0x414   : >> { %2940 = vst [vmem:[%s5235_s2 + $0x1a8] sm:$0xff] %v2876_v22  ;;  %v3068_v26 = vadd.f32 %v3004_v19, %v2876_v22  ;;  %v2814_v28 = vadd.f32 %v5307_v11, %v2722_v50  ;;  %v2725_v29 = vpop.f32.mrb[56].mxu0  ;;  %v2470_v30 = vpop.f32.mrb[57].mxu1  ;;  %v3013_v22 = vld [vmem:[%s5734_s16 + $0x1f0] sm:$0xff] }
 0x415   : >> { %3131 = vst [vmem:[%s5734_s16 + $0x1a0] sm:$0xff] %v3067_v23  ;;  %v2877_v31 = vmax.f32 %v2813_v24, 0.0  ;;  %v2726_v33 = vadd.f32 %v2725_v29, %v2468_v25  ;;  %v2727_v34 = vpop.f32.mrb[57].mxu0  ;;  %v3014_v24 = vld [vmem:[%s5734_s16 + $0x1f8] sm:$0xff] }
 0x416   : >> { %3132 = vst [vmem:[%s5734_s16 + $0x1a8] sm:$0xff] %v3068_v26  ;;  %v2878_v35 = vmax.f32 %v2814_v28, 0.0  ;;  %v2728_v36 = vadd.f32 %v2727_v34, %v2470_v30 }
 0x417   : >> { %2941 = vst [vmem:[%s5235_s2 + $0x1b0] sm:$0xff] %v2877_v31  ;;  %v3069_v37 = vadd.f32 %v3005_v27, %v2877_v31  ;;  %v2815_v38 = vadd.f32 %v5303_v8, %v2726_v33  ;;  %v2474_v39 = vpop.f32.mrb[58].mxu1 }
 0x418   : >> { %2942 = vst [vmem:[%s5235_s2 + $0x1b8] sm:$0xff] %v2878_v35  ;;  %v3070_v40 = vadd.f32 %v3006_v32, %v2878_v35  ;;  %v2816_v42 = vadd.f32 %v5307_v11, %v2728_v36  ;;  %v2731_v43 = vpop.f32.mrb[58].mxu0  ;;  %v2476_v44 = vpop.f32.mrb[59].mxu1 }
 0x419   : >> { %3133 = vst [vmem:[%s5734_s16 + $0x1b0] sm:$0xff] %v3069_v37  ;;  %v2879_v45 = vmax.f32 %v2815_v38, 0.0  ;;  %v2732_v48 = vadd.f32 %v2731_v43, %v2474_v39  ;;  %v2733_v49 = vpop.f32.mrb[59].mxu0 }
 0x41a   : >> { %3134 = vst [vmem:[%s5734_s16 + $0x1b8] sm:$0xff] %v3070_v40  ;;  %v2880_v51 = vmax.f32 %v2816_v42, 0.0  ;;  %v2734_v52 = vadd.f32 %v2733_v49, %v2476_v44 }
 0x41b   : >> { %2943 = vst [vmem:[%s5235_s2 + $0x1c0] sm:$0xff] %v2879_v45  ;;  %v3071_v53 = vadd.f32 %v3007_v41, %v2879_v45  ;;  %v2817_v54 = vadd.f32 %v5303_v8, %v2732_v48  ;;  %v2480_v55 = vpop.f32.mrb[60].mxu1 }
 0x41c   : >> { %2944 = vst [vmem:[%s5235_s2 + $0x1c8] sm:$0xff] %v2880_v51  ;;  %v3072_v56 = vadd.f32 %v3008_v47, %v2880_v51  ;;  %v2818_v58 = vadd.f32 %v5307_v11, %v2734_v52  ;;  %v2737_v59 = vpop.f32.mrb[60].mxu0  ;;  %v2482_v60 = vpop.f32.mrb[61].mxu1 }
 0x41d   : >> { %3135 = vst [vmem:[%s5734_s16 + $0x1c0] sm:$0xff] %v3071_v53  ;;  %v2881_v61 = vmax.f32 %v2817_v54, 0.0  ;;  %v2738_v63 = vadd.f32 %v2737_v59, %v2480_v55  ;;  %v2739_v1 = vpop.f32.mrb[61].mxu0 }
 0x41e   : >> { %3136 = vst [vmem:[%s5734_s16 + $0x1c8] sm:$0xff] %v3072_v56  ;;  %v2882_v2 = vmax.f32 %v2818_v58, 0.0  ;;  %v2740_v3 = vadd.f32 %v2739_v1, %v2482_v60 }
 0x41f   : >> { %2945 = vst [vmem:[%s5235_s2 + $0x1d0] sm:$0xff] %v2881_v61  ;;  %v3073_v4 = vadd.f32 %v3009_v57, %v2881_v61  ;;  %v2819_v5 = vadd.f32 %v5303_v8, %v2738_v63  ;;  %v2486_v6 = vpop.f32.mrb[62].mxu1 }
 0x420   : >> { %2946 = vst [vmem:[%s5235_s2 + $0x1d8] sm:$0xff] %v2882_v2  ;;  %v3074_v7 = vadd.f32 %v3010_v62, %v2882_v2  ;;  %v2820_v10 = vadd.f32 %v5307_v11, %v2740_v3  ;;  %v2743_v12 = vpop.f32.mrb[62].mxu0  ;;  %v2488_v13 = vpop.f32.mrb[63].mxu1 }
 0x421   : >> { %3137 = vst [vmem:[%s5734_s16 + $0x1d0] sm:$0xff] %v3073_v4  ;;  %v2883_v14 = vmax.f32 %v2819_v5, 0.0  ;;  %v2744_v16 = vadd.f32 %v2743_v12, %v2486_v6  ;;  %v2745_v17 = vpop.f32.mrb[63].mxu0 }
 0x422   : >> { %3138 = vst [vmem:[%s5734_s16 + $0x1d8] sm:$0xff] %v3074_v7  ;;  %v2884_v18 = vmax.f32 %v2820_v10, 0.0  ;;  %v2746_v46 = vadd.f32 %v2745_v17, %v2488_v13 }
 0x423   : >> { %2947 = vst [vmem:[%s5235_s2 + $0x1e0] sm:$0xff] %v2883_v14  ;;  %v3075_v19 = vadd.f32 %v3011_v9, %v2883_v14  ;;  %v2821_v20 = vadd.f32 %v5303_v8, %v2744_v16 }
 0x424   : >> { %2948 = vst [vmem:[%s5235_s2 + $0x1e8] sm:$0xff] %v2884_v18  ;;  %v3076_v21 = vadd.f32 %v3012_v15, %v2884_v18  ;;  %v2822_v50 = vadd.f32 %v5307_v11, %v2746_v46  ;;  %1358 = sbr.rel (!%p1356_p6) target bundleno = 462 (0x1ce), region = 160 }
 0x425   : >> { %3139 = vst [vmem:[%s5734_s16 + $0x1e0] sm:$0xff] %v3075_v19  ;;  %v2885_v23 = vmax.f32 %v2821_v20, 0.0 }
 0x426   : >> { %3140 = vst [vmem:[%s5734_s16 + $0x1e8] sm:$0xff] %v3076_v21  ;;  %v2886_v25 = vmax.f32 %v2822_v50, 0.0 }
 0x427   : >> { %2949 = vst [vmem:[%s5235_s2 + $0x1f0] sm:$0xff] %v2885_v23  ;;  %v3077_v26 = vadd.f32 %v3013_v22, %v2885_v23 }
 0x428   : >> { %2950 = vst [vmem:[%s5235_s2 + $0x1f8] sm:$0xff] %v2886_v25  ;;  %v3078_v27 = vadd.f32 %v3014_v24, %v2886_v25 }
 0x429   : >> { %3141 = vst [vmem:[%s5734_s16 + $0x1f0] sm:$0xff] %v3077_v26 }
 0x42a   : >> { %3142 = vst [vmem:[%s5734_s16 + $0x1f8] sm:$0xff] %v3078_v27 }
 0x42b   : > { %3975 = shalt.err (!%p3972_p3)
}
 0x42c   : > { %s3976_s8 = scalar_lea.hbm %s5572_s9, 8192  ;;  %s3980_s5 = scalar_lea.hbm %s5739_s20, 16384 }
 0x42d   : > { %p3977_p0 = scmp.ne.s32.totalorder %s5572_s9, %s3976_s8  ;;  %p3981_p9 = scmp.lt.u32.totalorder %s5572_s9, %s5739_s20 }
 0x42e   : > { %p3982_p13 = scmp.lt.u32.totalorder %s3980_s5, %s3976_s8  ;;  %p3984_p10 = scmp.lt.u32.totalorder %s3976_s8, %s5572_s9 }
 0x42f   : > { %p3978_p11 = pnand %p3977_p0, %p4260_p8 }
 0x430   : > { %p3983_p6 = por %p3982_p13, %p3981_p9 }
 0x431   : > { %p3979_p2 = pneg %p3978_p11 }
 0x432   : > { %p3985_p1 = por %p3984_p10, %p3983_p6 }
 0x434   : > { %p3986_p4 = pnand %p3985_p1, %p3979_p2 }
 0x436   : > { %3989 = shalt.err (!%p3986_p4)
}
 0x437   : > { %s4065_s13 = smov 256   ;;  %s4066_s18 = smov 16  }
 0x438   : > { %3753 = dma.vmem_to_hbm [thread:$0]  (%p4260_p8), %s5575_s17, 8192, %s5572_s9, %s3144_s25, %s4065_s13, %s4065_s13, %s4066_s18  }
 0x439 PF: > { %s5740_s4 = sld [smem:[#allocation20_spill]]  ;;  %s5741_s30 = sld [smem:[#allocation25_spill]] }
 0x43a   : > { %s5742_s21 = sld [smem:[#allocation23_spill]] }
 0x43f   : > { %s3173_s28 = sand.u32 1, %s5740_s4   ;;  %p5743_p5 = scmp.ne.s32.totalorder %s5741_s30, 0 }
 0x440   : > { %p5744_p7 = scmp.ge.s32.totalorder %s5742_s21, 2  ;;  %s3174_s1 = scalar_lea.sflag [#allocation8], %s3173_s28 }
 0x442   : > { %p3770_p12 = pnand %p5744_p7, %p5743_p5 }
 0x444   : > { %4029 = dma.done.wait (!%p3770_p12), %s3174_s1, 8192  }
 0x445   : > { %4031 = vsyncadd (!%p3770_p12), %s3174_s1, 4294959104  ;;  %s5745_s6 = sld [smem:[#allocation26_spill]]  ;;  %s5746_s28 = sld [smem:[#allocation21_spill]] }
 0x446   : > { %s5747_s29 = sld [smem:[#allocation22_spill]]  ;;  %s5748_s30 = sld [smem:[#allocation27_spill]] }
 0x44b   : > { %p24_p3 = scmp.ge.s32.totalorder %s5745_s6, 4  }
 0x44d   :  { %26 = sbr.rel (!%p24_p3) target bundleno = 20 (0x14), region = 171 }
 0x454   :  { %3179 = vsyncpa [#allocation7], 1 }
 0x455   :  { %3181 = vsyncpa [#allocation7 + $0x1], 1 }
 0x456   :  { %3182 = vsyncpa [#allocation10], 1 }
 0x457   :  { %3183 = vsyncpa [#allocation13], 1 }
 0x458   :  { %3184 = vsyncpa [#allocation8], 1 }
 0x459   :  { %3186 = vsyncpa [#allocation8 + $0x1], 1 }

</bundles_post_ra>
